<compile_context>
chip_gen: v6e
topology: v6e:2x2x1
jax: 0.10.0
libtpu: 0.0.40
codegen_flags: <defaults>
</compile_context>

<pallas_src>
import functools

import jax
import jax.numpy as jnp
from jax.experimental import pallas as pl
from jax.experimental.pallas import tpu as pltpu


def _round_up(x, m):
    return (x + m - 1) // m * m


def _featlift_kernel(img_w, img_h, chunk, n_chunks, wdtype,
                     proj_sm, pts_ref, fcat_ref, meta_ref, out_ref, vis_ref):
    """Per (batch, point-tile) step: perspective project -> visibility ->
    chunked bilinear grid_sample (one MXU matmul per 128-row SumHW chunk,
    pre_conv + bias folded into the features) -> visibility mask."""
    b = pl.program_id(0)
    pts = pts_ref[...]                        # (3, TP): points on the lane axis
    px = pts[0:1, :]
    py = pts[1:2, :]
    pz = pts[2:3, :]

    # perspective(): [hx, hy, hz]^T = proj(3x3) @ [x, y, z]^T (proj in SMEM)
    hx = px * proj_sm[b, 0] + py * proj_sm[b, 1] + pz * proj_sm[b, 2]
    hy = px * proj_sm[b, 3] + py * proj_sm[b, 4] + pz * proj_sm[b, 5]
    hz = px * proj_sm[b, 6] + py * proj_sm[b, 7] + pz * proj_sm[b, 8]
    inv_hz = pl.reciprocal(hz, approx=True)   # EUP; tiny precision change only
    img_x = hx * inv_hz                       # (1, TP)
    img_y = hy * inv_hz

    # TODO(synk): like the PyTorch reference there is no hz > 0 (behind-camera)
    # check; strict > 0 / < size bounds match the reference exactly.
    vis = ((img_x > 0.0) & (img_x < img_w) &
           (img_y > 0.0) & (img_y < img_h)).astype(jnp.float32)   # (1, TP)

    # normalized grid_sample coords, clamped like the reference; keep (n + 1)
    # so ix = aw*(n+1) with aw = 0.5*(W_l-1) is the align_corners=True unnorm.
    nx1 = jnp.clip(img_x * (2.0 / img_w) - 1.0, -1.0, 1.0) + 1.0  # (1, TP) f32
    ny1 = jnp.clip(img_y * (2.0 / img_h) - 1.0, -1.0, 1.0) + 1.0

    # Whole-block constants: features (Cd_pad, SumHW_pad) bf16 and packed
    # per-row metadata [hs, ah, ws, aw] (SumHW_pad, 4) f32 -- both tiny.
    f_all = fcat_ref[0]                       # (Cd_pad, SumHW_pad)
    m_all = meta_ref[...]                     # (SumHW_pad, 4)

    cd = out_ref.shape[1]
    tp = out_ref.shape[2]
    acc = jnp.zeros((cd, tp), jnp.float32)

    # Chunked separable-tent build + MXU accumulate.  Per chunk the live
    # temporaries are (chunk, TP) in wdtype, which keeps them (mostly) in vregs
    # instead of spilling the full (SumHW, TP) build to VMEM.
    for c in range(n_chunks):
        r0 = c * chunk                        # static, 128-aligned
        m = m_all[r0:r0 + chunk, :]           # (chunk, 4)
        hs = m[:, 0:1]
        ah = m[:, 1:2]
        ws = m[:, 2:3]
        aw = m[:, 3:4]
        # pixel-space offsets in f32 (accurate even for large H/W), tent in
        # wdtype (bf16 on v6e/v7x halves the dominant VALU work + spill bytes).
        dy = (hs - ah * ny1).astype(wdtype)   # (chunk, TP)
        dx = (ws - aw * nx1).astype(wdtype)
        wy = jnp.maximum(1.0 - jnp.abs(dy), 0.0)
        wx = jnp.maximum(1.0 - jnp.abs(dx), 0.0)
        wgt = (wy * wx).astype(jnp.bfloat16)  # (chunk, TP) MXU RHS
        fc = f_all[:, r0:r0 + chunk]          # (Cd_pad, chunk) bf16 MXU LHS
        acc = acc + jnp.dot(fc, wgt, preferred_element_type=jnp.float32)

    # Bias is already folded in as a weight==1 contraction row; mask last.
    acc = acc * vis                           # use_visible masking
    out_ref[0] = acc                          # lane-dense stores
    vis_ref[0] = vis


def featlifting_forward(K, RT, feat8, feat16, feat32, grid_pos, w_pre, b_pre,
                        img_width, img_height, *, point_tile=256,
                        weight_dtype=jnp.bfloat16):
    """weight_dtype: bf16 on v6e/v7x (bf16 VALU), pass jnp.float32 on v5e."""
    B = K.shape[0]
    X, Y, Z, _ = grid_pos.shape
    P = Y * X * Z
    Cd = w_pre.shape[1]
    Cd_pad = _round_up(Cd, 8)                 # 13 -> 16: sublane-aligned rows
    CHUNK = 128

    # proj = (K @ RT)[:, :3, :3]  (tiny; done in glue) -> SMEM scalar prefetch
    proj = jnp.einsum('bij,bjk->bik', K, RT)[:, :3, :3].reshape(B, 9)
    proj = proj.astype(jnp.float32)

    # voxel grid flattened in (Y, X, Z) order (grid_sample point order), with
    # coordinates on the sublane axis and points on the lane axis: (3, P)
    pts = jnp.transpose(grid_pos, (3, 1, 0, 2)).reshape(3, P).astype(jnp.float32)

    # Point tiling: lane-dense TP (multiple of 128), P padded up to TP multiple.
    TP = min(int(point_tile), _round_up(P, 128))
    TP = _round_up(TP, 128)
    P_pad = _round_up(P, TP)
    if P_pad > P:
        pts = jnp.pad(pts, ((0, 0), (0, P_pad - P)), mode="edge")
    NP = P_pad // TP

    # Fold pre_conv (1x1x1) into each level's features (zero-padded to Cd_pad),
    # keep channels-first, flatten spatially, concatenate levels.
    w_pad = jnp.zeros((w_pre.shape[0], Cd_pad), jnp.float32)
    w_pad = w_pad.at[:, :Cd].set(w_pre.astype(jnp.float32))
    bias_pad = jnp.zeros((Cd_pad,), jnp.float32).at[:Cd].set(
        b_pre.astype(jnp.float32))

    levels = [feat8, feat16, feat32]

    def pre_project(f):
        b, c, h, w = f.shape
        return jnp.einsum('bcs,cd->bds',
                          f.reshape(b, c, h * w).astype(jnp.float32),
                          w_pad)                              # (B, Cd_pad, H*W)

    f_cat = jnp.concatenate([pre_project(f) for f in levels], axis=-1)
    sum_hw = int(f_cat.shape[-1])

    # Per-row (pixel) metadata of the concatenated HW axis, packed as one
    # (rows, 4) array: [hs, ah, ws, aw] with ah = 0.5*(H_l-1), aw = 0.5*(W_l-1).
    meta_rows = []
    for f in levels:
        H, W = int(f.shape[2]), int(f.shape[3])
        hs = jnp.repeat(jnp.arange(H, dtype=jnp.float32), W)
        ws = jnp.tile(jnp.arange(W, dtype=jnp.float32), H)
        ah = jnp.full((H * W,), 0.5 * (H - 1), jnp.float32)
        aw = jnp.full((H * W,), 0.5 * (W - 1), jnp.float32)
        meta_rows.append(jnp.stack([hs, ah, ws, aw], axis=-1))
    meta = jnp.concatenate(meta_rows, axis=0)                 # (sum_hw, 4)

    # Fold the pre_conv bias into the matmul: one extra contraction row whose
    # tent weight is exactly 1 (hs=ah=ws=aw=0 -> wy=wx=1) and whose feature
    # column is the bias.
    meta = jnp.concatenate([meta, jnp.zeros((1, 4), jnp.float32)], axis=0)
    f_cat = jnp.concatenate(
        [f_cat, jnp.broadcast_to(bias_pad[None, :, None], (B, Cd_pad, 1))],
        axis=-1)

    # Pad the contraction axis to a CHUNK multiple; pad rows get weight 0
    # (hs=2, ah=0 -> wy=0) AND zero feature columns.
    rows = sum_hw + 1
    rows_pad = _round_up(rows, CHUNK)
    n_chunks = rows_pad // CHUNK
    if rows_pad > rows:
        pad_meta = jnp.tile(jnp.array([[2.0, 0.0, 2.0, 0.0]], jnp.float32),
                            (rows_pad - rows, 1))
        meta = jnp.concatenate([meta, pad_meta], axis=0)
        f_cat = jnp.concatenate(
            [f_cat, jnp.zeros((B, Cd_pad, rows_pad - rows), f_cat.dtype)],
            axis=-1)
    f_cat = f_cat.astype(jnp.bfloat16)                        # (B, Cd_pad, rows_pad)

    kernel = functools.partial(_featlift_kernel, float(img_width),
                               float(img_height), CHUNK, n_chunks, weight_dtype)

    grid_spec = pltpu.PrefetchScalarGridSpec(
        num_scalar_prefetch=1,                 # proj (B, 9) -> SMEM scalars
        grid=(B, NP),
        in_specs=[
            pl.BlockSpec((3, TP), lambda b, p, *_: (0, p)),               # pts
            pl.BlockSpec((1, Cd_pad, rows_pad), lambda b, p, *_: (b, 0, 0)),  # f_cat
            pl.BlockSpec((rows_pad, 4), lambda b, p, *_: (0, 0)),         # meta
        ],
        out_specs=[
            pl.BlockSpec((1, Cd_pad, TP), lambda b, p, *_: (b, 0, p)),
            pl.BlockSpec((1, 1, TP), lambda b, p, *_: (b, 0, p)),
        ],
    )

    cost = pl.CostEstimate(
        flops=int(2 * B * P_pad * rows_pad * Cd_pad + 9 * B * P_pad * rows_pad),
        transcendentals=int(B * P_pad),
        bytes_accessed=int(B * NP * Cd_pad * rows_pad * 2 + 3 * P_pad * 4
                           + rows_pad * 4 * 4 + B * P_pad * (Cd_pad + 1) * 4),
    )

    feat_out, vis_out = pl.pallas_call(
        kernel,
        grid_spec=grid_spec,
        out_shape=(jax.ShapeDtypeStruct((B, Cd_pad, P_pad), jnp.float32),
                   jax.ShapeDtypeStruct((B, 1, P_pad), jnp.float32)),
        compiler_params=pltpu.CompilerParams(
            dimension_semantics=("parallel", "parallel"),
            vmem_limit_bytes=32 * 1024 * 1024),   # fits the v7x 64 MiB budget
        cost_estimate=cost,
    )(proj, pts, f_cat, meta)

    # drop channel / point padding, back to PyTorch layout
    feat_out = feat_out[:, :Cd, :P]
    vis_out = vis_out[:, :, :P]
    feat_3d = feat_out.reshape(B, Cd, Y, X, Z).transpose(0, 1, 3, 2, 4)
    visible = vis_out.reshape(B, 1, Y, X, Z).transpose(0, 1, 3, 2, 4)

    # concat grid coordinates as 3 extra channels: (B, 3, X, Y, Z)
    grid_ch = jnp.broadcast_to(
        jnp.transpose(grid_pos, (3, 0, 1, 2))[None], (B, 3, X, Y, Z))
    feat_3d = jnp.concatenate([feat_3d, grid_ch], axis=1)     # (B, d_in, X, Y, Z)

    # TODO(synk): UNet3D(in_channels=d_in, out_channels=d_in, num_levels) comes
    # from an external library whose definition is not provided; it is not applied.
    return feat_3d, visible


if __name__ == "__main__":
    key = jax.random.PRNGKey(0)
    k1, k2, k3, k4, k5, k6 = jax.random.split(key, 6)

    B = 2
    X, Y, Z = 8, 8, 4
    d_in = 16
    C_in = 64
    img_width, img_height = 64.0, 48.0

    # self.grid_pos attribute: (X, Y, Z, 3) voxel-center coordinates
    xs = jnp.linspace(-2.0, 2.0, X)
    ys = jnp.linspace(-1.0, 1.0, Y)
    zs = jnp.linspace(1.0, 5.0, Z)
    gx, gy, gz = jnp.meshgrid(xs, ys, zs, indexing="ij")
    grid_pos = jnp.stack([gx, gy, gz], axis=-1).astype(jnp.float32)

    # camera intrinsics / extrinsics (B, 4, 4)
    K_base = jnp.array([[40.0, 0.0, 32.0, 0.0],
                        [0.0, 40.0, 24.0, 0.0],
                        [0.0, 0.0, 1.0, 0.0],
                        [0.0, 0.0, 0.0, 1.0]], jnp.float32)
    K = jnp.tile(K_base[None], (B, 1, 1))
    focal_jitter = 1.0 + 0.05 * jax.random.normal(k1, (B,), jnp.float32)
    K = K.at[:, 0, 0].multiply(focal_jitter).at[:, 1, 1].multiply(focal_jitter)
    RT = jnp.tile(jnp.eye(4, dtype=jnp.float32)[None], (B, 1, 1))

    feat8 = jax.random.normal(k2, (B, C_in, 16, 16), jnp.float32)
    feat16 = jax.random.normal(k3, (B, C_in, 8, 8), jnp.float32)
    feat32 = jax.random.normal(k4, (B, C_in, 4, 4), jnp.float32)

    # pre_conv parameters (deterministic synthetic init); stored as (C_in, C_out)
    w_pre = 0.05 * jax.random.normal(k5, (C_in, d_in - 3), jnp.float32)
    b_pre = 0.01 * jax.random.normal(k6, (d_in - 3,), jnp.float32)

    feat_3d, visible = featlifting_forward(
        K, RT, feat8, feat16, feat32, grid_pos, w_pre, b_pre,
        img_width, img_height)
    jax.block_until_ready((feat_3d, visible))

    assert feat_3d.shape == (B, d_in, X, Y, Z), feat_3d.shape
    assert visible.shape == (B, 1, X, Y, Z), visible.shape
    assert bool(jnp.all(jnp.isfinite(feat_3d))) and bool(jnp.all(jnp.isfinite(visible)))
    print("KERNEL_OK")
</pallas_src>

<mosaic_0001>
module attributes {stable_mosaic.version = 11 : i64} {
  func.func @_featlift_kernel(%arg0: i32, %arg1: i32, %arg2: memref<2x9xf32, #tpu.memory_space<smem>>, %arg3: memref<3x256xf32, #tpu.memory_space<vmem>>, %arg4: memref<1x16x384xbf16, #tpu.memory_space<vmem>>, %arg5: memref<384x4xf32, #tpu.memory_space<vmem>>, %arg6: memref<1x16x256xf32, #tpu.memory_space<vmem>>, %arg7: memref<1x1x256xf32, #tpu.memory_space<vmem>>) attributes {dimension_semantics = [#tpu.dimension_semantics<parallel>, #tpu.dimension_semantics<parallel>], iteration_bounds = array<i64: 2, 1>, scalar_prefetch = 1 : i64, scratch_operands = 0 : i64, tpu.core_type = #tpu.core_type<tc>, window_params = [{transform_indices = @transform_0, window_bounds = array<i64: 3, 256>}, {transform_indices = @transform_1, window_bounds = array<i64: 1, 16, 384>}, {pipeline_mode = #tpu.pipeline_mode<synchronous>, transform_indices = @transform_2, window_bounds = array<i64: 384, 4>}, {transform_indices = @transform_3, window_bounds = array<i64: 1, 16, 256>}, {transform_indices = @transform_4, window_bounds = array<i64: 1, 1, 256>}]} {
    %c0 = arith.constant 0 : index
    %c0_0 = arith.constant 0 : index
    %0 = vector.load %arg3[%c0, %c0_0] : memref<3x256xf32, #tpu.memory_space<vmem>>, vector<3x256xf32>
    %1 = vector.extract_strided_slice %0 {offsets = [0, 0], sizes = [1, 256], strides = [1, 1]} : vector<3x256xf32> to vector<1x256xf32>
    %2 = vector.extract_strided_slice %0 {offsets = [1, 0], sizes = [1, 256], strides = [1, 1]} : vector<3x256xf32> to vector<1x256xf32>
    %3 = vector.extract_strided_slice %0 {offsets = [2, 0], sizes = [1, 256], strides = [1, 1]} : vector<3x256xf32> to vector<1x256xf32>
    %4 = arith.index_cast %arg0 : i32 to index
    %c0_1 = arith.constant 0 : index
    %5 = memref.load %arg2[%4, %c0_1] : memref<2x9xf32, #tpu.memory_space<smem>>
    %6 = vector.broadcast %5 : f32 to vector<1x256xf32>
    %7 = arith.mulf %1, %6 : vector<1x256xf32>
    %8 = arith.index_cast %arg0 : i32 to index
    %c1 = arith.constant 1 : index
    %9 = memref.load %arg2[%8, %c1] : memref<2x9xf32, #tpu.memory_space<smem>>
    %10 = vector.broadcast %9 : f32 to vector<1x256xf32>
    %11 = arith.mulf %2, %10 : vector<1x256xf32>
    %12 = arith.addf %7, %11 : vector<1x256xf32>
    %13 = arith.index_cast %arg0 : i32 to index
    %c2 = arith.constant 2 : index
    %14 = memref.load %arg2[%13, %c2] : memref<2x9xf32, #tpu.memory_space<smem>>
    %15 = vector.broadcast %14 : f32 to vector<1x256xf32>
    %16 = arith.mulf %3, %15 : vector<1x256xf32>
    %17 = arith.addf %12, %16 : vector<1x256xf32>
    %18 = arith.index_cast %arg0 : i32 to index
    %c3 = arith.constant 3 : index
    %19 = memref.load %arg2[%18, %c3] : memref<2x9xf32, #tpu.memory_space<smem>>
    %20 = vector.broadcast %19 : f32 to vector<1x256xf32>
    %21 = arith.mulf %1, %20 : vector<1x256xf32>
    %22 = arith.index_cast %arg0 : i32 to index
    %c4 = arith.constant 4 : index
    %23 = memref.load %arg2[%22, %c4] : memref<2x9xf32, #tpu.memory_space<smem>>
    %24 = vector.broadcast %23 : f32 to vector<1x256xf32>
    %25 = arith.mulf %2, %24 : vector<1x256xf32>
    %26 = arith.addf %21, %25 : vector<1x256xf32>
    %27 = arith.index_cast %arg0 : i32 to index
    %c5 = arith.constant 5 : index
    %28 = memref.load %arg2[%27, %c5] : memref<2x9xf32, #tpu.memory_space<smem>>
    %29 = vector.broadcast %28 : f32 to vector<1x256xf32>
    %30 = arith.mulf %3, %29 : vector<1x256xf32>
    %31 = arith.addf %26, %30 : vector<1x256xf32>
    %32 = arith.index_cast %arg0 : i32 to index
    %c6 = arith.constant 6 : index
    %33 = memref.load %arg2[%32, %c6] : memref<2x9xf32, #tpu.memory_space<smem>>
    %34 = vector.broadcast %33 : f32 to vector<1x256xf32>
    %35 = arith.mulf %1, %34 : vector<1x256xf32>
    %36 = arith.index_cast %arg0 : i32 to index
    %c7 = arith.constant 7 : index
    %37 = memref.load %arg2[%36, %c7] : memref<2x9xf32, #tpu.memory_space<smem>>
    %38 = vector.broadcast %37 : f32 to vector<1x256xf32>
    %39 = arith.mulf %2, %38 : vector<1x256xf32>
    %40 = arith.addf %35, %39 : vector<1x256xf32>
    %41 = arith.index_cast %arg0 : i32 to index
    %c8 = arith.constant 8 : index
    %42 = memref.load %arg2[%41, %c8] : memref<2x9xf32, #tpu.memory_space<smem>>
    %43 = vector.broadcast %42 : f32 to vector<1x256xf32>
    %44 = arith.mulf %3, %43 : vector<1x256xf32>
    %45 = arith.addf %40, %44 : vector<1x256xf32>
    %46 = tpu.reciprocal %45 {approx = true} : vector<1x256xf32> -> vector<1x256xf32>
    %47 = arith.mulf %17, %46 : vector<1x256xf32>
    %48 = arith.mulf %31, %46 : vector<1x256xf32>
    %cst = arith.constant 0.000000e+00 : f32
    %49 = vector.broadcast %cst : f32 to vector<1x256xf32>
    %50 = arith.cmpf ogt, %47, %49 : vector<1x256xf32>
    %cst_2 = arith.constant 6.400000e+01 : f32
    %51 = vector.broadcast %cst_2 : f32 to vector<1x256xf32>
    %52 = arith.cmpf olt, %47, %51 : vector<1x256xf32>
    %53 = arith.andi %50, %52 : vector<1x256xi1>
    %cst_3 = arith.constant 0.000000e+00 : f32
    %54 = vector.broadcast %cst_3 : f32 to vector<1x256xf32>
    %55 = arith.cmpf ogt, %48, %54 : vector<1x256xf32>
    %56 = arith.andi %53, %55 : vector<1x256xi1>
    %cst_4 = arith.constant 4.800000e+01 : f32
    %57 = vector.broadcast %cst_4 : f32 to vector<1x256xf32>
    %58 = arith.cmpf olt, %48, %57 : vector<1x256xf32>
    %59 = arith.andi %56, %58 : vector<1x256xi1>
    %60 = arith.extui %59 : vector<1x256xi1> to vector<1x256xi32>
    %61 = arith.sitofp %60 : vector<1x256xi32> to vector<1x256xf32>
    %cst_5 = arith.constant 3.125000e-02 : f32
    %62 = vector.broadcast %cst_5 : f32 to vector<1x256xf32>
    %63 = arith.mulf %47, %62 : vector<1x256xf32>
    %cst_6 = arith.constant 1.000000e+00 : f32
    %64 = vector.broadcast %cst_6 : f32 to vector<1x256xf32>
    %65 = arith.subf %63, %64 : vector<1x256xf32>
    %cst_7 = arith.constant -1.000000e+00 : f32
    %cst_8 = arith.constant 1.000000e+00 : f32
    %66 = vector.broadcast %cst_7 : f32 to vector<1x256xf32>
    %67 = arith.maximumf %66, %65 : vector<1x256xf32>
    %68 = vector.broadcast %cst_8 : f32 to vector<1x256xf32>
    %69 = arith.minimumf %68, %67 : vector<1x256xf32>
    %cst_9 = arith.constant 1.000000e+00 : f32
    %70 = vector.broadcast %cst_9 : f32 to vector<1x256xf32>
    %71 = arith.addf %69, %70 : vector<1x256xf32>
    %cst_10 = arith.constant 0.0416666679 : f32
    %72 = vector.broadcast %cst_10 : f32 to vector<1x256xf32>
    %73 = arith.mulf %48, %72 : vector<1x256xf32>
    %cst_11 = arith.constant 1.000000e+00 : f32
    %74 = vector.broadcast %cst_11 : f32 to vector<1x256xf32>
    %75 = arith.subf %73, %74 : vector<1x256xf32>
    %cst_12 = arith.constant -1.000000e+00 : f32
    %cst_13 = arith.constant 1.000000e+00 : f32
    %76 = vector.broadcast %cst_12 : f32 to vector<1x256xf32>
    %77 = arith.maximumf %76, %75 : vector<1x256xf32>
    %78 = vector.broadcast %cst_13 : f32 to vector<1x256xf32>
    %79 = arith.minimumf %78, %77 : vector<1x256xf32>
    %cst_14 = arith.constant 1.000000e+00 : f32
    %80 = vector.broadcast %cst_14 : f32 to vector<1x256xf32>
    %81 = arith.addf %79, %80 : vector<1x256xf32>
    %c0_15 = arith.constant 0 : index
    %c0_16 = arith.constant 0 : index
    %c0_17 = arith.constant 0 : index
    %82 = vector.load %arg4[%c0_15, %c0_16, %c0_17] : memref<1x16x384xbf16, #tpu.memory_space<vmem>>, vector<1x16x384xbf16>
    %83 = vector.shape_cast %82 : vector<1x16x384xbf16> to vector<16x384xbf16>
    %c0_18 = arith.constant 0 : index
    %c0_19 = arith.constant 0 : index
    %84 = vector.load %arg5[%c0_18, %c0_19] : memref<384x4xf32, #tpu.memory_space<vmem>>, vector<384x4xf32>
    %cst_20 = arith.constant 0.000000e+00 : f32
    %85 = vector.broadcast %cst_20 : f32 to vector<16x256xf32>
    %86 = vector.extract_strided_slice %84 {offsets = [0, 0], sizes = [128, 4], strides = [1, 1]} : vector<384x4xf32> to vector<128x4xf32>
    %87 = vector.extract_strided_slice %86 {offsets = [0, 0], sizes = [128, 1], strides = [1, 1]} : vector<128x4xf32> to vector<128x1xf32>
    %88 = vector.extract_strided_slice %86 {offsets = [0, 1], sizes = [128, 1], strides = [1, 1]} : vector<128x4xf32> to vector<128x1xf32>
    %89 = vector.extract_strided_slice %86 {offsets = [0, 2], sizes = [128, 1], strides = [1, 1]} : vector<128x4xf32> to vector<128x1xf32>
    %90 = vector.extract_strided_slice %86 {offsets = [0, 3], sizes = [128, 1], strides = [1, 1]} : vector<128x4xf32> to vector<128x1xf32>
    %91 = vector.broadcast %88 : vector<128x1xf32> to vector<128x256xf32>
    %92 = vector.broadcast %81 : vector<1x256xf32> to vector<128x256xf32>
    %93 = arith.mulf %91, %92 : vector<128x256xf32>
    %94 = vector.broadcast %87 : vector<128x1xf32> to vector<128x256xf32>
    %95 = arith.subf %94, %93 : vector<128x256xf32>
    %96 = arith.truncf %95 : vector<128x256xf32> to vector<128x256xbf16>
    %97 = vector.broadcast %90 : vector<128x1xf32> to vector<128x256xf32>
    %98 = vector.broadcast %71 : vector<1x256xf32> to vector<128x256xf32>
    %99 = arith.mulf %97, %98 : vector<128x256xf32>
    %100 = vector.broadcast %89 : vector<128x1xf32> to vector<128x256xf32>
    %101 = arith.subf %100, %99 : vector<128x256xf32>
    %102 = arith.truncf %101 : vector<128x256xf32> to vector<128x256xbf16>
    %103 = math.absf %96 : vector<128x256xbf16>
    %cst_21 = arith.constant 1.000000e+00 : bf16
    %104 = vector.broadcast %cst_21 : bf16 to vector<128x256xbf16>
    %105 = arith.subf %104, %103 : vector<128x256xbf16>
    %cst_22 = arith.constant 0.000000e+00 : bf16
    %106 = vector.broadcast %cst_22 : bf16 to vector<128x256xbf16>
    %107 = arith.maximumf %105, %106 : vector<128x256xbf16>
    %108 = math.absf %102 : vector<128x256xbf16>
    %cst_23 = arith.constant 1.000000e+00 : bf16
    %109 = vector.broadcast %cst_23 : bf16 to vector<128x256xbf16>
    %110 = arith.subf %109, %108 : vector<128x256xbf16>
    %cst_24 = arith.constant 0.000000e+00 : bf16
    %111 = vector.broadcast %cst_24 : bf16 to vector<128x256xbf16>
    %112 = arith.maximumf %110, %111 : vector<128x256xbf16>
    %113 = arith.mulf %107, %112 : vector<128x256xbf16>
    %114 = vector.extract_strided_slice %83 {offsets = [0, 0], sizes = [16, 128], strides = [1, 1]} : vector<16x384xbf16> to vector<16x128xbf16>
    %cst_25 = arith.constant dense<0.000000e+00> : vector<16x256xf32>
    %115 = tpu.matmul %114, %113, %cst_25 {dimension_numbers = #tpu.dot_dimension_numbers<[1], [0], [0], [1], [0, 0, 1, 1], [], []>} : vector<16x128xbf16>, vector<128x256xbf16>, vector<16x256xf32> -> vector<16x256xf32>
    %116 = arith.addf %85, %115 : vector<16x256xf32>
    %117 = vector.extract_strided_slice %84 {offsets = [128, 0], sizes = [128, 4], strides = [1, 1]} : vector<384x4xf32> to vector<128x4xf32>
    %118 = vector.extract_strided_slice %117 {offsets = [0, 0], sizes = [128, 1], strides = [1, 1]} : vector<128x4xf32> to vector<128x1xf32>
    %119 = vector.extract_strided_slice %117 {offsets = [0, 1], sizes = [128, 1], strides = [1, 1]} : vector<128x4xf32> to vector<128x1xf32>
    %120 = vector.extract_strided_slice %117 {offsets = [0, 2], sizes = [128, 1], strides = [1, 1]} : vector<128x4xf32> to vector<128x1xf32>
    %121 = vector.extract_strided_slice %117 {offsets = [0, 3], sizes = [128, 1], strides = [1, 1]} : vector<128x4xf32> to vector<128x1xf32>
    %122 = vector.broadcast %119 : vector<128x1xf32> to vector<128x256xf32>
    %123 = vector.broadcast %81 : vector<1x256xf32> to vector<128x256xf32>
    %124 = arith.mulf %122, %123 : vector<128x256xf32>
    %125 = vector.broadcast %118 : vector<128x1xf32> to vector<128x256xf32>
    %126 = arith.subf %125, %124 : vector<128x256xf32>
    %127 = arith.truncf %126 : vector<128x256xf32> to vector<128x256xbf16>
    %128 = vector.broadcast %121 : vector<128x1xf32> to vector<128x256xf32>
    %129 = vector.broadcast %71 : vector<1x256xf32> to vector<128x256xf32>
    %130 = arith.mulf %128, %129 : vector<128x256xf32>
    %131 = vector.broadcast %120 : vector<128x1xf32> to vector<128x256xf32>
    %132 = arith.subf %131, %130 : vector<128x256xf32>
    %133 = arith.truncf %132 : vector<128x256xf32> to vector<128x256xbf16>
    %134 = math.absf %127 : vector<128x256xbf16>
    %cst_26 = arith.constant 1.000000e+00 : bf16
    %135 = vector.broadcast %cst_26 : bf16 to vector<128x256xbf16>
    %136 = arith.subf %135, %134 : vector<128x256xbf16>
    %cst_27 = arith.constant 0.000000e+00 : bf16
    %137 = vector.broadcast %cst_27 : bf16 to vector<128x256xbf16>
    %138 = arith.maximumf %136, %137 : vector<128x256xbf16>
    %139 = math.absf %133 : vector<128x256xbf16>
    %cst_28 = arith.constant 1.000000e+00 : bf16
    %140 = vector.broadcast %cst_28 : bf16 to vector<128x256xbf16>
    %141 = arith.subf %140, %139 : vector<128x256xbf16>
    %cst_29 = arith.constant 0.000000e+00 : bf16
    %142 = vector.broadcast %cst_29 : bf16 to vector<128x256xbf16>
    %143 = arith.maximumf %141, %142 : vector<128x256xbf16>
    %144 = arith.mulf %138, %143 : vector<128x256xbf16>
    %145 = vector.extract_strided_slice %83 {offsets = [0, 128], sizes = [16, 128], strides = [1, 1]} : vector<16x384xbf16> to vector<16x128xbf16>
    %cst_30 = arith.constant dense<0.000000e+00> : vector<16x256xf32>
    %146 = tpu.matmul %145, %144, %cst_30 {dimension_numbers = #tpu.dot_dimension_numbers<[1], [0], [0], [1], [0, 0, 1, 1], [], []>} : vector<16x128xbf16>, vector<128x256xbf16>, vector<16x256xf32> -> vector<16x256xf32>
    %147 = arith.addf %116, %146 : vector<16x256xf32>
    %148 = vector.extract_strided_slice %84 {offsets = [256, 0], sizes = [128, 4], strides = [1, 1]} : vector<384x4xf32> to vector<128x4xf32>
    %149 = vector.extract_strided_slice %148 {offsets = [0, 0], sizes = [128, 1], strides = [1, 1]} : vector<128x4xf32> to vector<128x1xf32>
    %150 = vector.extract_strided_slice %148 {offsets = [0, 1], sizes = [128, 1], strides = [1, 1]} : vector<128x4xf32> to vector<128x1xf32>
    %151 = vector.extract_strided_slice %148 {offsets = [0, 2], sizes = [128, 1], strides = [1, 1]} : vector<128x4xf32> to vector<128x1xf32>
    %152 = vector.extract_strided_slice %148 {offsets = [0, 3], sizes = [128, 1], strides = [1, 1]} : vector<128x4xf32> to vector<128x1xf32>
    %153 = vector.broadcast %150 : vector<128x1xf32> to vector<128x256xf32>
    %154 = vector.broadcast %81 : vector<1x256xf32> to vector<128x256xf32>
    %155 = arith.mulf %153, %154 : vector<128x256xf32>
    %156 = vector.broadcast %149 : vector<128x1xf32> to vector<128x256xf32>
    %157 = arith.subf %156, %155 : vector<128x256xf32>
    %158 = arith.truncf %157 : vector<128x256xf32> to vector<128x256xbf16>
    %159 = vector.broadcast %152 : vector<128x1xf32> to vector<128x256xf32>
    %160 = vector.broadcast %71 : vector<1x256xf32> to vector<128x256xf32>
    %161 = arith.mulf %159, %160 : vector<128x256xf32>
    %162 = vector.broadcast %151 : vector<128x1xf32> to vector<128x256xf32>
    %163 = arith.subf %162, %161 : vector<128x256xf32>
    %164 = arith.truncf %163 : vector<128x256xf32> to vector<128x256xbf16>
    %165 = math.absf %158 : vector<128x256xbf16>
    %cst_31 = arith.constant 1.000000e+00 : bf16
    %166 = vector.broadcast %cst_31 : bf16 to vector<128x256xbf16>
    %167 = arith.subf %166, %165 : vector<128x256xbf16>
    %cst_32 = arith.constant 0.000000e+00 : bf16
    %168 = vector.broadcast %cst_32 : bf16 to vector<128x256xbf16>
    %169 = arith.maximumf %167, %168 : vector<128x256xbf16>
    %170 = math.absf %164 : vector<128x256xbf16>
    %cst_33 = arith.constant 1.000000e+00 : bf16
    %171 = vector.broadcast %cst_33 : bf16 to vector<128x256xbf16>
    %172 = arith.subf %171, %170 : vector<128x256xbf16>
    %cst_34 = arith.constant 0.000000e+00 : bf16
    %173 = vector.broadcast %cst_34 : bf16 to vector<128x256xbf16>
    %174 = arith.maximumf %172, %173 : vector<128x256xbf16>
    %175 = arith.mulf %169, %174 : vector<128x256xbf16>
    %176 = vector.extract_strided_slice %83 {offsets = [0, 256], sizes = [16, 128], strides = [1, 1]} : vector<16x384xbf16> to vector<16x128xbf16>
    %cst_35 = arith.constant dense<0.000000e+00> : vector<16x256xf32>
    %177 = tpu.matmul %176, %175, %cst_35 {dimension_numbers = #tpu.dot_dimension_numbers<[1], [0], [0], [1], [0, 0, 1, 1], [], []>} : vector<16x128xbf16>, vector<128x256xbf16>, vector<16x256xf32> -> vector<16x256xf32>
    %178 = arith.addf %147, %177 : vector<16x256xf32>
    %179 = vector.broadcast %61 : vector<1x256xf32> to vector<16x256xf32>
    %180 = arith.mulf %178, %179 : vector<16x256xf32>
    %c0_36 = arith.constant 0 : index
    %c0_37 = arith.constant 0 : index
    %c0_38 = arith.constant 0 : index
    %181 = vector.load %arg6[%c0_36, %c0_37, %c0_38] : memref<1x16x256xf32, #tpu.memory_space<vmem>>, vector<1x16x256xf32>
    %182 = vector.shape_cast %181 : vector<1x16x256xf32> to vector<16x256xf32>
    %183 = vector.shape_cast %180 : vector<16x256xf32> to vector<1x16x256xf32>
    tpu.vector_store %arg6[%c0_36, %c0_37, %c0_38], %183 {strides = array<i32>} : memref<1x16x256xf32, #tpu.memory_space<vmem>>, vector<1x16x256xf32>,
    %c0_39 = arith.constant 0 : index
    %c0_40 = arith.constant 0 : index
    %c0_41 = arith.constant 0 : index
    %184 = vector.load %arg7[%c0_39, %c0_40, %c0_41] : memref<1x1x256xf32, #tpu.memory_space<vmem>>, vector<1x1x256xf32>
    %185 = vector.shape_cast %184 : vector<1x1x256xf32> to vector<1x256xf32>
    %186 = vector.shape_cast %61 : vector<1x256xf32> to vector<1x1x256xf32>
    tpu.vector_store %arg7[%c0_39, %c0_40, %c0_41], %186 {strides = array<i32>} : memref<1x1x256xf32, #tpu.memory_space<vmem>>, vector<1x1x256xf32>,
    return
  }
  func.func @transform_0(%arg0: i32, %arg1: i32, %arg2: memref<2x9xf32, #tpu.memory_space<smem>>) -> (i32, i32) {
    %c0_i32 = arith.constant 0 : i32
    %c0_i32_0 = arith.constant 0 : i32
    return %c0_i32, %arg1 : i32, i32
  }
  func.func @transform_1(%arg0: i32, %arg1: i32, %arg2: memref<2x9xf32, #tpu.memory_space<smem>>) -> (i32, i32, i32) {
    %c0_i32 = arith.constant 0 : i32
    %c0_i32_0 = arith.constant 0 : i32
    %c0_i32_1 = arith.constant 0 : i32
    return %arg0, %c0_i32, %c0_i32_0 : i32, i32, i32
  }
  func.func @transform_2(%arg0: i32, %arg1: i32, %arg2: memref<2x9xf32, #tpu.memory_space<smem>>) -> (i32, i32) {
    %c0_i32 = arith.constant 0 : i32
    %c0_i32_0 = arith.constant 0 : i32
    %c0_i32_1 = arith.constant 0 : i32
    return %c0_i32, %c0_i32_0 : i32, i32
  }
  func.func @transform_3(%arg0: i32, %arg1: i32, %arg2: memref<2x9xf32, #tpu.memory_space<smem>>) -> (i32, i32, i32) {
    %c0_i32 = arith.constant 0 : i32
    %c0_i32_0 = arith.constant 0 : i32
    return %arg0, %c0_i32, %arg1 : i32, i32, i32
  }
  func.func @transform_4(%arg0: i32, %arg1: i32, %arg2: memref<2x9xf32, #tpu.memory_space<smem>>) -> (i32, i32, i32) {
    %c0_i32 = arith.constant 0 : i32
    %c0_i32_0 = arith.constant 0 : i32
    return %arg0, %c0_i32, %arg1 : i32, i32, i32
  }
}

</mosaic_0001>

<bundles_post_ra>
// kernel: tpu_custom_call.1
= control target key start
LH: loop header
LB: loop body
LE: loop exit
PB: predicated region body
PF: predicated region fallthrough
CT: control target
= control target key end

     0   :  { %s4756_s0 = inlined_call_operand.vmem [shape: f32[2,9], index: 0, kind: input, shape index: {}]   ;;  %s4757_s1 = inlined_call_operand.vmem [shape: f32[3,256], index: 1, kind: input, shape index: {}]   ;;  %s4758_s2 = inlined_call_operand.vmem [shape: bf16[2,16,384], index: 2, kind: input, shape index: {}]   ;;  %s4759_s3 = inlined_call_operand.vmem [shape: f32[384,4], index: 3, kind: input, shape index: {}]   ;;  %s4760_s4 = inlined_call_operand.hbm [shape: f32[2,16,256], index: 4, kind: output, shape index: {0}]   ;;  %s4761_s5 = inlined_call_operand.hbm [shape: f32[2,1,256], index: 5, kind: output, shape index: {1}]  }
   0x1   :  { %s11_s20 = sshll.u32 %s4756_s0, 4  ;;  %s12_s20 = int_to_ptr.vmem [resolvable:$true] %s11_s20 }
   0x2   :  { %s2595_s21 = scalar_lea.vmem %s12_s20, 32  ;;  %p2600_p1 = scmp.lt.s32.totalorder %s12_s20, %s12_s20 }
   0x3   :  { %p2596_p0 = scmp.ne.s32.totalorder %s12_s20, %s2595_s21  ;;  %p2601_p2 = scmp.lt.s32.totalorder %s2595_s21, %s2595_s21 }
   0x5   :  { %p2602_p3 = por %p2601_p2, %p2600_p1 }
   0x7   :  { %p2603_p4 = pnand %p2602_p3, %p2596_p0 }
   0x9   :  { %2606 = shalt.err (!%p2603_p4)  }
   0xa   :  { %s2717_s22 = smov [#allocation3]  }
   0xb   :  { %14 = dma.vmem_to_smem %s12_s20, 32, %s2717_s22, [#allocation2] }
   0xc   :  { %2683 = dma.done.wait [#allocation2], 32 }
   0xd   :  { %2684 = vsyncadd [#allocation2], 4294967264 }
   0xe   :  { %16 = sfence }
   0xf   :  { %17 = vsyncpa [#allocation5], 0 }
  0x10   :  { %19 = vsyncpa [#allocation5 + $0x1], 0 }
  0x11   :  { %20 = vsyncpa [#allocation7], 0 }
  0x12   :  { %22 = vsyncpa [#allocation7 + $0x1], 0  ;;  %s2761_s23 = smov 0   ;;  %s2763_s0 = smov 0  }
  0x13   :  { %s2765_s24 = smov 0   ;;  %s2767_s25 = smov 0  }
  0x14   :  { %s2769_s26 = smov 0   ;;  %s2771_s27 = smov 0  }
  0x15 LB: > { %s2423_s28 = sadd.s32 4294967295, %s2715_s27   ;;  %s2424_s29 = sadd.s32 4294967294, %s2715_s27   ;;  %s2715_s27 = sphi %s2771_s27, %s28_s27   ;;  %s2711_s26 = sphi %s2769_s26, %s5260_s26   ;;  %s2707_s25 = sphi %s2767_s25, %s5259_s25   ;;  %s2703_s24 = sphi %s2765_s24, %s5258_s24   ;;  %s2699_s0 = sphi %s2763_s0, %s5257_s0   ;;  %s2695_s23 = sphi %s2761_s23, %s5256_s23  }
  0x16   : > { %s40_s30 = sadd.s32 1, %s2711_s26  ;;  %s122_s6 = sadd.s32 1, %s2703_s24 }
  0x17   : > { %p42_p5 = scmp.ge.s32.totalorder %s40_s30, 2  ;;  %p132_p6 = scmp.ne.s32.totalorder %s2703_s24, %s2699_s0 }
  0x18   : > { %p133_p7 = scmp.eq.s32.totalorder %s2423_s28, 1  ;;  %p138_p8 = scmp.ne.s32.totalorder %s2699_s0, %s2695_s23 }
  0x19   : > { %s5262_s30 = smov (%p42_p5, %s40_s30), 0  ;;  %p139_p10 = scmp.eq.s32.totalorder %s2424_s29, 1 }
  0x1a   : > { %p2801_p9 = por %p133_p7, %p132_p6  ;;  %s117_s8 = ssub.s32 %s2711_s26, %s5262_s30 }
  0x1b   : > { %p2428_p11 = scmp.ge.s32.totalorder %s2715_s27, 1  ;;  %p120_p12 = scmp.eq.s32.totalorder %s117_s8, 0 }
  0x1c   : > { %p2808_p13 = por %p139_p10, %p138_p8  ;;  %p205_p0 = scmp.lt.s32.totalorder %s2715_s27, 3 }
  0x1d   : > { %s2814_s10 = scalar_select %p120_p12, %s2703_s24, %s122_s6  }
  0x1e   : > { %p206_p1 = pnand %p2428_p11, %p205_p0 }
  0x20   : > { %209 = sbr.rel (%p206_p1) target bundleno = 890 (0x37a), region = 32 }
  0x25   : > { %v2819_v0 = vld [vmem:[%s4759_s3 + $0x10] sm:$0xff]  ;;  %v2824_v1 = vld [vmem:[%s4759_s3 + $0x8] sm:$0xff]  ;;  %v4768_v2 = vmov 3   ;;  %v4764_v3 = vmov 1   ;;  %v2833_v4 = vld [vmem:[%s4759_s3 + $0x18] sm:$0xff]  ;;  %v4762_v6 = vmov 0  }
  0x26   : > { %2530 = vset.pattern.permute.xlu0 %v4768_v2  ;;  %2527 = vset.pattern.permute.xlu1 %v4764_v3  ;;  %v2838_v5 = vld [vmem:[%s4759_s3 + $0x20] sm:$0xff]  ;;  %v2847_v7 = vld [vmem:[%s4759_s3 + $0x28] sm:$0xff]  ;;  %v2852_v8 = vld [vmem:[%s4759_s3 + $0x30] sm:$0xff]  ;;  %v4766_v30 = vmov 2   ;;  %s3154_s17 = sshll.u32 %s2707_s25, 7  ;;  %p247_p2 = scmp.lt.s32.totalorder %s2707_s25, 1 }
  0x27   : > { %409 = vperm.xlu1 %2527, %v2819_v0   ;;  %645 = vperm.xlu0 %2530, %v2824_v1   ;;  %v2859_v9 = vld [vmem:[%s4759_s3 + $0x38] sm:$0xff]  ;;  %v2864_v10 = vld [vmem:[%s4759_s3 + $0x40] sm:$0xff]  ;;  %v2871_v11 = vld [vmem:[%s4759_s3 + $0x48] sm:$0xff]  ;;  %s305_s20 = sadd.s32 7, %s3154_s17  ;;  %s301_s21 = sadd.s32 6, %s3154_s17 }
  0x28   : > { %1561 = vmatprep.mubr.bf16.mxu0 %v4762_v6  ;;  %1608 = vmatprep.mubr.bf16.mxu1 %v4762_v6  ;;  %v2876_v12 = vld [vmem:[%s4759_s3 + $0x50] sm:$0xff]  ;;  %v2883_v13 = vld [vmem:[%s4759_s3 + $0x58] sm:$0xff]  ;;  %v2888_v14 = vld [vmem:[%s4759_s3 + $0x60] sm:$0xff]  ;;  %s306_s22 = sld [smem:[#allocation3 + %s305_s20]]  ;;  %s314_s28 = sadd.s32 8, %s3154_s17 }
  0x29   : > { %v2895_v15 = vld [vmem:[%s4759_s3 + $0x68] sm:$0xff]  ;;  %v2900_v16 = vld [vmem:[%s4759_s3 + $0x70] sm:$0xff]  ;;  %v2907_v17 = vld [vmem:[%s4759_s3 + $0x78] sm:$0xff]  ;;  %s302_s8 = sld [smem:[#allocation3 + %s301_s21]]  ;;  %s283_s19 = sadd.s32 4, %s3154_s17 }
  0x2a   : > { %v2912_v18 = vld [vmem:[%s4759_s3 + $0x88] sm:$0xff]  ;;  %v2919_v19 = vld [vmem:[%s4759_s3 + $0xa0] sm:$0xff]  ;;  %v2927_v20 = vld [vmem:[%s4759_s3 + $0xb0] sm:$0xff]  ;;  %s315_s11 = sld [smem:[#allocation3 + %s314_s28]]  ;;  %s292_s29 = sadd.s32 5, %s3154_s17 }
  0x2b   : > { %414 = vperm.xlu1 %2527, %v2833_v4   ;;  %657 = vperm.xlu0 %2530, %v2838_v5   ;;  %v2934_v21 = vld [vmem:[%s4759_s3 + $0xc0] sm:$0xff]  ;;  %v2941_v22 = vld [vmem:[%s4759_s3 + $0xf0] sm:$0xff]  ;;  %v2948_v23 = vld [vmem:[%s4759_s3 + $0xe8] sm:$0xff]  ;;  %s284_s28 = sld [smem:[#allocation3 + %s283_s19]]  ;;  %s261_s13 = sadd.s32 1, %s3154_s17 }
  0x2c   : > { %v2955_v24 = vld [vmem:[%s4759_s3 + $0xd0] sm:$0xff]  ;;  %v2962_v25 = vld [vmem:[%s4759_s3] sm:$0xff]  ;;  %v2992_v27 = vld [vmem:[%s4759_s3 + $0x98] sm:$0xff]  ;;  %s293_s12 = sld [smem:[#allocation3 + %s292_s29]]  ;;  %s270_s15 = sadd.s32 2, %s3154_s17 }
  0x2d   : > { %v2985_v26 = vld [vmem:[%s4759_s3 + $0x80] sm:$0xff]  ;;  %v2999_v28 = vld [vmem:[%s4759_s3 + $0xa8] sm:$0xff]  ;;  %v3006_v29 = vld [vmem:[%s4759_s3 + $0xb8] sm:$0xff]  ;;  %s262_s14 = sld [smem:[#allocation3 + %s261_s13]]  ;;  %s2456_s13 = sshll.u32 %s2707_s25, 5 }
  0x2e   : > { %v3013_v31 = vld [vmem:[%s4759_s3 + $0xc8] sm:$0xff]  ;;  %v3020_v32 = vld [vmem:[%s4759_s3 + $0xd8] sm:$0xff]  ;;  %v3036_v34 = vld [vmem:[%s4759_s3 + $0x170] sm:$0xff]  ;;  %s258_s16 = sld [smem:[#allocation3 + %s3154_s17]] }
  0x2f   : > { %424 = vperm.xlu1 %2527, %v2847_v7   ;;  %665 = vperm.xlu0 %2530, %v2852_v8   ;;  %v3029_v33 = vld [vmem:[%s4759_s3 + $0xf8] sm:$0xff]  ;;  %v3043_v35 = vld [vmem:[%s4759_s3 + $0x168] sm:$0xff]  ;;  %v389_v38 = vld [vmem:[%s4759_s3 + $0x140] sm:$0xff]  ;;  %s271_s18 = sld [smem:[#allocation3 + %s270_s15]] }
  0x30   : > { %4889 = vst [vmem:[#allocation11_spill] sm:$0xff] %v3043_v35  ;;  %v388_v41 = vld [vmem:[%s4759_s3 + $0x138] sm:$0xff]  ;;  %v3077_v46 = vld [vmem:[%s4759_s3 + $0x90] sm:$0xff]  ;;  %s248_s29 = scalar_select %p247_p2, %s2707_s25, 1 }
  0x33   : > { %434 = vperm.xlu1 %2527, %v2859_v9   ;;  %673 = vperm.xlu0 %2530, %v2864_v10  }
  0x37   : > { %444 = vperm.xlu1 %2527, %v2871_v11   ;;  %681 = vperm.xlu0 %2530, %v2876_v12  }
  0x3b   : > { %454 = vperm.xlu1 %2527, %v2883_v13   ;;  %689 = vperm.xlu0 %2530, %v2888_v14  }
  0x3f   : > { %464 = vperm.xlu1 %2527, %v2895_v15   ;;  %697 = vperm.xlu0 %2530, %v2900_v16  }
  0x43   : > { %474 = vperm.xlu1 %2527, %v2907_v17   ;;  %1208 = vperm.xlu0 %2530, %v2912_v18  }
  0x47   : > { %2528 = vset.pattern.permute.xlu1 %v4762_v6  ;;  %1220 = vperm.xlu0 %2530, %v2919_v19  }
  0x48   : > { %533 = vperm.xlu1 %2528, %v2824_v1  }
  0x4b   : > { %1228 = vperm.xlu0 %2530, %v2927_v20  }
  0x4c   : > { %537 = vperm.xlu1 %2528, %v2819_v0  }
  0x4f   : > { %1236 = vperm.xlu0 %2530, %v2934_v21  }
  0x50   : > { %545 = vperm.xlu1 %2528, %v2838_v5  }
  0x53   : > { %1260 = vperm.xlu0 %2530, %v2941_v22  }
  0x54   : > { %553 = vperm.xlu1 %2528, %v2852_v8  }
  0x57   : > { %1256 = vperm.xlu0 %2530, %v2948_v23  }
  0x58   : > { %561 = vperm.xlu1 %2528, %v2864_v10  }
  0x5b   : > { %1244 = vperm.xlu0 %2530, %v2955_v24  }
  0x5c   : > { %569 = vperm.xlu1 %2528, %v2876_v12  }
  0x5f   : > { %2538 = vset.pattern.permute.xlu0 %v4762_v6 }
  0x60   : > { %577 = vperm.xlu1 %2528, %v2888_v14   ;;  %529 = vperm.xlu0 %2538, %v2962_v25  }
  0x64   : > { %585 = vperm.xlu1 %2528, %v2900_v16   ;;  %541 = vperm.xlu0 %2538, %v2833_v4  }
  0x68   : > { %2529 = vset.pattern.permute.xlu1 %v4768_v2  ;;  %549 = vperm.xlu0 %2538, %v2847_v7  }
  0x69   : > { %641 = vperm.xlu1 %2529, %v2962_v25  }
  0x6c   : > { %557 = vperm.xlu0 %2538, %v2859_v9  }
  0x6d   : > { %649 = vperm.xlu1 %2529, %v2819_v0  }
  0x70   : > { %565 = vperm.xlu0 %2538, %v2871_v11  }
  0x71   : > { %653 = vperm.xlu1 %2529, %v2833_v4  }
  0x74   : > { %573 = vperm.xlu0 %2538, %v2883_v13  }
  0x75   : > { %661 = vperm.xlu1 %2529, %v2847_v7  }
  0x78   : > { %581 = vperm.xlu0 %2538, %v2895_v15  }
  0x79   : > { %669 = vperm.xlu1 %2529, %v2859_v9  }
  0x7c   : > { %589 = vperm.xlu0 %2538, %v2907_v17  }
  0x7d   : > { %677 = vperm.xlu1 %2529, %v2871_v11  }
  0x80   : > { %1092 = vperm.xlu0 %2538, %v2985_v26  }
  0x81   : > { %685 = vperm.xlu1 %2529, %v2883_v13  }
  0x84   : > { %1104 = vperm.xlu0 %2538, %v2992_v27  }
  0x85   : > { %693 = vperm.xlu1 %2529, %v2895_v15  }
  0x88   : > { %1112 = vperm.xlu0 %2538, %v2999_v28  }
  0x89   : > { %701 = vperm.xlu1 %2529, %v2907_v17  }
  0x8c   : > { %1120 = vperm.xlu0 %2538, %v3006_v29  }
  0x8d   : > { %2531 = vset.pattern.permute.xlu1 %v4766_v30  ;;  %v3179_v30 = vld [vmem:[%s4759_s3 + $0x178] sm:$0xff] }
  0x8e   : > { %760 = vperm.xlu1 %2531, %v2824_v1  }
  0x90   : > { %1128 = vperm.xlu0 %2538, %v3013_v31  }
  0x92   : > { %764 = vperm.xlu1 %2531, %v2819_v0  }
  0x94   : > { %1136 = vperm.xlu0 %2538, %v3020_v32  }
  0x96   : > { %772 = vperm.xlu1 %2531, %v2838_v5  }
  0x98   : > { %1144 = vperm.xlu0 %2538, %v2948_v23  }
  0x9a   : > { %780 = vperm.xlu1 %2531, %v2852_v8  }
  0x9c   : > { %1152 = vperm.xlu0 %2538, %v3029_v33  }
  0x9e   : > { %788 = vperm.xlu1 %2531, %v2864_v10  }
  0xa0   : > { %1788 = vperm.xlu0 %2538, %v3036_v34  }
  0xa2   : > { %v3045_v36 = vpop.permute.xlu1 %409  ;;  %796 = vperm.xlu1 %2531, %v2876_v12   ;;  %v3048_v37 = vpop.permute.xlu0 %645 }
  0xa4   : > { %1784 = vperm.xlu0 %2538, %v3043_v35  }
  0xa6   : > { %v3054_v39 = vpop.permute.xlu1 %414  ;;  %804 = vperm.xlu1 %2531, %v2888_v14   ;;  %v3057_v40 = vpop.permute.xlu0 %657 }
  0xa8   : > { %1764 = vperm.xlu0 %2538, %v389_v38  }
  0xaa   : > { %v3062_v42 = vpop.permute.xlu1 %424  ;;  %812 = vperm.xlu1 %2531, %v2900_v16   ;;  %v3065_v43 = vpop.permute.xlu0 %665 }
  0xac   : > { %1760 = vperm.xlu0 %2538, %v388_v41  }
  0xae   : > { %v3067_v44 = vpop.permute.xlu1 %434  ;;  %2532 = vset.pattern.permute.xlu1 %v4764_v3  ;;  %v3070_v45 = vpop.permute.xlu0 %673 }
  0xaf   : > { %981 = vperm.xlu1 %2532, %v2985_v26  }
  0xb0   : > { %2560 = vset.pattern.permute.xlu0 %v4764_v3 }
  0xb1   : > { %399 = vperm.xlu0 %2560, %v2962_v25  }
  0xb2   : > { %v3080_v47 = vpop.permute.xlu1 %444  ;;  %v3082_v48 = vpop.permute.xlu0 %681 }
  0xb3   : > { %991 = vperm.xlu1 %2532, %v3077_v46  }
  0xb5   : > { %404 = vperm.xlu0 %2560, %v2824_v1  }
  0xb6   : > { %v3086_v49 = vpop.permute.xlu1 %454  ;;  %v3088_v50 = vpop.permute.xlu0 %689 }
  0xb7   : > { %996 = vperm.xlu1 %2532, %v2992_v27  }
  0xb9   : > { %419 = vperm.xlu0 %2560, %v2838_v5  }
  0xba   : > { %v3092_v51 = vpop.permute.xlu1 %464  ;;  %v3094_v52 = vpop.permute.xlu0 %697 }
  0xbb   : > { %1006 = vperm.xlu1 %2532, %v2999_v28  }
  0xbd   : > { %429 = vperm.xlu0 %2560, %v2852_v8  }
  0xbe   : > { %v3098_v53 = vpop.permute.xlu1 %474  ;;  %v3100_v54 = vpop.permute.xlu0 %1208 }
  0xbf   : > { %1016 = vperm.xlu1 %2532, %v3006_v29  }
  0xc1   : > { %439 = vperm.xlu0 %2560, %v2864_v10  }
  0xc2   : > { %v3104_v55 = vpop.permute.xlu0 %1220 }
  0xc3   : > { %v3106_v56 = vpop.permute.xlu1 %533  ;;  %1026 = vperm.xlu1 %2532, %v3013_v31  }
  0xc5   : > { %449 = vperm.xlu0 %2560, %v2876_v12  }
  0xc6   : > { %v3110_v57 = vpop.permute.xlu0 %1228 }
  0xc7   : > { %4890 = vst [vmem:[#allocation12_spill] sm:$0xff] %v3110_v57  ;;  %v3112_v58 = vpop.permute.xlu1 %537  ;;  %1036 = vperm.xlu1 %2532, %v3020_v32   ;;  %v4919_v57 = vmov 2  }
  0xc9   : > { %459 = vperm.xlu0 %2560, %v2888_v14  }
  0xca   : > { %v3116_v59 = vpop.permute.xlu0 %1236 }
  0xcb   : > { %4891 = vst [vmem:[#allocation13_spill] sm:$0xff] %v3116_v59  ;;  %v3118_v60 = vpop.permute.xlu1 %545  ;;  %1046 = vperm.xlu1 %2532, %v2948_v23  }
  0xcc   : > { %4892 = vst [vmem:[#allocation14_spill] sm:$0xff] %v3118_v60  ;;  %v3206_v60 = vld [vmem:[%s4759_s3 + $0x148] sm:$0xff] }
  0xcd   : > { %469 = vperm.xlu0 %2560, %v2900_v16   ;;  %v3159_v16 = vld [vmem:[%s4759_s3 + $0xe0] sm:$0xff] }
  0xce   : > { %v3122_v61 = vpop.permute.xlu0 %1260 }
  0xcf   : > { %4893 = vst [vmem:[#allocation15_spill] sm:$0xff] %v3122_v61  ;;  %v3124_v62 = vpop.permute.xlu1 %553  ;;  %1056 = vperm.xlu1 %2532, %v3029_v33   ;;  %v285_v61 = vstv %s284_s28 }
  0xd0   : > { %4894 = vst [vmem:[#allocation16_spill] sm:$0xff] %v3124_v62 }
  0xd1   : > { %986 = vperm.xlu0 %2560, %v2912_v18  }
  0xd2   : > { %v3128_v63 = vpop.permute.xlu0 %1256 }
  0xd3   : > { %4895 = vst [vmem:[#allocation17_spill] sm:$0xff] %v3128_v63  ;;  %v3130_v0 = vpop.permute.xlu1 %561  ;;  %2533 = vset.pattern.permute.xlu1 %v4762_v6  ;;  %v3235_v63 = vld [vmem:[%s4759_s3 + $0x118] sm:$0xff] }
  0xd4   : > { %4896 = vst [vmem:[#allocation18_spill] sm:$0xff] %v3130_v0  ;;  %1096 = vperm.xlu1 %2533, %v2912_v18   ;;  %v307_v0 = vstv %s306_s22  ;;  %s279_s22 = sadd.s32 3, %s3154_s17  ;;  %s2301_s17 = scalar_lea.hbm %s4761_s5, %s2456_s13 }
  0xd5   : > { %1001 = vperm.xlu0 %2560, %v2919_v19  }
  0xd6   : > { %v3135_v1 = vpop.permute.xlu0 %1244 }
  0xd7   : > { %4897 = vst [vmem:[#allocation19_spill] sm:$0xff] %v3135_v1  ;;  %v3137_v5 = vpop.permute.xlu1 %569 }
  0xd8   : > { %4898 = vst [vmem:[#allocation20_spill] sm:$0xff] %v3137_v5  ;;  %1100 = vperm.xlu1 %2533, %v3077_v46   ;;  %v3197_v5 = vld [vmem:[%s4757_s1] sm:$0x77] }
  0xd9   : > { %1011 = vperm.xlu0 %2560, %v2927_v20  }
  0xdb   : > { %v3141_v8 = vpop.permute.xlu1 %577  ;;  %v3143_v10 = vpop.permute.xlu0 %529 }
  0xdc   : > { %4899 = vst [vmem:[#allocation21_spill] sm:$0xff] %v3141_v8  ;;  %1108 = vperm.xlu1 %2533, %v2919_v19   ;;  %v3190_v8 = vld [vmem:[%s4759_s3 + $0x150] sm:$0xff] }
  0xdd   : > { %1021 = vperm.xlu0 %2560, %v2934_v21   ;;  %4907 = vst [vmem:[#allocation29_spill] sm:$0xff] %v3190_v8 }
  0xdf   : > { %v3147_v12 = vpop.permute.xlu1 %585  ;;  %v3149_v14 = vpop.permute.xlu0 %541 }
  0xe0   : > { %4900 = vst [vmem:[#allocation22_spill] sm:$0xff] %v3147_v12  ;;  %1116 = vperm.xlu1 %2533, %v2927_v20  }
  0xe1   : > { %1031 = vperm.xlu0 %2560, %v2955_v24  }
  0xe3   : > { %v3161_v38 = vpop.permute.xlu0 %549 }
  0xe4   : > { %4901 = vst [vmem:[#allocation23_spill] sm:$0xff] %v3161_v38  ;;  %1124 = vperm.xlu1 %2533, %v2934_v21   ;;  %v3164_v41 = vpop.permute.xlu1 %641 }
  0xe5   : > { %4902 = vst [vmem:[#allocation24_spill] sm:$0xff] %v3164_v41  ;;  %1041 = vperm.xlu0 %2560, %v3159_v16  }
  0xe7   : > { %v3168_v6 = vpop.permute.xlu0 %557 }
  0xe8   : > { %4903 = vst [vmem:[#allocation25_spill] sm:$0xff] %v3168_v6  ;;  %1132 = vperm.xlu1 %2533, %v2955_v24   ;;  %v3172_v3 = vpop.permute.xlu1 %649  ;;  %v4911_v6 = vmov 3  }
  0xe9   : > { %4904 = vst [vmem:[#allocation26_spill] sm:$0xff] %v3172_v3  ;;  %1051 = vperm.xlu0 %2560, %v2941_v22   ;;  %v316_v3 = vstv %s315_s11  ;;  %s280_s11 = sld [smem:[#allocation3 + %s279_s22]]  ;;  %s2724_s22 = smov [#allocation6]  }
  0xea   : > { %v317_v38 = vmul.f32 %v316_v3, %v3197_v5  ;;  %s2611_s28 = sshll.u32 %s2724_s22, 4  ;;  %s2612_s28 = int_to_ptr.vmem [resolvable:$false] %s2611_s28 }
  0xeb   : > { %v3181_v2 = vpop.permute.xlu0 %565 }
  0xec   : > { %4905 = vst [vmem:[#allocation27_spill] sm:$0xff] %v3181_v2  ;;  %1140 = vperm.xlu1 %2533, %v3159_v16   ;;  %v3184_v12 = vpop.permute.xlu1 %653  ;;  %v303_v2 = vstv %s302_s8 }
  0xed   : > { %4906 = vst [vmem:[#allocation28_spill] sm:$0xff] %v3184_v12  ;;  %1696 = vperm.xlu0 %2560, %v3179_v30  }
  0xef   : > { %v3192_v35 = vpop.permute.xlu0 %573 }
  0xf0   : > { %4908 = vst [vmem:[#allocation30_spill] sm:$0xff] %v3192_v35  ;;  %1148 = vperm.xlu1 %2533, %v2941_v22   ;;  %v3200_v62 = vpop.permute.xlu1 %661  ;;  %v308_v35 = vmul.f32 %v307_v0, %v3197_v5  ;;  %v304_v0 = vmul.f32 %v303_v2, %v3197_v5 }
  0xf1   : > { %4909 = vst [vmem:[#allocation31_spill] sm:$0xff] %v3200_v62  ;;  %1671 = vperm.xlu0 %2560, %v3190_v8   ;;  %v3220_v62 = vld [vmem:[%s4759_s3 + $0x120] sm:$0xff] }
  0xf2   : > { %4913 = vst [vmem:[#allocation34_spill] sm:$0xff] %v3220_v62 }
  0xf3   : > { %v3209_v12 = vpop.permute.xlu0 %581 }
  0xf4   : > { %4910 = vst [vmem:[#allocation32_spill] sm:$0xff] %v3209_v12  ;;  %2534 = vset.pattern.permute.xlu1 %v4911_v6  ;;  %v3212_v41 = vpop.permute.xlu1 %669  ;;  %v2437_v12 = vrot.slane %v308_v35, 9  ;;  %v2438_v35 = vrot.slane %v317_v38, 10 }
  0xf5   : > { %4912 = vst [vmem:[#allocation33_spill] sm:$0xff] %v3212_v41  ;;  %1666 = vperm.xlu0 %2560, %v3206_v60   ;;  %1204 = vperm.xlu1 %2534, %v2985_v26  }
  0xf6   : > { %v313_v2 = vadd.f32 %v2437_v12, %v304_v0  ;;  %v286_v12 = vmul.f32 %v285_v61, %v3197_v5  ;;  %v281_v0 = vstv %s280_s11  ;;  %s2457_s11 = smul.u32 24, %s248_s29  ;;  %s2613_s29 = scalar_lea.vmem %s2612_s28, 64 }
  0xf7   : > { %v3224_v1 = vpop.permute.xlu0 %589 }
  0xf8   : > { %4914 = vst [vmem:[#allocation35_spill] sm:$0xff] %v3224_v1  ;;  %v3227_v41 = vpop.permute.xlu1 %677 }
  0xf9   : > { %4915 = vst [vmem:[#allocation36_spill] sm:$0xff] %v3227_v41  ;;  %1641 = vperm.xlu0 %2560, %v3220_v62   ;;  %1212 = vperm.xlu1 %2534, %v3077_v46   ;;  %v322_v41 = vadd.f32 %v2438_v35, %v313_v2  ;;  %v282_v35 = vmul.f32 %v281_v0, %v3197_v5 }
  0xfb   : > { %v3237_v3 = vpop.permute.xlu0 %1092  ;;  %2582 = vrcp.f32 %v322_v41 }
  0xfc   : > { %4916 = vst [vmem:[#allocation37_spill] sm:$0xff] %v3237_v3  ;;  %v3239_v1 = vpop.permute.xlu1 %685  ;;  %v294_v3 = vstv %s293_s12 }
  0xfd   : > { %1636 = vperm.xlu0 %2560, %v3235_v63   ;;  %1216 = vperm.xlu1 %2534, %v2992_v27  }
  0xff   : > { %v3243_v62 = vpop.permute.xlu0 %1104 }
 0x100   : > { %4917 = vst [vmem:[#allocation38_spill] sm:$0xff] %v3243_v62  ;;  %v3245_v59 = vpop.permute.xlu1 %693  ;;  %v2435_v62 = vrot.slane %v286_v12, 9 }
 0x101   : > { %4918 = vst [vmem:[#allocation39_spill] sm:$0xff] %v3245_v59  ;;  %2567 = vset.pattern.permute.xlu0 %v4919_v57  ;;  %1224 = vperm.xlu1 %2534, %v2999_v28  }
 0x102   : > { %756 = vperm.xlu0 %2567, %v2962_v25   ;;  %v295_v25 = vmul.f32 %v294_v3, %v3197_v5 }
 0x103   : > { %v3251_v38 = vpop.permute.xlu0 %1112 }
 0x104   : > { %4920 = vst [vmem:[#allocation40_spill] sm:$0xff] %v3251_v38  ;;  %v3253_v2 = vpop.permute.xlu1 %701  ;;  %v291_v38 = vadd.f32 %v2435_v62, %v282_v35 }
 0x105   : > { %4921 = vst [vmem:[#allocation41_spill] sm:$0xff] %v3253_v2  ;;  %1232 = vperm.xlu1 %2534, %v3006_v29   ;;  %v2436_v2 = vrot.slane %v295_v25, 10 }
 0x106   : > { %768 = vperm.xlu0 %2567, %v2833_v4  }
 0x107   : > { %v3260_v61 = vpop.permute.xlu0 %1120  ;;  %v300_v3 = vadd.f32 %v2436_v2, %v291_v38  ;;  %v272_v38 = vstv %s271_s18 }
 0x108   : > { %4922 = vst [vmem:[#allocation42_spill] sm:$0xff] %v3260_v61  ;;  %v2583_v0 = vpop.eup %2582  ;;  %v263_v61 = vstv %s262_s14 }
 0x109   : > { %1240 = vperm.xlu1 %2534, %v3013_v31   ;;  %v3263_v41 = vpop.permute.xlu1 %760  ;;  %v3281_v62 = vmul.f32 %v2583_v0, %v300_v3  ;;  %v264_v25 = vmul.f32 %v263_v61, %v3197_v5 }
 0x10a   : > { %4923 = vst [vmem:[#allocation43_spill] sm:$0xff] %v3263_v41  ;;  %776 = vperm.xlu0 %2567, %v2847_v7   ;;  %v5034_v41 = vld [vmem:[#allocation14_spill] sm:$0xff] }
 0x10b   : > { %v3267_v59 = vpop.permute.xlu0 %1128  ;;  %4928 = vst [vmem:[#allocation48_spill] sm:$0xff] %v3281_v62  ;;  %v2433_v3 = vrot.slane %v264_v25, 9 }
 0x10c   : > { %4924 = vst [vmem:[#allocation44_spill] sm:$0xff] %v3267_v59  ;;  %v4810_v59 = vlaneseq }
 0x10d   : > { %1264 = vperm.xlu1 %2534, %v3029_v33   ;;  %v3271_v4 = vpop.permute.xlu1 %764 }
 0x10e   : > { %4925 = vst [vmem:[#allocation45_spill] sm:$0xff] %v3271_v4  ;;  %784 = vperm.xlu0 %2567, %v2859_v9   ;;  %v259_v9 = vstv %s258_s16  ;;  %s3860_s16 = scalar_lea.vmem %s4758_s2, %s2457_s11 }
 0x10f   : > { %v3274_v12 = vpop.permute.xlu0 %1136 }
 0x110   : > { %4926 = vst [vmem:[#allocation46_spill] sm:$0xff] %v3274_v12  ;;  %v340_v12 = vmul.f32 0.041666668, %v3281_v62 }
 0x111   : > { %2535 = vset.pattern.permute.xlu1 %v4919_v57  ;;  %v3277_v7 = vpop.permute.xlu1 %772 }
 0x112   : > { %4927 = vst [vmem:[#allocation47_spill] sm:$0xff] %v3277_v7  ;;  %792 = vperm.xlu0 %2567, %v2871_v11   ;;  %1360 = vperm.xlu1 %2535, %v3029_v33   ;;  %v260_v33 = vmul.f32 %v259_v9, %v3197_v5 }
 0x113   : > { %v3283_v35 = vpop.permute.xlu0 %1144 }
 0x114   : > { %4929 = vst [vmem:[#allocation49_spill] sm:$0xff] %v3283_v35  ;;  %v273_v35 = vmul.f32 %v272_v38, %v3197_v5  ;;  %v269_v62 = vadd.f32 %v2433_v3, %v260_v33  ;;  %v3307_v5 = vshrl.u32 %v4810_v59, 7 }
 0x115   : > { %v3286_v2 = vpop.permute.xlu1 %780 }
 0x116   : > { %4930 = vst [vmem:[#allocation50_spill] sm:$0xff] %v3286_v2  ;;  %800 = vperm.xlu0 %2567, %v2883_v13   ;;  %2536 = vset.pattern.permute.xlu1 %v4911_v6  ;;  %v2442_v2 = vadd.f32 -1.0, %v340_v12  ;;  %v2434_v7 = vrot.slane %v273_v35, 10  ;;  %4935 = vst [vmem:[#allocation55_spill] sm:$0xff] %v3307_v5  ;;  %v3316_v35 = vsub.s32 0, %v3307_v5 }
 0x117   : > { %1252 = vperm.xlu1 %2536, %v3159_v16   ;;  %v3292_v11 = vpop.permute.xlu0 %1152 }
 0x118   : > { %4931 = vst [vmem:[#allocation51_spill] sm:$0xff] %v3292_v11  ;;  %v2443_v25 = vclamps-f32 %v2442_v2, 1.0  ;;  %4938 = vst [vmem:[#allocation58_spill] sm:$0xff] %v3316_v35 }
 0x119   : > { %v3296_v61 = vpop.permute.xlu1 %788 }
 0x11a   : > { %4932 = vst [vmem:[#allocation52_spill] sm:$0xff] %v3296_v61  ;;  %808 = vperm.xlu0 %2567, %v2895_v15   ;;  %v278_v15 = vadd.f32 %v2434_v7, %v269_v62 }
 0x11b   : > { %2537 = vset.pattern.permute.xlu1 %v4919_v57  ;;  %v3300_v13 = vpop.permute.xlu0 %1788 }
 0x11c   : > { %4933 = vst [vmem:[#allocation53_spill] sm:$0xff] %v3300_v13  ;;  %1348 = vperm.xlu1 %2537, %v3159_v16   ;;  %v3319_v16 = vsub.s32 4, %v3307_v5  ;;  %v3323_v33 = vmul.f32 %v2583_v0, %v278_v15 }
 0x11d   : > { %v3303_v11 = vpop.permute.xlu1 %796 }
 0x11e   : > { %4934 = vst [vmem:[#allocation54_spill] sm:$0xff] %v3303_v11  ;;  %816 = vperm.xlu0 %2567, %v2907_v17   ;;  %4939 = vst [vmem:[#allocation59_spill] sm:$0xff] %v3319_v16  ;;  %v344_v17 = vadd.f32 1.0, %v2443_v25  ;;  %v335_v2 = vmul.f32 0.03125, %v3323_v33 }
 0x11f   : > { %v3309_v9 = vpop.permute.xlu0 %1784  ;;  %4941 = vst [vmem:[#allocation61_spill] sm:$0xff] %v3323_v33 }
 0x120   : > { %4936 = vst [vmem:[#allocation56_spill] sm:$0xff] %v3309_v9  ;;  %1352 = vperm.xlu1 %2537, %v2948_v23   ;;  %v485_v7 = vrot.slane %v344_v17, %v3319_v16  ;;  %v2440_v25 = vadd.f32 -1.0, %v335_v2 }
 0x121   : > { %v3312_v12 = vpop.permute.xlu1 %804 }
 0x122   : > { %4937 = vst [vmem:[#allocation57_spill] sm:$0xff] %v3312_v12  ;;  %1356 = vperm.xlu0 %2567, %v2941_v22   ;;  %v481_v22 = vrot.slane %v344_v17, %v3316_v35 }
 0x123   : > { %v3321_v38 = vpop.permute.xlu0 %1764 }
 0x124   : > { %4940 = vst [vmem:[#allocation60_spill] sm:$0xff] %v3321_v38  ;;  %2539 = vset.pattern.permute.xlu1 %v4911_v6  ;;  %v3341_v3 = vrot.slane %v481_v22, %v3316_v35 }
 0x125   : > { %1248 = vperm.xlu1 %2539, %v3020_v32   ;;  %v3327_v23 = vpop.permute.xlu1 %812 }
 0x126   : > { %4942 = vst [vmem:[#allocation62_spill] sm:$0xff] %v3327_v23  ;;  %1340 = vperm.xlu0 %2567, %v2955_v24   ;;  %4944 = vst [vmem:[#allocation64_spill] sm:$0xff] %v3341_v3  ;;  %v3344_v24 = vrot.slane %v485_v7, %v3316_v35  ;;  %v5043_v23 = vld [vmem:[#allocation38_spill] sm:$0xff] }
 0x127   : > { %v3332_v62 = vpop.permute.xlu0 %1760 }
 0x128   : > { %4943 = vst [vmem:[#allocation63_spill] sm:$0xff] %v3332_v62  ;;  %4945 = vst [vmem:[#allocation65_spill] sm:$0xff] %v3344_v24 }
 0x129   : > { %2540 = vset.pattern.permute.xlu1 %v4919_v57 }
 0x12a   : > { %1336 = vperm.xlu0 %2567, %v3013_v31   ;;  %1344 = vperm.xlu1 %2540, %v3020_v32   ;;  %v3338_v0 = vpop.permute.xlu1 %981  ;;  %v2441_v32 = vclamps-f32 %v2440_v25, 1.0 }
 0x12c   : > { %v400_v15 = vpop.permute.xlu0 %399  ;;  %v339_v62 = vadd.f32 1.0, %v2441_v32  ;;  %v503_v32 = vmul.f32 %v3344_v24, %v3054_v39 }
 0x12d   : > { %v496_v17 = vmul.f32 %v3341_v3, %v400_v15  ;;  %v497_v59 = vmul.f32 %v3344_v24, %v400_v15 }
 0x12e   : > { %1328 = vperm.xlu0 %2567, %v3006_v29   ;;  %1332 = vperm.xlu1 %2540, %v2934_v21   ;;  %v3350_v31 = vpop.permute.xlu1 %991 }
 0x12f   : > { %v592_v22 = vsub.f32 %v3143_v10, %v496_v17  ;;  %v593_v33 = vsub.f32 %v3143_v10, %v497_v59  ;;  %v708_v10 = vrot.slane %v339_v62, %v3316_v35 }
 0x130   : > { %v405_v5 = vpop.permute.xlu0 %404 }
 0x131   : > { %v498_v7 = vmul.f32 %v3341_v3, %v405_v5  ;;  %v499_v2 = vmul.f32 %v3344_v24, %v405_v5  ;;  %v712_v5 = vrot.slane %v339_v62, %v3319_v16  ;;  %v4966_v16 = vmov 1  }
 0x132   : > { %1320 = vperm.xlu0 %2567, %v2999_v28   ;;  %1324 = vperm.xlu1 %2540, %v2927_v20   ;;  %v3358_v15 = vpop.permute.xlu1 %996 }
 0x133   : > { %v594_v21 = vsub.f32 %v3106_v56, %v498_v7  ;;  %v595_v29 = vsub.f32 %v3106_v56, %v499_v2  ;;  %v502_v56 = vmul.f32 %v3341_v3, %v3054_v39  ;;  %v3393_v39 = vrot.slane %v708_v10, %v3316_v35 }
 0x134   : > { %v3362_v25 = vpop.permute.xlu0 %419  ;;  %v3422_v10 = vmul.f32 %v3341_v3, %v3062_v42 }
 0x135   : > { %v3364_v17 = vpack.c.bf16 %v594_v21, %v592_v22  ;;  %v3366_v59 = vpack.c.bf16 %v595_v29, %v593_v33  ;;  %v598_v62 = vsub.f32 %v3149_v14, %v502_v56  ;;  %v599_v22 = vsub.f32 %v3149_v14, %v503_v32  ;;  %4949 = vst [vmem:[#allocation69_spill] sm:$0xff] %v3393_v39 }
 0x136   : > { %1312 = vperm.xlu0 %2567, %v2992_v27   ;;  %1316 = vperm.xlu1 %2540, %v2919_v19   ;;  %v3370_v28 = vpop.permute.xlu1 %1006  ;;  %v500_v19 = vmul.f32 %v3341_v3, %v3045_v36  ;;  %v501_v27 = vmul.f32 %v3344_v24, %v3045_v36  ;;  %v3405_v36 = vmul.f32 %v3393_v39, %v3048_v37 }
 0x137   : > { %4946 = vst [vmem:[#allocation66_spill] sm:$0xff] %v3364_v17  ;;  %4947 = vst [vmem:[#allocation67_spill] sm:$0xff] %v3370_v28  ;;  %v3413_v29 = vmul.f32 %v3393_v39, %v3057_v40 }
 0x138   : > { %v3372_v20 = vpop.permute.xlu0 %429  ;;  %v597_v2 = vsub.f32 %v3112_v58, %v501_v27  ;;  %4952 = vst [vmem:[#allocation72_spill] sm:$0xff] %v3405_v36  ;;  %v3444_v27 = vmul.f32 %v3344_v24, %v3067_v44  ;;  %v3742_v36 = vld [vmem:[%s4759_s3 + $0x158] sm:$0xff] }
 0x139   : > { %4954 = vst [vmem:[#allocation74_spill] sm:$0xff] %v3413_v29  ;;  %v3779_v29 = vmul.f32 %v3358_v15, %v3344_v24 }
 0x13a   : > { %1304 = vperm.xlu0 %2567, %v2912_v18   ;;  %v3381_v33 = vpop.permute.xlu1 %1016  ;;  %1308 = vperm.xlu1 %2540, %v3077_v46   ;;  %v3396_v18 = vrot.slane %v712_v5, %v3316_v35  ;;  %v596_v46 = vsub.f32 %v3112_v58, %v500_v19  ;;  %v627_v56 = vpack.c.bf16 %v599_v22, %v597_v2 }
 0x13b   : > { %4948 = vst [vmem:[#allocation68_spill] sm:$0xff] %v3381_v33  ;;  %v3432_v19 = vmul.f32 %v3393_v39, %v3065_v43  ;;  %4960 = vst [vmem:[#allocation80_spill] sm:$0xff] %v3444_v27  ;;  %v3475_v2 = vmul.f32 %v3341_v3, %v3086_v49  ;;  %v3480_v35 = vmul.f32 %v3344_v24, %v3086_v49  ;;  %v4978_v33 = vld [vmem:[#allocation12_spill] sm:$0xff] }
 0x13c   : > { %v3390_v7 = vpop.permute.xlu0 %439  ;;  %4950 = vst [vmem:[#allocation70_spill] sm:$0xff] %v3396_v18  ;;  %v3409_v14 = vmul.f32 %v3396_v18, %v3048_v37  ;;  %v3418_v58 = vmul.f32 %v3396_v18, %v3057_v40  ;;  %v626_v5 = vpack.c.bf16 %v598_v62, %v596_v46  ;;  %v3428_v37 = vmul.f32 %v3344_v24, %v3062_v42  ;;  %v5009_v27 = vld [vmem:[#allocation28_spill] sm:$0xff] }
 0x13d   : > { %4957 = vst [vmem:[#allocation77_spill] sm:$0xff] %v3432_v19  ;;  %v3440_v40 = vmul.f32 %v3341_v3, %v3067_v44  ;;  %v3448_v42 = vmul.f32 %v3393_v39, %v3070_v45  ;;  %v3452_v62 = vmul.f32 %v3396_v18, %v3070_v45  ;;  %v3463_v44 = vmul.f32 %v3344_v24, %v3080_v47  ;;  %v386_v19 = vld [vmem:[%s4759_s3 + $0x128] sm:$0xff] }
 0x13e   : > { %v3400_v21 = vpop.permute.xlu1 %1026  ;;  %2000 = vperm.xlu0 %2567, %v3179_v30   ;;  %4953 = vst [vmem:[#allocation73_spill] sm:$0xff] %v3409_v14  ;;  %1300 = vperm.xlu1 %2540, %v2985_v26   ;;  %4955 = vst [vmem:[#allocation75_spill] sm:$0xff] %v3418_v58  ;;  %v3436_v26 = vmul.f32 %v3396_v18, %v3065_v43  ;;  %v3456_v43 = vmul.f32 %v3341_v3, %v3080_v47  ;;  %v869_v38 = vand.u32 2147450879, %v626_v5 }
 0x13f   : > { %4951 = vst [vmem:[#allocation71_spill] sm:$0xff] %v3400_v21  ;;  %4959 = vst [vmem:[#allocation79_spill] sm:$0xff] %v3440_v40  ;;  %v3467_v46 = vmul.f32 %v3393_v39, %v3082_v48  ;;  %v3471_v45 = vmul.f32 %v3396_v18, %v3082_v48  ;;  %v3484_v47 = vmul.f32 %v3393_v39, %v3088_v50  ;;  %v870_v9 = vand.u32 2147450879, %v627_v56 }
 0x140   : > { %v3424_v32 = vpop.permute.xlu0 %449  ;;  %4958 = vst [vmem:[#allocation78_spill] sm:$0xff] %v3436_v26  ;;  %4961 = vst [vmem:[#allocation81_spill] sm:$0xff] %v3448_v42  ;;  %v3491_v13 = vmul.f32 %v3396_v18, %v3088_v50  ;;  %v3499_v49 = vmul.f32 %v3344_v24, %v3092_v51  ;;  %v3503_v5 = vmul.f32 %v3393_v39, %v3094_v52 }
 0x141   : > { %4956 = vst [vmem:[#allocation76_spill] sm:$0xff] %v3424_v32  ;;  %4962 = vst [vmem:[#allocation82_spill] sm:$0xff] %v3452_v62  ;;  %v3507_v56 = vmul.f32 %v3396_v18, %v3094_v52  ;;  %v3511_v50 = vmul.f32 %v3341_v3, %v3098_v53  ;;  %v3526_v52 = vmul.f32 %v3100_v54, %v3396_v18  ;;  %v5036_v62 = vld [vmem:[#allocation37_spill] sm:$0xff] }
 0x142   : > { %v3458_v22 = vpop.permute.xlu1 %1036  ;;  %1980 = vperm.xlu0 %2567, %v3190_v8   ;;  %4964 = vst [vmem:[#allocation84_spill] sm:$0xff] %v3467_v46  ;;  %4965 = vst [vmem:[#allocation85_spill] sm:$0xff] %v3471_v45  ;;  %2541 = vset.pattern.permute.xlu1 %v4966_v16  ;;  %v3495_v8 = vmul.f32 %v3341_v3, %v3092_v51  ;;  %v3519_v51 = vmul.f32 %v3100_v54, %v3393_v39 }
 0x143   : > { %4963 = vst [vmem:[#allocation83_spill] sm:$0xff] %v3458_v22  ;;  %4967 = vst [vmem:[#allocation86_spill] sm:$0xff] %v3484_v47  ;;  %1691 = vperm.xlu1 %2541, %v3036_v34   ;;  %v3515_v22 = vmul.f32 %v3344_v24, %v3098_v53  ;;  %v3534_v53 = vmul.f32 %v3104_v55, %v3396_v18  ;;  %v3538_v28 = vmul.f32 %v4978_v33, %v3393_v39 }
 0x144   : > { %v3487_v48 = vpop.permute.xlu0 %459  ;;  %4969 = vst [vmem:[#allocation88_spill] sm:$0xff] %v3491_v13  ;;  %4970 = vst [vmem:[#allocation89_spill] sm:$0xff] %v3495_v8  ;;  %v3621_v40 = vmul.f32 %v3393_v39, %v5009_v27  ;;  %v513_v42 = vmul.f32 %v3344_v24, %v3390_v7 }
 0x145   : > { %4968 = vst [vmem:[#allocation87_spill] sm:$0xff] %v3487_v48  ;;  %4971 = vst [vmem:[#allocation90_spill] sm:$0xff] %v3503_v5  ;;  %v3530_v48 = vmul.f32 %v3104_v55, %v3393_v39 }
 0x146   : > { %4972 = vst [vmem:[#allocation91_spill] sm:$0xff] %v3507_v56  ;;  %4973 = vst [vmem:[#allocation92_spill] sm:$0xff] %v3519_v51  ;;  %v3521_v21 = vpop.permute.xlu1 %1046  ;;  %1976 = vperm.xlu0 %2567, %v3206_v60   ;;  %v3542_v51 = vmul.f32 %v4978_v33, %v3396_v18  ;;  %v4981_v60 = vld [vmem:[#allocation13_spill] sm:$0xff]  ;;  %v5046_v12 = vld [vmem:[#allocation79_spill] sm:$0xff] }
 0x147   : > { %4974 = vst [vmem:[#allocation93_spill] sm:$0xff] %v3521_v21  ;;  %4975 = vst [vmem:[#allocation94_spill] sm:$0xff] %v3526_v52  ;;  %v3546_v54 = vmul.f32 %v4981_v60, %v3393_v39  ;;  %v885_v52 = vsub.bf16 1065369472, %v869_v38  ;;  %v886_v21 = vsub.bf16 1065369472, %v870_v9  ;;  %2542 = vset.pattern.permute.xlu1 %v4911_v6  ;;  %v3553_v55 = vmul.f32 %v4981_v60, %v3396_v18 }
 0x148   : > { %4976 = vst [vmem:[#allocation95_spill] sm:$0xff] %v3530_v48  ;;  %4977 = vst [vmem:[#allocation96_spill] sm:$0xff] %v3534_v53  ;;  %v3549_v48 = vpop.permute.xlu0 %469  ;;  %v4985_v53 = vld [vmem:[#allocation15_spill] sm:$0xff]  ;;  %1900 = vperm.xlu1 %2542, %v3036_v34  }
 0x149   : > { %4979 = vst [vmem:[#allocation12_spill] sm:$0xff] %v3538_v28  ;;  %4980 = vst [vmem:[#allocation97_spill] sm:$0xff] %v3542_v51  ;;  %v3557_v28 = vmul.f32 %v4985_v53, %v3393_v39  ;;  %v3561_v33 = vmul.f32 %v4985_v53, %v3396_v18  ;;  %v4988_v51 = vld [vmem:[#allocation17_spill] sm:$0xff]  ;;  %v4991_v60 = vld [vmem:[#allocation19_spill] sm:$0xff] }
 0x14a   : > { %4982 = vst [vmem:[#allocation13_spill] sm:$0xff] %v3546_v54  ;;  %4983 = vst [vmem:[#allocation98_spill] sm:$0xff] %v3549_v48  ;;  %v3565_v38 = vmul.f32 %v4988_v51, %v3393_v39  ;;  %v3570_v9 = vmul.f32 %v4988_v51, %v3396_v18  ;;  %v3578_v54 = vmul.f32 %v4991_v60, %v3396_v18  ;;  %v4994_v53 = vld [vmem:[#allocation23_spill] sm:$0xff]  ;;  %v4997_v51 = vld [vmem:[#allocation24_spill] sm:$0xff]  ;;  %v5004_v48 = vmov 0  }
 0x14b   : > { %4984 = vst [vmem:[#allocation99_spill] sm:$0xff] %v3553_v55  ;;  %4986 = vst [vmem:[#allocation15_spill] sm:$0xff] %v3557_v28  ;;  %v3574_v55 = vmul.f32 %v4991_v60, %v3393_v39  ;;  %v3582_v28 = vpop.permute.xlu1 %1056  ;;  %v5000_v60 = vld [vmem:[#allocation25_spill] sm:$0xff]  ;;  %v3606_v32 = vmax.bf16 %v5004_v48, %v886_v21  ;;  %v3626_v21 = vmul.f32 %v3396_v18, %v5009_v27  ;;  %v5021_v27 = vld [vmem:[#allocation36_spill] sm:$0xff] }
 0x14c   : > { %4987 = vst [vmem:[#allocation100_spill] sm:$0xff] %v3561_v33  ;;  %4989 = vst [vmem:[#allocation17_spill] sm:$0xff] %v3565_v38  ;;  %v4996_v38 = vld [vmem:[#allocation34_spill] sm:$0xff]  ;;  %v3603_v17 = vpop.permute.xlu0 %986  ;;  %1904 = vperm.xlu1 %2542, %v3179_v30   ;;  %v3661_v8 = vmul.f32 %v3393_v39, %v5021_v27  ;;  %v5038_v46 = vsub.f32 %v4994_v53, %v3428_v37 }
 0x14d   : > { %4990 = vst [vmem:[#allocation101_spill] sm:$0xff] %v3570_v9  ;;  %4992 = vst [vmem:[#allocation19_spill] sm:$0xff] %v3574_v55  ;;  %1956 = vperm.xlu0 %2567, %v4996_v38   ;;  %v3589_v9 = vmul.f32 %v3393_v39, %v4997_v51  ;;  %v3593_v55 = vmul.f32 %v3396_v18, %v4997_v51 }
 0x14e   : > { %4993 = vst [vmem:[#allocation102_spill] sm:$0xff] %v3578_v54  ;;  %4995 = vst [vmem:[#allocation23_spill] sm:$0xff] %v3582_v28  ;;  %v5001_v28 = vld [vmem:[#allocation26_spill] sm:$0xff]  ;;  %v5008_v54 = vld [vmem:[#allocation27_spill] sm:$0xff] }
 0x14f   : > { %4998 = vst [vmem:[#allocation34_spill] sm:$0xff] %v3589_v9  ;;  %4999 = vst [vmem:[#allocation24_spill] sm:$0xff] %v3593_v55  ;;  %v3601_v38 = vmul.f32 %v3393_v39, %v5001_v28  ;;  %v3609_v9 = vmax.bf16 %v5004_v48, %v885_v52  ;;  %v3613_v51 = vmul.f32 %v3396_v18, %v5001_v28  ;;  %v5012_v52 = vld [vmem:[#allocation30_spill] sm:$0xff]  ;;  %v5013_v55 = vld [vmem:[#allocation31_spill] sm:$0xff] }
 0x150   : > { %5003 = vst [vmem:[#allocation26_spill] sm:$0xff] %v3603_v17  ;;  %5005 = vst [vmem:[#allocation103_spill] sm:$0xff] %v3606_v32  ;;  %v3634_v32 = vmul.f32 %v3393_v39, %v5013_v55  ;;  %v3639_v33 = vmul.f32 %v3396_v18, %v5013_v55  ;;  %v5017_v28 = vld [vmem:[#allocation33_spill] sm:$0xff]  ;;  %v3675_v55 = vmul.f32 %v3396_v18, %v3239_v1  ;;  %2543 = vset.pattern.permute.xlu1 %v5004_v48 }
 0x151   : > { %5002 = vst [vmem:[#allocation25_spill] sm:$0xff] %v3601_v38  ;;  %5006 = vst [vmem:[#allocation104_spill] sm:$0xff] %v3609_v9  ;;  %1952 = vperm.xlu0 %2567, %v3235_v63   ;;  %v3647_v17 = vmul.f32 %v3393_v39, %v5017_v28  ;;  %v3649_v9 = vpop.permute.xlu1 %1096  ;;  %v5020_v63 = vld [vmem:[#allocation35_spill] sm:$0xff]  ;;  %1792 = vperm.xlu1 %2543, %v3179_v30  }
 0x152   : > { %5007 = vst [vmem:[#allocation105_spill] sm:$0xff] %v3613_v51  ;;  %5010 = vst [vmem:[#allocation27_spill] sm:$0xff] %v3621_v40  ;;  %v5016_v40 = vld [vmem:[#allocation32_spill] sm:$0xff]  ;;  %v5052_v38 = vld [vmem:[#allocation11_spill] sm:$0xff] }
 0x153   : > { %5011 = vst [vmem:[#allocation28_spill] sm:$0xff] %v3626_v21  ;;  %5014 = vst [vmem:[#allocation30_spill] sm:$0xff] %v3634_v32  ;;  %v3653_v32 = vmul.f32 %v3396_v18, %v5017_v28  ;;  %v3663_v21 = vpop.permute.xlu0 %1001  ;;  %v3671_v28 = vmul.f32 %v3393_v39, %v3239_v1  ;;  %v3694_v1 = vld [vmem:[%s4759_s3 + $0x160] sm:$0xff] }
 0x154   : > { %5015 = vst [vmem:[#allocation31_spill] sm:$0xff] %v3639_v33  ;;  %5018 = vst [vmem:[#allocation32_spill] sm:$0xff] %v3647_v17  ;;  %v3667_v17 = vmul.f32 %v3396_v18, %v5021_v27  ;;  %v504_v33 = vmul.f32 %v3341_v3, %v3362_v25 }
 0x155   : > { %5019 = vst [vmem:[#allocation33_spill] sm:$0xff] %v3653_v32  ;;  %5022 = vst [vmem:[#allocation35_spill] sm:$0xff] %v3661_v8  ;;  %v5026_v8 = vld [vmem:[#allocation39_spill] sm:$0xff]  ;;  %2571 = vset.pattern.permute.xlu0 %v4911_v6  ;;  %2544 = vset.pattern.permute.xlu1 %v4919_v57 }
 0x156   : > { %5023 = vst [vmem:[#allocation36_spill] sm:$0xff] %v3667_v17  ;;  %5024 = vst [vmem:[#allocation106_spill] sm:$0xff] %v3671_v28  ;;  %v3682_v32 = vmul.f32 %v3393_v39, %v5026_v8  ;;  %v3686_v27 = vmul.f32 %v3396_v18, %v5026_v8  ;;  %v505_v28 = vmul.f32 %v3344_v24, %v3362_v25  ;;  %1892 = vperm.xlu0 %2571, %v3694_v1  }
 0x157   : > { %5025 = vst [vmem:[#allocation107_spill] sm:$0xff] %v3675_v55  ;;  %v5029_v55 = vld [vmem:[#allocation41_spill] sm:$0xff]  ;;  %v3720_v25 = vpop.permute.xlu0 %1011  ;;  %1996 = vperm.xlu1 %2544, %v3036_v34   ;;  %v512_v34 = vmul.f32 %v3341_v3, %v3390_v7  ;;  %v3804_v7 = vmul.f32 %v3350_v31, %v3341_v3 }
 0x158   : > { %5027 = vst [vmem:[#allocation39_spill] sm:$0xff] %v3682_v32  ;;  %5028 = vst [vmem:[#allocation108_spill] sm:$0xff] %v3686_v27  ;;  %v3699_v17 = vmul.f32 %v3393_v39, %v5029_v55  ;;  %v3703_v8 = vmul.f32 %v3396_v18, %v5029_v55  ;;  %v3709_v27 = vpop.permute.xlu1 %1100  ;;  %v3728_v32 = vmul.f32 %v3338_v0, %v3341_v3  ;;  %v5050_v18 = vld [vmem:[#allocation68_spill] sm:$0xff] }
 0x159   : > { %v601_v14 = vsub.f32 %v5034_v41, %v505_v28  ;;  %v508_v55 = vmul.f32 %v3341_v3, %v3372_v20  ;;  %v3772_v28 = vmul.f32 %v3358_v15, %v3341_v3  ;;  %v5042_v15 = vld [vmem:[#allocation66_spill] sm:$0xff]  ;;  %v3847_v58 = vmul.f32 %v5050_v18, %v3341_v3  ;;  %v5051_v39 = vld [vmem:[#allocation20_spill] sm:$0xff] }
 0x15a   : > { %5030 = vst [vmem:[#allocation41_spill] sm:$0xff] %v3699_v17  ;;  %5031 = vst [vmem:[#allocation109_spill] sm:$0xff] %v3703_v8  ;;  %v600_v17 = vsub.f32 %v5034_v41, %v504_v33  ;;  %v3746_v33 = vmul.f32 %v3338_v0, %v3344_v24  ;;  %v509_v8 = vmul.f32 %v3344_v24, %v3372_v20  ;;  %1888 = vperm.xlu0 %2571, %v3742_v36  }
 0x15b   : > { %v3764_v20 = vpop.permute.xlu0 %1021  ;;  %v5037_v0 = vsub.f32 %v4994_v53, %v3422_v10  ;;  %v629_v5 = vpack.c.bf16 %v5038_v46, %v601_v14  ;;  %v3791_v10 = vld [vmem:[%s4759_s3 + $0x130] sm:$0xff]  ;;  %2545 = vset.pattern.permute.xlu1 %v4966_v16  ;;  %v868_v46 = vand.u32 2147450879, %v3366_v59 }
 0x15c   : > { %5035 = vst [vmem:[#allocation14_spill] sm:$0xff] %v3746_v33  ;;  %v3753_v41 = vpop.permute.xlu1 %1108  ;;  %5039 = vst [vmem:[#allocation37_spill] sm:$0xff] %v3791_v10  ;;  %v5041_v53 = vld [vmem:[#allocation76_spill] sm:$0xff]  ;;  %1681 = vperm.xlu1 %2545, %v3694_v1  }
 0x15d   : > { %v628_v47 = vpack.c.bf16 %v5037_v0, %v600_v17  ;;  %v5040_v17 = vld [vmem:[#allocation16_spill] sm:$0xff]  ;;  %v516_v56 = vmul.f32 %v3341_v3, %v5041_v53  ;;  %v872_v45 = vand.u32 2147450879, %v629_v5  ;;  %v5047_v5 = vsub.f32 %v5000_v60, %v5046_v12 }
 0x15e   : > { %v604_v0 = vsub.f32 %v5040_v17, %v508_v55  ;;  %v605_v14 = vsub.f32 %v5040_v17, %v509_v8  ;;  %1868 = vperm.xlu0 %2571, %v3791_v10   ;;  %v517_v55 = vmul.f32 %v3344_v24, %v5041_v53  ;;  %v3817_v17 = vmul.f32 %v3350_v31, %v3344_v24  ;;  %v5044_v53 = vld [vmem:[#allocation18_spill] sm:$0xff]  ;;  %v5045_v31 = vld [vmem:[#allocation67_spill] sm:$0xff] }
 0x15f   : > { %v3812_v8 = vpop.permute.xlu0 %1031  ;;  %v867_v10 = vand.u32 2147450879, %v5042_v15  ;;  %v871_v13 = vand.u32 2147450879, %v628_v47  ;;  %v608_v11 = vsub.f32 %v5044_v53, %v512_v34  ;;  %v609_v61 = vsub.f32 %v5044_v53, %v513_v42  ;;  %v5048_v34 = vld [vmem:[#allocation80_spill] sm:$0xff] }
 0x160   : > { %v3799_v37 = vpop.permute.xlu1 %1116  ;;  %v3831_v15 = vmul.f32 %v5045_v31, %v3341_v3  ;;  %v3835_v47 = vmul.f32 %v5045_v31, %v3344_v24  ;;  %v630_v59 = vpack.c.bf16 %v5047_v5, %v604_v0  ;;  %v5049_v42 = vsub.f32 %v5000_v60, %v5048_v34  ;;  %1686 = vperm.xlu1 %2545, %v5052_v38   ;;  %v381_v60 = vld [vmem:[%s4759_s3 + $0x100] sm:$0xff] }
 0x161   : > { %v884_v30 = vsub.bf16 1065369472, %v868_v46  ;;  %v612_v51 = vsub.f32 %v5051_v39, %v516_v56  ;;  %v613_v31 = vsub.f32 %v5051_v39, %v517_v55  ;;  %v887_v0 = vsub.bf16 1065369472, %v871_v13  ;;  %v5054_v39 = vld [vmem:[#allocation87_spill] sm:$0xff]  ;;  %v5057_v13 = vld [vmem:[#allocation40_spill] sm:$0xff] }
 0x162   : > { %v631_v53 = vpack.c.bf16 %v5049_v42, %v605_v14  ;;  %1864 = vperm.xlu0 %2571, %v386_v19   ;;  %v3862_v19 = vsub.bf16 1065369472, %v867_v10  ;;  %v3866_v56 = vmul.f32 %v5050_v18, %v3344_v24  ;;  %v521_v14 = vmul.f32 %v3344_v24, %v5054_v39 }
 0x163   : > { %v3852_v12 = vpop.permute.xlu0 %1041  ;;  %v888_v46 = vsub.bf16 1065369472, %v872_v45  ;;  %v5055_v55 = vsub.f32 %v5008_v54, %v3456_v43  ;;  %v5056_v34 = vsub.f32 %v5008_v54, %v3463_v44  ;;  %v520_v10 = vmul.f32 %v3341_v3, %v5054_v39 }
 0x164   : > { %v3843_v26 = vpop.permute.xlu1 %1124  ;;  %5053 = vst [vmem:[#allocation16_spill] sm:$0xff] %v3862_v19  ;;  %v873_v4 = vand.u32 2147450879, %v630_v59  ;;  %v874_v33 = vand.u32 2147450879, %v631_v53  ;;  %v5060_v54 = vsub.f32 %v5012_v52, %v3480_v35  ;;  %2546 = vset.pattern.permute.xlu1 %v4911_v6  ;;  %v3896_v59 = vmax.bf16 %v5004_v48, %v884_v30  ;;  %v5065_v35 = vld [vmem:[#allocation21_spill] sm:$0xff] }
 0x165   : > { %v632_v5 = vpack.c.bf16 %v5055_v55, %v608_v11  ;;  %v633_v42 = vpack.c.bf16 %v5056_v34, %v609_v61  ;;  %v5058_v11 = vld [vmem:[#allocation42_spill] sm:$0xff]  ;;  %v5059_v61 = vsub.f32 %v5012_v52, %v3475_v2  ;;  %1896 = vperm.xlu1 %2546, %v5052_v38   ;;  %v616_v30 = vsub.f32 %v5065_v35, %v520_v10  ;;  %v383_v38 = vld [vmem:[%s4759_s3 + $0x110] sm:$0xff] }
 0x166   : > { %1844 = vperm.xlu0 %2571, %v381_v60   ;;  %v635_v39 = vpack.c.bf16 %v5060_v54, %v613_v31  ;;  %5061 = vst [vmem:[#allocation76_spill] sm:$0xff] %v3896_v59  ;;  %v5062_v60 = vld [vmem:[#allocation71_spill] sm:$0xff]  ;;  %v889_v53 = vsub.bf16 1065369472, %v873_v4  ;;  %v890_v43 = vsub.bf16 1065369472, %v874_v33  ;;  %v3916_v19 = vmax.bf16 %v5004_v48, %v888_v46 }
 0x167   : > { %v634_v44 = vpack.c.bf16 %v5059_v61, %v612_v51  ;;  %v3893_v55 = vpop.permute.xlu0 %1051  ;;  %v3902_v34 = vmul.f32 %v5062_v60, %v3341_v3  ;;  %v3906_v2 = vmul.f32 %v5062_v60, %v3344_v24  ;;  %v617_v51 = vsub.f32 %v5065_v35, %v521_v14  ;;  %v5066_v61 = vld [vmem:[#allocation98_spill] sm:$0xff]  ;;  %v5076_v35 = vld [vmem:[#allocation93_spill] sm:$0xff] }
 0x168   : > { %v3882_v45 = vpop.permute.xlu1 %1132  ;;  %v875_v52 = vand.u32 2147450879, %v632_v5  ;;  %v876_v31 = vand.u32 2147450879, %v633_v42  ;;  %v524_v54 = vmul.f32 %v3341_v3, %v5066_v61  ;;  %5067 = vst [vmem:[#allocation18_spill] sm:$0xff] %v3916_v19  ;;  %v3919_v60 = vmax.bf16 %v5004_v48, %v887_v0  ;;  %v5069_v42 = vld [vmem:[#allocation83_spill] sm:$0xff] }
 0x169   : > { %5063 = vst [vmem:[#allocation66_spill] sm:$0xff] %v3902_v34  ;;  %5064 = vst [vmem:[#allocation38_spill] sm:$0xff] %v3906_v2  ;;  %v877_v14 = vand.u32 2147450879, %v634_v44  ;;  %v878_v5 = vand.u32 2147450879, %v635_v39  ;;  %v3927_v4 = vmul.f32 %v5069_v42, %v3341_v3  ;;  %v525_v33 = vmul.f32 %v3344_v24, %v5066_v61  ;;  %2547 = vset.pattern.permute.xlu1 %v5004_v48 }
 0x16a   : > { %5068 = vst [vmem:[#allocation67_spill] sm:$0xff] %v3919_v60  ;;  %2573 = vset.pattern.permute.xlu0 %v5004_v48  ;;  %v5071_v0 = vld [vmem:[#allocation44_spill] sm:$0xff]  ;;  %v3939_v44 = vmul.f32 %v5069_v42, %v3344_v24  ;;  %v5072_v39 = vsub.f32 %v5016_v40, %v3499_v49  ;;  %v891_v61 = vsub.bf16 1065369472, %v875_v52  ;;  %v892_v60 = vsub.bf16 1065369472, %v876_v31  ;;  %1780 = vperm.xlu1 %2547, %v3694_v1  }
 0x16b   : > { %v3931_v46 = vpop.permute.xlu0 %1696  ;;  %1740 = vperm.xlu0 %2573, %v383_v38   ;;  %v5073_v38 = vld [vmem:[#allocation89_spill] sm:$0xff]  ;;  %v5075_v10 = vld [vmem:[#allocation22_spill] sm:$0xff]  ;;  %v3952_v42 = vmul.f32 %v5076_v35, %v3341_v3  ;;  %v3956_v49 = vmul.f32 %v5076_v35, %v3344_v24  ;;  %v3961_v52 = vmax.bf16 %v5004_v48, %v890_v43  ;;  %v893_v31 = vsub.bf16 1065369472, %v877_v14  ;;  %v5081_v34 = vld [vmem:[#allocation23_spill] sm:$0xff] }
 0x16c   : > { %v3913_v18 = vpop.permute.xlu1 %1140  ;;  %5070 = vst [vmem:[#allocation79_spill] sm:$0xff] %v3931_v46  ;;  %v637_v59 = vpack.c.bf16 %v5072_v39, %v617_v51  ;;  %v5074_v46 = vsub.f32 %v5016_v40, %v5073_v38  ;;  %v620_v6 = vsub.f32 %v5075_v10, %v524_v54  ;;  %v3964_v40 = vmax.bf16 %v5004_v48, %v889_v53  ;;  %v5079_v54 = vld [vmem:[#allocation46_spill] sm:$0xff] }
 0x16d   : > { %5077 = vst [vmem:[#allocation80_spill] sm:$0xff] %v3961_v52  ;;  %v621_v39 = vsub.f32 %v5075_v10, %v525_v33  ;;  %v3975_v43 = vmul.f32 %v5081_v34, %v3341_v3  ;;  %v3979_v53 = vmul.f32 %v5081_v34, %v3344_v24  ;;  %v3986_v33 = vmax.bf16 %v5004_v48, %v892_v60  ;;  %v5085_v10 = vld [vmem:[#allocation49_spill] sm:$0xff] }
 0x16e   : > { %v636_v19 = vpack.c.bf16 %v5074_v46, %v616_v30  ;;  %5078 = vst [vmem:[#allocation68_spill] sm:$0xff] %v3964_v40  ;;  %v894_v30 = vsub.bf16 1065369472, %v878_v5  ;;  %v880_v2 = vand.u32 2147450879, %v637_v59  ;;  %v5082_v5 = vsub.f32 %v5020_v63, %v3511_v50  ;;  %2548 = vset.pattern.permute.xlu1 %v4919_v57 }
 0x16f   : > { %v3969_v38 = vpop.permute.xlu0 %1671  ;;  %5083 = vst [vmem:[#allocation11_spill] sm:$0xff] %v3986_v33  ;;  %v3989_v59 = vmax.bf16 %v5004_v48, %v891_v61  ;;  %1988 = vperm.xlu1 %2548, %v3694_v1   ;;  %v1067_v50 = vmul.f32 %v3663_v21, %v3341_v3  ;;  %v5089_v1 = vld [vmem:[#allocation51_spill] sm:$0xff] }
 0x170   : > { %v3958_v51 = vpop.permute.xlu1 %1148  ;;  %5080 = vst [vmem:[#allocation20_spill] sm:$0xff] %v3969_v38  ;;  %v879_v14 = vand.u32 2147450879, %v636_v19  ;;  %v638_v46 = vpack.c.bf16 %v5082_v5, %v620_v6  ;;  %v5086_v19 = vld [vmem:[#allocation26_spill] sm:$0xff]  ;;  %v5088_v5 = vsub.f32 %v5020_v63, %v3515_v22  ;;  %v4016_v35 = vmax.bf16 %v5004_v48, %v894_v30 }
 0x171   : > { %5084 = vst [vmem:[#allocation87_spill] sm:$0xff] %v3989_v59  ;;  %v3997_v38 = vmul.f32 %v5086_v19, %v3341_v3  ;;  %v4001_v6 = vmul.f32 %v5086_v19, %v3344_v24  ;;  %v4019_v19 = vmax.bf16 %v5004_v48, %v893_v31  ;;  %v896_v40 = vsub.bf16 1065369472, %v880_v2 }
 0x172   : > { %v4013_v34 = vpack.c.bf16 %v5088_v5, %v621_v39  ;;  %v895_v33 = vsub.bf16 1065369472, %v879_v14  ;;  %v1159_v22 = vsub.f32 %v3709_v27, %v3804_v7  ;;  %v1071_v63 = vmul.f32 %v3720_v25, %v3341_v3  ;;  %v2584_v7 = vld [vmem:[%s4759_s3 + $0x168] sm:$0xff] }
 0x173   : > { %v4008_v61 = vpop.permute.xlu0 %1666  ;;  %v881_v30 = vand.u32 2147450879, %v638_v46  ;;  %v1157_v2 = vsub.f32 %v3649_v9, %v3997_v38  ;;  %v1160_v39 = vsub.f32 %v3709_v27, %v3817_v17  ;;  %1992 = vperm.xlu1 %2548, %v2584_v7   ;;  %v1163_v14 = vsub.f32 %v3753_v41, %v1067_v50 }
 0x174   : > { %v4006_v60 = vpop.permute.xlu1 %1204  ;;  %5087 = vst [vmem:[#allocation40_spill] sm:$0xff] %v4008_v61  ;;  %v1068_v61 = vmul.f32 %v3663_v21, %v3344_v24  ;;  %v1072_v21 = vmul.f32 %v3720_v25, %v3344_v24  ;;  %v1075_v46 = vmul.f32 %v3764_v20, %v3341_v3  ;;  %v1076_v38 = vmul.f32 %v3764_v20, %v3344_v24 }
 0x175   : > { %v882_v27 = vand.u32 2147450879, %v4013_v34  ;;  %v1079_v17 = vmul.f32 %v3812_v8, %v3341_v3  ;;  %v1080_v50 = vmul.f32 %v3812_v8, %v3344_v24  ;;  %v4058_v7 = vmax.bf16 %v5004_v48, %v896_v40 }
 0x176   : > { %v1164_v25 = vsub.f32 %v3753_v41, %v1068_v61  ;;  %v5091_v20 = vsub.f32 %v5043_v23, %v3772_v28  ;;  %v1167_v52 = vsub.f32 %v3799_v37, %v1071_v63  ;;  %v1083_v34 = vmul.f32 %v3852_v12, %v3341_v3 }
 0x177   : > { %v4049_v31 = vpop.permute.xlu0 %1641  ;;  %v1084_v41 = vmul.f32 %v3852_v12, %v3344_v24  ;;  %v5092_v61 = vsub.f32 %v5043_v23, %v3779_v29  ;;  %v1168_v8 = vsub.f32 %v3799_v37, %v1072_v21  ;;  %v1087_v40 = vmul.f32 %v3893_v55, %v3341_v3  ;;  %2549 = vset.pattern.permute.xlu1 %v4966_v16 }
 0x178   : > { %v4047_v5 = vpop.permute.xlu1 %1212  ;;  %5090 = vst [vmem:[#allocation42_spill] sm:$0xff] %v4049_v31  ;;  %v1189_v59 = vpack.c.bf16 %v5091_v20, %v1159_v22  ;;  %v1088_v28 = vmul.f32 %v3893_v55, %v3344_v24  ;;  %v4080_v22 = vld [vmem:[%s4759_s3 + $0x108] sm:$0xff]  ;;  %v5094_v12 = vsub.f32 %v5057_v13, %v3831_v15  ;;  %v1171_v29 = vsub.f32 %v3843_v26, %v1075_v46 }
 0x179   : > { %v1190_v31 = vpack.c.bf16 %v5092_v61, %v1160_v39  ;;  %5093 = vst [vmem:[#allocation71_spill] sm:$0xff] %v4080_v22  ;;  %v1172_v37 = vsub.f32 %v3843_v26, %v1076_v38  ;;  %1676 = vperm.xlu1 %2549, %v3742_v36   ;;  %v897_v39 = vsub.bf16 1065369472, %v881_v30  ;;  %1736 = vperm.xlu0 %2573, %v4080_v22   ;;  %v5160_v22 = vld [vmem:[#allocation73_spill] sm:$0xff] }
 0x17a   : > { %v1191_v23 = vpack.c.bf16 %v5094_v12, %v1163_v14  ;;  %v5096_v21 = vsub.f32 %v5057_v13, %v3835_v47  ;;  %v1175_v15 = vsub.f32 %v3882_v45, %v1079_v17  ;;  %v1176_v14 = vsub.f32 %v3882_v45, %v1080_v50 }
 0x17b   : > { %v4090_v55 = vpop.permute.xlu0 %1636  ;;  %v4099_v46 = vmax.bf16 %v5004_v48, %v895_v33  ;;  %v1413_v26 = vand.u32 2147450879, %v1189_v59  ;;  %v5097_v38 = vsub.f32 %v5058_v11, %v3847_v58  ;;  %v1179_v30 = vsub.f32 %v3913_v18, %v1083_v34 }
 0x17c   : > { %v4088_v63 = vpop.permute.xlu1 %1216  ;;  %5095 = vst [vmem:[#allocation21_spill] sm:$0xff] %v4090_v55  ;;  %v1192_v20 = vpack.c.bf16 %v5096_v21, %v1164_v25  ;;  %v1180_v12 = vsub.f32 %v3913_v18, %v1084_v41  ;;  %v1414_v55 = vand.u32 2147450879, %v1190_v31  ;;  %v5098_v47 = vsub.f32 %v5058_v11, %v3866_v56  ;;  %v5102_v18 = vld [vmem:[#allocation38_spill] sm:$0xff] }
 0x17d   : > { %v1193_v61 = vpack.c.bf16 %v5097_v38, %v1167_v52  ;;  %v1183_v25 = vsub.f32 %v3958_v51, %v1087_v40  ;;  %v1184_v45 = vsub.f32 %v3958_v51, %v1088_v28  ;;  %v5099_v33 = vsub.f32 %v5036_v62, %v3728_v32  ;;  %v5100_v52 = vld [vmem:[#allocation66_spill] sm:$0xff]  ;;  %2577 = vset.pattern.permute.xlu0 %v4919_v57  ;;  %v5107_v40 = vld [vmem:[#allocation29_spill] sm:$0xff] }
 0x17e   : > { %v1194_v13 = vpack.c.bf16 %v5098_v47, %v1168_v8  ;;  %v1415_v58 = vand.u32 2147450879, %v1191_v23  ;;  %v5101_v17 = vsub.f32 %v5071_v0, %v5100_v52  ;;  %v5103_v31 = vsub.f32 %v5071_v0, %v5102_v18  ;;  %v5116_v18 = vld [vmem:[#allocation27_spill] sm:$0xff] }
 0x17f   : > { %v4114_v59 = vpack.c.bf16 %v1157_v2, %v5099_v33  ;;  %v5104_v56 = vmov 3   ;;  %v1416_v51 = vand.u32 2147450879, %v1192_v20  ;;  %v5105_v32 = vsub.f32 %v5079_v54, %v3927_v4  ;;  %v4133_v28 = vpop.permute.xlu0 %756 }
 0x180   : > { %v1195_v50 = vpack.c.bf16 %v5101_v17, %v1171_v29  ;;  %v1196_v34 = vpack.c.bf16 %v5103_v31, %v1172_v37  ;;  %2550 = vset.pattern.permute.xlu1 %v5104_v56  ;;  %v4123_v11 = vpop.permute.xlu1 %1224  ;;  %v5106_v41 = vsub.f32 %v5079_v54, %v3939_v44  ;;  %v898_v0 = vsub.bf16 1065369472, %v882_v27 }
 0x181   : > { %v1197_v2 = vpack.c.bf16 %v5105_v32, %v1175_v15  ;;  %1884 = vperm.xlu1 %2550, %v5107_v40   ;;  %v1429_v23 = vsub.bf16 1065369472, %v1413_v26  ;;  %v1417_v29 = vand.u32 2147450879, %v1193_v61  ;;  %v5108_v37 = vsub.f32 %v5085_v10, %v3952_v42  ;;  %v5112_v26 = vld [vmem:[#allocation14_spill] sm:$0xff] }
 0x182   : > { %v1198_v8 = vpack.c.bf16 %v5106_v41, %v1176_v14  ;;  %v5109_v20 = vsub.f32 %v5085_v10, %v3956_v49  ;;  %v1430_v15 = vsub.bf16 1065369472, %v1414_v55  ;;  %v1418_v38 = vand.u32 2147450879, %v1194_v13  ;;  %v5118_v41 = vld [vmem:[#allocation28_spill] sm:$0xff] }
 0x183   : > { %v1199_v21 = vpack.c.bf16 %v5108_v37, %v1179_v30  ;;  %v5110_v44 = vsub.f32 %v5089_v1, %v3975_v43  ;;  %v5111_v14 = vsub.f32 %v5089_v1, %v3979_v53  ;;  %v5113_v61 = vsub.f32 %v5036_v62, %v5112_v26  ;;  %v769_v53 = vpop.permute.xlu0 %768 }
 0x184   : > { %v1200_v4 = vpack.c.bf16 %v5109_v20, %v1180_v12  ;;  %v5114_v42 = vsub.f32 %v3649_v9, %v4001_v6  ;;  %v1431_v49 = vsub.bf16 1065369472, %v1415_v58  ;;  %v1419_v10 = vand.u32 2147450879, %v1195_v50  ;;  %v4155_v12 = vpop.permute.xlu1 %1232  ;;  %v2585_v9 = vld [vmem:[%s4759_s3 + $0x150] sm:$0xff] }
 0x185   : > { %v1201_v54 = vpack.c.bf16 %v5110_v44, %v1183_v25  ;;  %v1202_v27 = vpack.c.bf16 %v5111_v14, %v1184_v45  ;;  %v1420_v55 = vand.u32 2147450879, %v1196_v34  ;;  %v1432_v47 = vsub.bf16 1065369472, %v1416_v51  ;;  %2551 = vset.pattern.permute.xlu1 %v5004_v48  ;;  %v5125_v14 = vld [vmem:[#allocation25_spill] sm:$0xff] }
 0x186   : > { %v4153_v30 = vpack.c.bf16 %v5114_v42, %v5113_v61  ;;  %v1421_v43 = vand.u32 2147450879, %v1197_v2  ;;  %v1422_v13 = vand.u32 2147450879, %v1198_v8  ;;  %v4159_v1 = vmax.bf16 %v5004_v48, %v897_v39  ;;  %1772 = vperm.xlu1 %2551, %v2585_v9   ;;  %v5127_v61 = vld [vmem:[#allocation30_spill] sm:$0xff] }
 0x187   : > { %v1433_v62 = vsub.bf16 1065369472, %v1417_v29  ;;  %v1423_v25 = vand.u32 2147450879, %v1199_v21  ;;  %v1424_v45 = vand.u32 2147450879, %v1200_v4  ;;  %v4165_v6 = vmax.bf16 %v5004_v48, %v898_v0  ;;  %v777_v40 = vpop.permute.xlu0 %776 }
 0x188   : > { %v1434_v33 = vsub.bf16 1065369472, %v1418_v38  ;;  %v1426_v58 = vand.u32 2147450879, %v1202_v27  ;;  %v1425_v52 = vand.u32 2147450879, %v1201_v54  ;;  %v4168_v17 = vmax.bf16 %v5004_v48, %v1430_v15  ;;  %v4171_v34 = vpop.permute.xlu1 %1240 }
 0x189   : > { %v1435_v50 = vsub.bf16 1065369472, %v1419_v10  ;;  %v1436_v39 = vsub.bf16 1065369472, %v1420_v55  ;;  %v825_v31 = vsub.f32 %v769_v53, %v5116_v18  ;;  %v4174_v51 = vmax.bf16 %v5004_v48, %v1429_v23  ;;  %v5120_v21 = vld [vmem:[#allocation31_spill] sm:$0xff]  ;;  %v5124_v54 = vld [vmem:[#allocation45_spill] sm:$0xff] }
 0x18a   : > { %5115 = vst [vmem:[#allocation98_spill] sm:$0xff] %v4168_v17  ;;  %v1437_v32 = vsub.bf16 1065369472, %v1421_v43  ;;  %v1438_v2 = vsub.bf16 1065369472, %v1422_v13  ;;  %v826_v8 = vsub.f32 %v769_v53, %v5118_v41  ;;  %v4178_v0 = vmax.bf16 %v5004_v48, %v1432_v47  ;;  %1776 = vperm.xlu1 %2551, %v3742_v36   ;;  %v5130_v47 = vld [vmem:[#allocation105_spill] sm:$0xff] }
 0x18b   : > { %5117 = vst [vmem:[#allocation83_spill] sm:$0xff] %v4174_v51  ;;  %v1439_v29 = vsub.bf16 1065369472, %v1423_v25  ;;  %v1440_v37 = vsub.bf16 1065369472, %v1424_v45  ;;  %v830_v20 = vsub.f32 %v777_v40, %v5120_v21  ;;  %v4183_v4 = vmax.bf16 %v5004_v48, %v1431_v49  ;;  %v5132_v53 = vld [vmem:[#allocation47_spill] sm:$0xff]  ;;  %v785_v9 = vpop.permute.xlu0 %784 }
 0x18c   : > { %5119 = vst [vmem:[#allocation44_spill] sm:$0xff] %v4178_v0  ;;  %v1442_v15 = vsub.bf16 1065369472, %v1426_v58  ;;  %v1441_v23 = vsub.bf16 1065369472, %v1425_v52  ;;  %v4186_v38 = vmax.bf16 %v5004_v48, %v1434_v33  ;;  %v4189_v44 = vmax.bf16 %v5004_v48, %v1433_v62  ;;  %v1265_v10 = vpop.permute.xlu1 %1264  ;;  %v5133_v62 = vld [vmem:[#allocation75_spill] sm:$0xff] }
 0x18d   : > { %5121 = vst [vmem:[#allocation89_spill] sm:$0xff] %v4183_v4  ;;  %v5126_v27 = vsub.f32 %v5124_v54, %v5125_v14  ;;  %v829_v42 = vsub.f32 %v777_v40, %v5127_v61  ;;  %v4196_v55 = vmax.bf16 %v5004_v48, %v1436_v39  ;;  %v4199_v49 = vmax.bf16 %v5004_v48, %v1435_v50  ;;  %v5135_v52 = vld [vmem:[#allocation69_spill] sm:$0xff]  ;;  %v5142_v14 = vld [vmem:[#allocation24_spill] sm:$0xff]  ;;  %v5168_v4 = vld [vmem:[#allocation106_spill] sm:$0xff] }
 0x18e   : > { %5122 = vst [vmem:[#allocation22_spill] sm:$0xff] %v4186_v38  ;;  %5123 = vst [vmem:[#allocation93_spill] sm:$0xff] %v4189_v44  ;;  %v5131_v43 = vsub.f32 %v5124_v54, %v5130_v47  ;;  %v5134_v25 = vsub.f32 %v5132_v53, %v5133_v62  ;;  %v4208_v33 = vmax.bf16 %v5004_v48, %v1438_v2  ;;  %v5137_v50 = vld [vmem:[#allocation33_spill] sm:$0xff]  ;;  %2552 = vset.pattern.permute.xlu1 %v4919_v57  ;;  %v5141_v54 = vld [vmem:[#allocation34_spill] sm:$0xff] }
 0x18f   : > { %v853_v26 = vpack.c.bf16 %v825_v31, %v5126_v27  ;;  %5128 = vst [vmem:[#allocation46_spill] sm:$0xff] %v4196_v55  ;;  %5129 = vst [vmem:[#allocation23_spill] sm:$0xff] %v4199_v49  ;;  %v4211_v58 = vmax.bf16 %v5004_v48, %v1437_v32  ;;  %v4215_v39 = vmul.f32 %v4006_v60, %v5135_v52  ;;  %v5140_v32 = vld [vmem:[#allocation32_spill] sm:$0xff]  ;;  %1984 = vperm.xlu1 %2552, %v3742_v36   ;;  %v5146_v62 = vld [vmem:[#allocation50_spill] sm:$0xff] }
 0x190   : > { %v854_v13 = vpack.c.bf16 %v826_v8, %v5131_v43  ;;  %v856_v45 = vpack.c.bf16 %v830_v20, %v5134_v25  ;;  %v834_v18 = vsub.f32 %v785_v9, %v5137_v50  ;;  %v4220_v31 = vmax.bf16 %v5004_v48, %v1440_v37  ;;  %v5138_v8 = vld [vmem:[#allocation70_spill] sm:$0xff]  ;;  %v793_v50 = vpop.permute.xlu0 %792 }
 0x191   : > { %5136 = vst [vmem:[#allocation49_spill] sm:$0xff] %v4215_v39  ;;  %v4223_v41 = vmax.bf16 %v5004_v48, %v1439_v29  ;;  %v4227_v2 = vmul.f32 %v4006_v60, %v5138_v8  ;;  %v833_v40 = vsub.f32 %v785_v9, %v5140_v32  ;;  %v4232_v21 = vmax.bf16 %v5004_v48, %v1442_v15  ;;  %v5143_v60 = vld [vmem:[#allocation74_spill] sm:$0xff]  ;;  %v4251_v32 = vpop.permute.xlu1 %1360 }
 0x192   : > { %v4235_v20 = vmax.bf16 %v5004_v48, %v1441_v23  ;;  %v819_v37 = vsub.f32 %v4133_v28, %v5141_v54  ;;  %v820_v29 = vsub.f32 %v4133_v28, %v5142_v14  ;;  %v917_v27 = vand.u32 2147450879, %v853_v26  ;;  %v5147_v23 = vld [vmem:[#allocation78_spill] sm:$0xff] }
 0x193   : > { %5139 = vst [vmem:[#allocation26_spill] sm:$0xff] %v4227_v2  ;;  %v5144_v61 = vsub.f32 %v5132_v53, %v5143_v60  ;;  %v4246_v36 = vmul.f32 %v4047_v5, %v5135_v52  ;;  %v918_v15 = vand.u32 2147450879, %v854_v13  ;;  %v920_v43 = vand.u32 2147450879, %v856_v45  ;;  %v5152_v13 = vld [vmem:[#allocation35_spill] sm:$0xff]  ;;  %2553 = vset.pattern.permute.xlu1 %v4966_v16 }
 0x194   : > { %v5148_v25 = vsub.f32 %v5146_v62, %v5147_v23  ;;  %v4255_v28 = vmul.f32 %v4047_v5, %v5138_v8  ;;  %v4259_v26 = vmul.f32 %v4088_v63, %v5135_v52  ;;  %v837_v53 = vsub.f32 %v793_v50, %v5152_v13  ;;  %v5153_v5 = vld [vmem:[#allocation77_spill] sm:$0xff]  ;;  %v5155_v60 = vld [vmem:[#allocation36_spill] sm:$0xff] }
 0x195   : > { %v855_v47 = vpack.c.bf16 %v829_v42, %v5144_v61  ;;  %5145 = vst [vmem:[#allocation51_spill] sm:$0xff] %v4246_v36  ;;  %v4263_v42 = vmul.f32 %v4088_v63, %v5138_v8  ;;  %v4268_v45 = vmul.f32 %v4123_v11, %v5135_v52  ;;  %v5154_v54 = vsub.f32 %v5146_v62, %v5153_v5  ;;  %v5156_v63 = vld [vmem:[#allocation43_spill] sm:$0xff]  ;;  %v5157_v23 = vld [vmem:[#allocation72_spill] sm:$0xff]  ;;  %v5179_v36 = vld [vmem:[#allocation57_spill] sm:$0xff] }
 0x196   : > { %v858_v9 = vpack.c.bf16 %v834_v18, %v5148_v25  ;;  %5149 = vst [vmem:[#allocation66_spill] sm:$0xff] %v4255_v28  ;;  %5150 = vst [vmem:[#allocation38_spill] sm:$0xff] %v4259_v26  ;;  %v4272_v18 = vmul.f32 %v4123_v11, %v5138_v8  ;;  %v838_v61 = vsub.f32 %v793_v50, %v5155_v60  ;;  %v933_v11 = vsub.bf16 1065369472, %v917_v27  ;;  %v5163_v27 = vld [vmem:[#allocation81_spill] sm:$0xff] }
 0x197   : > { %5151 = vst [vmem:[#allocation29_spill] sm:$0xff] %v4263_v42  ;;  %v857_v14 = vpack.c.bf16 %v833_v40, %v5154_v54  ;;  %v5158_v25 = vsub.f32 %v5156_v63, %v5157_v23  ;;  %v5161_v24 = vsub.f32 %v5156_v63, %v5160_v22  ;;  %v919_v51 = vand.u32 2147450879, %v855_v47  ;;  %v4292_v40 = vld [vmem:[%s4759_s3 + $0x140] sm:$0xff]  ;;  %v801_v54 = vpop.permute.xlu0 %800 }
 0x198   : > { %1661 = vperm.xlu1 %2553, %v4292_v40   ;;  %v4297_v62 = vmul.f32 %v4155_v12, %v5135_v52  ;;  %v936_v50 = vsub.bf16 1065369472, %v920_v43  ;;  %v922_v5 = vand.u32 2147450879, %v858_v9  ;;  %v4305_v22 = vmul.f32 %v4171_v34, %v5135_v52  ;;  %v5165_v63 = vld [vmem:[#allocation107_spill] sm:$0xff]  ;;  %v5166_v9 = vld [vmem:[#allocation82_spill] sm:$0xff] }
 0x199   : > { %v4282_v13 = vpack.c.bf16 %v5158_v25, %v819_v37  ;;  %v4287_v3 = vpack.c.bf16 %v5161_v24, %v820_v29  ;;  %v934_v37 = vsub.bf16 1065369472, %v918_v15  ;;  %v4301_v24 = vmul.f32 %v4155_v12, %v5138_v8  ;;  %v5162_v29 = vld [vmem:[#allocation52_spill] sm:$0xff]  ;;  %v1253_v25 = vpop.permute.xlu1 %1252  ;;  %v5189_v42 = vld [vmem:[#allocation90_spill] sm:$0xff] }
 0x19a   : > { %v5164_v47 = vsub.f32 %v5162_v29, %v5163_v27  ;;  %v842_v23 = vsub.f32 %v801_v54, %v5165_v63  ;;  %v4313_v15 = vmul.f32 %v4171_v34, %v5138_v8  ;;  %v921_v43 = vand.u32 2147450879, %v857_v14 }
 0x19b   : > { %5159 = vst [vmem:[#allocation14_spill] sm:$0xff] %v4282_v13  ;;  %v5167_v12 = vsub.f32 %v5162_v29, %v5166_v9  ;;  %v841_v0 = vsub.f32 %v801_v54, %v5168_v4  ;;  %v935_v2 = vsub.bf16 1065369472, %v919_v51  ;;  %v1297_v39 = vmul.f32 %v1265_v10, %v5135_v52  ;;  %v809_v14 = vpop.permute.xlu0 %808  ;;  %v5175_v54 = vld [vmem:[#allocation39_spill] sm:$0xff]  ;;  %v5176_v9 = vld [vmem:[#allocation108_spill] sm:$0xff] }
 0x19c   : > { %v859_v60 = vpack.c.bf16 %v837_v53, %v5164_v47  ;;  %v1298_v27 = vmul.f32 %v1265_v10, %v5138_v8  ;;  %v5169_v53 = vld [vmem:[#allocation54_spill] sm:$0xff]  ;;  %v5170_v47 = vld [vmem:[#allocation85_spill] sm:$0xff]  ;;  %2554 = vset.pattern.permute.xlu1 %v5104_v56  ;;  %v938_v34 = vsub.bf16 1065369472, %v922_v5  ;;  %v4327_v29 = vmax.bf16 %v5004_v48, %v936_v50  ;;  %v5177_v50 = vld [vmem:[#allocation84_spill] sm:$0xff] }
 0x19d   : > { %v860_v17 = vpack.c.bf16 %v838_v61, %v5167_v12  ;;  %v5171_v63 = vsub.f32 %v5169_v53, %v5170_v47  ;;  %1876 = vperm.xlu1 %2554, %v4292_v40   ;;  %v4330_v4 = vmax.bf16 %v5004_v48, %v934_v37  ;;  %v4333_v51 = vmax.bf16 %v5004_v48, %v933_v11  ;;  %v1349_v37 = vpop.permute.xlu1 %1348  ;;  %v5180_v11 = vld [vmem:[#allocation86_spill] sm:$0xff]  ;;  %v5196_v13 = vld [vmem:[#allocation100_spill] sm:$0xff] }
 0x19e   : > { %5172 = vst [vmem:[#allocation27_spill] sm:$0xff] %v4327_v29  ;;  %v923_v10 = vand.u32 2147450879, %v859_v60  ;;  %v1393_v61 = vsub.f32 %v4251_v32, %v1297_v39  ;;  %v846_v12 = vsub.f32 %v809_v14, %v5176_v9  ;;  %v937_v5 = vsub.bf16 1065369472, %v921_v43  ;;  %v5182_v39 = vld [vmem:[#allocation88_spill] sm:$0xff] }
 0x19f   : > { %v862_v44 = vpack.c.bf16 %v842_v23, %v5171_v63  ;;  %5173 = vst [vmem:[#allocation28_spill] sm:$0xff] %v4330_v4  ;;  %5174 = vst [vmem:[#allocation31_spill] sm:$0xff] %v4333_v51  ;;  %v845_v23 = vsub.f32 %v809_v14, %v5175_v54  ;;  %v924_v47 = vand.u32 2147450879, %v860_v17  ;;  %v1394_v63 = vsub.f32 %v4251_v32, %v1298_v27 }
 0x1a0   : > { %v5178_v38 = vsub.f32 %v5169_v53, %v5177_v50  ;;  %v5181_v51 = vsub.f32 %v5179_v36, %v5180_v11  ;;  %v5183_v49 = vsub.f32 %v5179_v36, %v5182_v39  ;;  %v4349_v14 = vmax.bf16 %v5004_v48, %v935_v2  ;;  %v5186_v2 = vld [vmem:[#allocation41_spill] sm:$0xff] }
 0x1a1   : > { %v926_v4 = vand.u32 2147450879, %v862_v44  ;;  %v1291_v17 = vmul.f32 %v1253_v25, %v5135_v52  ;;  %v1292_v32 = vmul.f32 %v1253_v25, %v5138_v8  ;;  %v4357_v44 = vmax.bf16 %v5004_v48, %v938_v34  ;;  %v1353_v50 = vpop.permute.xlu1 %1352  ;;  %v5188_v34 = vld [vmem:[#allocation62_spill] sm:$0xff] }
 0x1a2   : > { %v861_v28 = vpack.c.bf16 %v841_v0, %v5178_v38  ;;  %v863_v60 = vpack.c.bf16 %v845_v23, %v5181_v51  ;;  %v864_v54 = vpack.c.bf16 %v846_v12, %v5183_v49  ;;  %5184 = vst [vmem:[#allocation45_spill] sm:$0xff] %v4349_v14  ;;  %v2587_v0 = vld [vmem:[%s4759_s3 + $0x148] sm:$0xff]  ;;  %v817_v38 = vpop.permute.xlu0 %816  ;;  %v939_v49 = vsub.bf16 1065369472, %v923_v10  ;;  %v5187_v51 = vld [vmem:[#allocation109_spill] sm:$0xff] }
 0x1a3   : > { %1880 = vperm.xlu1 %2554, %v2587_v0   ;;  %v849_v53 = vsub.f32 %v817_v38, %v5186_v2  ;;  %v850_v23 = vsub.f32 %v817_v38, %v5187_v51  ;;  %v940_v9 = vsub.bf16 1065369472, %v924_v47  ;;  %v4364_v11 = vmax.bf16 %v5004_v48, %v937_v5  ;;  %v5191_v10 = vld [vmem:[#allocation91_spill] sm:$0xff]  ;;  %v5193_v38 = vld [vmem:[#allocation17_spill] sm:$0xff] }
 0x1a4   : > { %v928_v27 = vand.u32 2147450879, %v864_v54  ;;  %v925_v25 = vand.u32 2147450879, %v861_v28  ;;  %v927_v12 = vand.u32 2147450879, %v863_v60  ;;  %v1387_v14 = vsub.f32 %v1349_v37, %v1291_v17 }
 0x1a5   : > { %v942_v39 = vsub.bf16 1065369472, %v926_v4  ;;  %v5190_v26 = vsub.f32 %v5188_v34, %v5189_v42  ;;  %v5192_v54 = vsub.f32 %v5188_v34, %v5191_v10  ;;  %v1388_v43 = vsub.f32 %v1349_v37, %v1292_v32  ;;  %v5194_v28 = vld [vmem:[#allocation101_spill] sm:$0xff]  ;;  %v5195_v17 = vld [vmem:[#allocation15_spill] sm:$0xff] }
 0x1a6   : > { %v944_v2 = vsub.bf16 1065369472, %v928_v27  ;;  %v1389_v47 = vsub.f32 %v1353_v50, %v5193_v38  ;;  %v1390_v60 = vsub.f32 %v1353_v50, %v5194_v28  ;;  %v1357_v5 = vpop.permute.xlu0 %1356  ;;  %v4378_v27 = vmax.bf16 %v5004_v48, %v940_v9  ;;  %v1249_v50 = vpop.permute.xlu1 %1248 }
 0x1a7   : > { %v865_v55 = vpack.c.bf16 %v849_v53, %v5190_v26  ;;  %v866_v36 = vpack.c.bf16 %v850_v23, %v5192_v54  ;;  %2555 = vset.pattern.permute.xlu1 %v5004_v48  ;;  %v1391_v29 = vsub.f32 %v1357_v5, %v5195_v17  ;;  %v1392_v42 = vsub.f32 %v1357_v5, %v5196_v13  ;;  %v5198_v17 = vld [vmem:[#allocation102_spill] sm:$0xff] }
 0x1a8   : > { %1768 = vperm.xlu1 %2555, %v2587_v0   ;;  %v943_v26 = vsub.bf16 1065369472, %v927_v12  ;;  %v1407_v53 = vpack.c.bf16 %v1389_v47, %v1387_v14  ;;  %v1408_v34 = vpack.c.bf16 %v1390_v60, %v1388_v43  ;;  %v941_v54 = vsub.bf16 1065369472, %v925_v25 }
 0x1a9   : > { %v929_v51 = vand.u32 2147450879, %v865_v55  ;;  %v930_v4 = vand.u32 2147450879, %v866_v36  ;;  %v1409_v32 = vpack.c.bf16 %v1393_v61, %v1391_v29  ;;  %v1410_v23 = vpack.c.bf16 %v1394_v63, %v1392_v42 }
 0x1aa   : > { %v1471_v38 = vand.u32 2147450879, %v1407_v53  ;;  %v1472_v55 = vand.u32 2147450879, %v1408_v34  ;;  %v1341_v36 = vpop.permute.xlu0 %1340  ;;  %v4381_v28 = vmax.bf16 %v5004_v48, %v939_v49  ;;  %v960_v14 = vmax.bf16 %v5004_v48, %v944_v2  ;;  %v5197_v2 = vld [vmem:[#allocation19_spill] sm:$0xff] }
 0x1ab   : > { %v945_v37 = vsub.bf16 1065369472, %v929_v51  ;;  %v946_v10 = vsub.bf16 1065369472, %v930_v4  ;;  %v1473_v13 = vand.u32 2147450879, %v1409_v32  ;;  %v4386_v43 = vmax.bf16 %v5004_v48, %v942_v39  ;;  %v1345_v51 = vpop.permute.xlu1 %1344 }
 0x1ac   : > { %v1474_v0 = vand.u32 2147450879, %v1410_v23  ;;  %2556 = vset.pattern.permute.xlu1 %v4919_v57  ;;  %v1488_v29 = vsub.bf16 1065369472, %v1472_v55  ;;  %v959_v9 = vmax.bf16 %v5004_v48, %v943_v26  ;;  %v1289_v25 = vmul.f32 %v1249_v50, %v5135_v52 }
 0x1ad   : > { %1972 = vperm.xlu1 %2556, %v4292_v40   ;;  %v962_v61 = vmax.bf16 %v5004_v48, %v946_v10  ;;  %v961_v63 = vmax.bf16 %v5004_v48, %v945_v37  ;;  %v1489_v49 = vsub.bf16 1065369472, %v1473_v13  ;;  %v1290_v12 = vmul.f32 %v1249_v50, %v5138_v8 }
 0x1ae   : > { %v1490_v47 = vsub.bf16 1065369472, %v1474_v0  ;;  %v1487_v60 = vsub.bf16 1065369472, %v1471_v38  ;;  %v1383_v5 = vsub.f32 %v1341_v36, %v5197_v2  ;;  %v1337_v39 = vpop.permute.xlu0 %1336  ;;  %v1384_v42 = vsub.f32 %v1341_v36, %v5198_v17  ;;  %v5199_v38 = vld [vmem:[#allocation37_spill] sm:$0xff]  ;;  %v5202_v2 = vld [vmem:[#allocation99_spill] sm:$0xff] }
 0x1af   : > { %v978_v4 = vmul.bf16 %v962_v61, %v4165_v6  ;;  %v977_v40 = vmul.bf16 %v961_v63, %v4159_v1  ;;  %v1385_v53 = vsub.f32 %v1345_v51, %v1289_v25  ;;  %v1386_v34 = vsub.f32 %v1345_v51, %v1290_v12  ;;  %v1333_v36 = vpop.permute.xlu1 %1332  ;;  %v5200_v61 = vld [vmem:[#allocation11_spill] sm:$0xff]  ;;  %v5201_v12 = vld [vmem:[#allocation13_spill] sm:$0xff] }
 0x1b0   : > { %v976_v26 = vmul.bf16 %v960_v14, %v4058_v7  ;;  %v1411_v37 = vand.u32 2147450879, %v4114_v59  ;;  %v1506_v32 = vmax.bf16 %v5004_v48, %v1490_v47  ;;  %v1505_v23 = vmax.bf16 %v5004_v48, %v1489_v49 }
 0x1b1   : > { %2557 = vset.pattern.permute.xlu1 %v4966_v16  ;;  %1576 = vmatprep.subr.bf16.mxu1 %v978_v4  ;;  %v1504_v50 = vmax.bf16 %v5004_v48, %v1488_v29  ;;  %v1412_v6 = vand.u32 2147450879, %v4153_v30  ;;  %v1405_v1 = vpack.c.bf16 %v1385_v53, %v1383_v5  ;;  %v1406_v10 = vpack.c.bf16 %v1386_v34, %v1384_v42  ;;  %v5203_v42 = vld [vmem:[#allocation12_spill] sm:$0xff] }
 0x1b2   : > { %1651 = vperm.xlu1 %2557, %v5199_v38   ;;  %1577 = vmatpush1.bf16.msra.mxu1 %v977_v40  ;;  %v957_v7 = vmax.bf16 %v5004_v48, %v941_v54  ;;  %v1329_v55 = vpop.permute.xlu0 %1328  ;;  %v1522_v13 = vmul.bf16 %v1506_v32, %v4232_v21  ;;  %v1521_v0 = vmul.bf16 %v1505_v23, %v4235_v20  ;;  %v916_v23 = vand.u32 2147450879, %v4287_v3 }
 0x1b3   : > { %1578 = vmatprep.subr.bf16.mxu1 %v976_v26  ;;  %v1503_v14 = vmax.bf16 %v5004_v48, %v1487_v60  ;;  %v972_v29 = vmul.bf16 %v4378_v27, %v5200_v61  ;;  %v1381_v30 = vsub.f32 %v1337_v39, %v4305_v22  ;;  %v1469_v63 = vand.u32 2147450879, %v1405_v1  ;;  %v4421_v27 = vld [vmem:[%s4759_s3 + $0x138] sm:$0xff]  ;;  %v1325_v51 = vpop.permute.xlu1 %1324  ;;  %v5206_v61 = vld [vmem:[#allocation95_spill] sm:$0xff] }
 0x1b4   : > { %v1470_v49 = vand.u32 2147450879, %v1406_v10  ;;  %v975_v25 = vmul.bf16 %v959_v9, %v4099_v46  ;;  %v1382_v54 = vsub.f32 %v1337_v39, %v4313_v15  ;;  %v1379_v47 = vsub.f32 %v1333_v36, %v5201_v12  ;;  %1529 = vmatprep.subr.bf16.mxu0 %v1522_v13  ;;  %v5209_v12 = vld [vmem:[#allocation68_spill] sm:$0xff] }
 0x1b5   : > { %v1380_v5 = vsub.f32 %v1333_v36, %v5202_v2  ;;  %v1520_v21 = vmul.bf16 %v1504_v50, %v4220_v31  ;;  %v1485_v20 = vsub.bf16 1065369472, %v1469_v63  ;;  %1530 = vmatpush1.bf16.msra.mxu0 %v1521_v0  ;;  %v974_v46 = vmul.bf16 %v4386_v43, %v4016_v35  ;;  %v5204_v35 = vld [vmem:[#allocation97_spill] sm:$0xff] }
 0x1b6   : > { %v1486_v60 = vsub.bf16 1065369472, %v1470_v49  ;;  %1656 = vperm.xlu1 %2557, %v4421_v27   ;;  %v973_v22 = vmul.bf16 %v957_v7, %v4019_v19  ;;  %v4427_v15 = vsub.bf16 1065369472, %v1412_v6  ;;  %v1403_v9 = vpack.c.bf16 %v1381_v30, %v1379_v47  ;;  %1579 = vmatpush1.bf16.msra.mxu1 %v975_v25  ;;  %v1321_v31 = vpop.permute.xlu0 %1320  ;;  %v5207_v30 = vld [vmem:[#allocation96_spill] sm:$0xff]  ;;  %v5210_v47 = vld [vmem:[#allocation14_spill] sm:$0xff] }
 0x1b7   : > { %v1404_v39 = vpack.c.bf16 %v1382_v54, %v1380_v5  ;;  %1531 = vmatprep.subr.bf16.mxu0 %v1520_v21  ;;  %v1519_v4 = vmul.bf16 %v1503_v14, %v4223_v41  ;;  %v1377_v40 = vsub.f32 %v1329_v55, %v4297_v62  ;;  %v1378_v17 = vsub.f32 %v1329_v55, %v4301_v24  ;;  %v5205_v41 = vld [vmem:[#allocation87_spill] sm:$0xff]  ;;  %v1317_v7 = vpop.permute.xlu1 %1316 }
 0x1b8   : > { %1580 = vmatprep.subr.bf16.mxu1 %v974_v46  ;;  %v1375_v53 = vsub.f32 %v1325_v51, %v5203_v42  ;;  %v1376_v43 = vsub.f32 %v1325_v51, %v5204_v35  ;;  %v1467_v19 = vand.u32 2147450879, %v1403_v9  ;;  %v1502_v26 = vmax.bf16 %v5004_v48, %v1486_v60 }
 0x1b9   : > { %v1468_v34 = vand.u32 2147450879, %v1404_v39  ;;  %v1501_v32 = vmax.bf16 %v5004_v48, %v1485_v20  ;;  %1532 = vmatpush1.bf16.msra.mxu0 %v1519_v4  ;;  %v971_v62 = vmul.bf16 %v4381_v28, %v5205_v41  ;;  %v1373_v3 = vsub.f32 %v1321_v31, %v4268_v45  ;;  %v5211_v20 = vld [vmem:[#allocation46_spill] sm:$0xff]  ;;  %v5213_v39 = vld [vmem:[#allocation29_spill] sm:$0xff] }
 0x1ba   : > { %v1401_v50 = vpack.c.bf16 %v1377_v40, %v1375_v53  ;;  %v1402_v6 = vpack.c.bf16 %v1378_v17, %v1376_v43  ;;  %2558 = vset.pattern.permute.xlu1 %v5104_v56  ;;  %v1483_v24 = vsub.bf16 1065369472, %v1467_v19  ;;  %1581 = vmatpush1.bf16.msra.mxu1 %v973_v22  ;;  %v1313_v10 = vpop.permute.xlu0 %1312  ;;  %v1518_v55 = vmul.bf16 %v1502_v26, %v4208_v33  ;;  %v5212_v22 = vld [vmem:[#allocation38_spill] sm:$0xff]  ;;  %v5215_v17 = vld [vmem:[#allocation51_spill] sm:$0xff]  ;;  %v5217_v43 = vld [vmem:[#allocation92_spill] sm:$0xff] }
 0x1bb   : > { %v1484_v1 = vsub.bf16 1065369472, %v1468_v34  ;;  %1872 = vperm.xlu1 %2558, %v4421_v27   ;;  %v1517_v36 = vmul.bf16 %v1501_v32, %v4211_v58  ;;  %v1374_v13 = vsub.f32 %v1321_v31, %v4272_v18  ;;  %1582 = vmatprep.subr.bf16.mxu1 %v972_v29  ;;  %v1371_v28 = vsub.f32 %v1317_v7, %v5206_v61  ;;  %v5208_v58 = vld [vmem:[#allocation80_spill] sm:$0xff]  ;;  %v5216_v53 = vld [vmem:[#allocation66_spill] sm:$0xff]  ;;  %v5218_v32 = vld [vmem:[#allocation67_spill] sm:$0xff] }
 0x1bc   : > { %v1465_v0 = vand.u32 2147450879, %v1401_v50  ;;  %v1466_v14 = vand.u32 2147450879, %v1402_v6  ;;  %v1372_v63 = vsub.f32 %v1317_v7, %v5207_v30  ;;  %1533 = vmatprep.subr.bf16.mxu0 %v1518_v55  ;;  %v1499_v25 = vmax.bf16 %v5004_v48, %v1483_v24  ;;  %v5221_v55 = vld [vmem:[#allocation27_spill] sm:$0xff]  ;;  %v5225_v61 = vld [vmem:[#allocation93_spill] sm:$0xff] }
 0x1bd   : > { %v1500_v49 = vmax.bf16 %v5004_v48, %v1484_v1  ;;  %1534 = vmatpush1.bf16.msra.mxu0 %v1517_v36  ;;  %v970_v45 = vmul.bf16 %v4357_v44, %v5208_v58  ;;  %v969_v18 = vmul.bf16 %v4364_v11, %v5209_v12  ;;  %v915_v29 = vand.u32 2147450879, %v5210_v47  ;;  %v1309_v44 = vpop.permute.xlu1 %1308  ;;  %v5214_v11 = vld [vmem:[#allocation23_spill] sm:$0xff]  ;;  %v5222_v36 = vld [vmem:[#allocation18_spill] sm:$0xff] }
 0x1be   : > { %v1481_v54 = vsub.bf16 1065369472, %v1465_v0  ;;  %v1482_v33 = vsub.bf16 1065369472, %v1466_v14  ;;  %v1399_v2 = vpack.c.bf16 %v1373_v3, %v1371_v28  ;;  %v1400_v5 = vpack.c.bf16 %v1374_v13, %v1372_v63  ;;  %1583 = vmatpush1.bf16.msra.mxu1 %v971_v62  ;;  %v1305_v21 = vpop.permute.xlu0 %1304  ;;  %v5224_v0 = vld [vmem:[#allocation22_spill] sm:$0xff]  ;;  %v5228_v58 = vld [vmem:[#allocation103_spill] sm:$0xff] }
 0x1bf   : > { %2559 = vset.pattern.permute.xlu1 %v5004_v48  ;;  %v1516_v60 = vmul.bf16 %v1500_v49, %v5211_v20  ;;  %v932_v46 = vsub.bf16 1065369472, %v916_v23  ;;  %v1369_v9 = vsub.f32 %v1313_v10, %v5212_v22  ;;  %v1370_v31 = vsub.f32 %v1313_v10, %v5213_v39  ;;  %1584 = vmatprep.subr.bf16.mxu1 %v970_v45  ;;  %v5219_v23 = vld [vmem:[#allocation45_spill] sm:$0xff]  ;;  %v5220_v10 = vld [vmem:[#allocation94_spill] sm:$0xff]  ;;  %v5229_v45 = vld [vmem:[#allocation28_spill] sm:$0xff] }
 0x1c0   : > { %1756 = vperm.xlu1 %2559, %v5199_v38   ;;  %v1515_v51 = vmul.bf16 %v1499_v25, %v5214_v11  ;;  %v1463_v4 = vand.u32 2147450879, %v1399_v2  ;;  %v1464_v40 = vand.u32 2147450879, %v1400_v5  ;;  %v1367_v42 = vsub.f32 %v1309_v44, %v5215_v17  ;;  %v5226_v49 = vld [vmem:[#allocation49_spill] sm:$0xff]  ;;  %v5232_v39 = vld [vmem:[#allocation104_spill] sm:$0xff] }
 0x1c1   : > { %v1368_v35 = vsub.f32 %v1309_v44, %v5216_v53  ;;  %1535 = vmatprep.subr.bf16.mxu0 %v1516_v60  ;;  %v1365_v19 = vsub.f32 %v1305_v21, %v5217_v43  ;;  %v1498_v34 = vmax.bf16 %v5004_v48, %v1482_v33  ;;  %v1497_v26 = vmax.bf16 %v5004_v48, %v1481_v54  ;;  %v1301_v13 = vpop.permute.xlu1 %1300  ;;  %v5227_v54 = vld [vmem:[#allocation26_spill] sm:$0xff]  ;;  %v5230_v60 = vld [vmem:[#allocation44_spill] sm:$0xff] }
 0x1c2   : > { %1536 = vmatpush1.bf16.msra.mxu0 %v1515_v51  ;;  %v967_v50 = vmul.bf16 %v5219_v23, %v5218_v32  ;;  %v1479_v6 = vsub.bf16 1065369472, %v1463_v4  ;;  %v1480_v41 = vsub.bf16 1065369472, %v1464_v40  ;;  %v1397_v62 = vpack.c.bf16 %v1369_v9, %v1367_v42  ;;  %1585 = vmatpush1.bf16.msra.mxu1 %v969_v18  ;;  %v5234_v53 = vld [vmem:[#allocation76_spill] sm:$0xff]  ;;  %v5236_v32 = vld [vmem:[#allocation98_spill] sm:$0xff] }
 0x1c3   : > { %v1398_v24 = vpack.c.bf16 %v1370_v31, %v1368_v35  ;;  %v931_v1 = vsub.bf16 1065369472, %v915_v29  ;;  %v1366_v7 = vsub.f32 %v1305_v21, %v5220_v10  ;;  %v5223_v3 = vmul.bf16 %v5221_v55, %v5222_v36  ;;  %v5233_v31 = vld [vmem:[#allocation31_spill] sm:$0xff]  ;;  %v5235_v43 = vld [vmem:[#allocation16_spill] sm:$0xff] }
 0x1c4   : > { %2561 = vset.pattern.permute.xlu1 %v4919_v57  ;;  %v1514_v14 = vmul.bf16 %v1498_v34, %v5224_v0  ;;  %v1513_v28 = vmul.bf16 %v1497_v26, %v5225_v61  ;;  %v1461_v30 = vand.u32 2147450879, %v1397_v62  ;;  %v1363_v25 = vsub.f32 %v1301_v13, %v5226_v49  ;;  %v5237_v23 = vld [vmem:[#allocation83_spill] sm:$0xff]  ;;  %v5238_v36 = vld [vmem:[#allocation64_spill] sm:$0xff]  ;;  %v5240_v61 = vld [vmem:[#allocation65_spill] sm:$0xff] }
 0x1c5   : > { %1586 = vmatprep.subr.bf16.mxu1 %v5223_v3  ;;  %v1462_v63 = vand.u32 2147450879, %v1398_v24  ;;  %v1364_v33 = vsub.f32 %v1301_v13, %v5227_v54  ;;  %1964 = vperm.xlu1 %2561, %v5199_v38   ;;  %v966_v12 = vmul.bf16 %v5229_v45, %v5228_v58  ;;  %v1496_v18 = vmax.bf16 %v5004_v48, %v1480_v41  ;;  %v5231_v38 = vld [vmem:[#allocation89_spill] sm:$0xff]  ;;  %v2589_v62 = vld [vmem:[%s4759_s3 + $0x128] sm:$0xff]  ;;  %v2578_v55 = vld [vmem:[%s3860_s16 + $0x4] ss:$12 sps:$4 sm:$0xff]  }
 0x1c6   : > { %1537 = vmatprep.subr.bf16.mxu0 %v1514_v14  ;;  %v1495_v47 = vmax.bf16 %v5004_v48, %v1479_v6  ;;  %v948_v29 = vmax.bf16 %v5004_v48, %v932_v46  ;;  %v1477_v2 = vsub.bf16 1065369472, %v1461_v30  ;;  %v1395_v21 = vpack.c.bf16 %v1365_v19, %v1363_v25  ;;  %1587 = vmatpush1.bf16.msra.mxu1 %v967_v50  ;;  %v1692_v46 = vpop.permute.xlu1 %1691  ;;  %v2590_v13 = vld [vmem:[%s4759_s3 + $0x120] sm:$0xff]  ;;  %v5241_v49 = vld [vmem:[#allocation53_spill] sm:$0xff] }
 0x1c7   : > { %v1478_v5 = vsub.bf16 1065369472, %v1462_v63  ;;  %v1396_v20 = vpack.c.bf16 %v1366_v7, %v1364_v33  ;;  %1538 = vmatpush1.bf16.msra.mxu0 %v1513_v28  ;;  %1588 = vmatprep.subr.bf16.mxu1 %v966_v12  ;;  %v1512_v22 = vmul.bf16 %v1496_v18, %v5230_v60  ;;  %v965_v44 = vmul.bf16 %v5233_v31, %v5232_v39  ;;  %v5239_v0 = vld [vmem:[#allocation79_spill] sm:$0xff]  ;;  %v2001_v63 = vpop.permute.xlu0 %2000 }
 0x1c8   : > { %v1511_v9 = vmul.bf16 %v1495_v47, %v5231_v38  ;;  %v947_v11 = vmax.bf16 %v5004_v48, %v931_v1  ;;  %v1459_v51 = vand.u32 2147450879, %v1395_v21  ;;  %v1493_v17 = vmax.bf16 %v5004_v48, %v1477_v2 }
 0x1c9   : > { %v1460_v4 = vand.u32 2147450879, %v1396_v20  ;;  %1968 = vperm.xlu1 %2561, %v4421_v27   ;;  %v1494_v40 = vmax.bf16 %v5004_v48, %v1478_v5  ;;  %v1427_v42 = vsub.bf16 1065369472, %v1411_v37  ;;  %1539 = vmatprep.subr.bf16.mxu0 %v1512_v22  ;;  %v964_v35 = vmul.bf16 %v948_v29, %v5234_v53 }
 0x1ca   : > { %v899_v19 = vmax.bf16 %v5004_v48, %v5235_v43  ;;  %v1475_v34 = vsub.bf16 1065369472, %v1459_v51  ;;  %1589 = vmatpush1.bf16.msra.mxu1 %v965_v44  ;;  %v1509_v50 = vmul.bf16 %v1493_v17, %v5237_v23  ;;  %v1444_v6 = vmax.bf16 %v5004_v48, %v4427_v15  ;;  %v1901_v24 = vpop.permute.xlu1 %1900 }
 0x1cb   : > { %v1476_v26 = vsub.bf16 1065369472, %v1460_v4  ;;  %1540 = vmatpush1.bf16.msra.mxu0 %v1511_v9  ;;  %v1510_v27 = vmul.bf16 %v1494_v40, %v5236_v32  ;;  %1590 = vmatprep.subr.bf16.mxu1 %v964_v35  ;;  %v1443_v1 = vmax.bf16 %v5004_v48, %v1427_v42  ;;  %v1727_v3 = vmul.f32 %v1692_v46, %v5238_v36  ;;  %v4523_v2 = vpop.permute.xlu0 %1980 }
 0x1cc   : > { %v963_v59 = vmul.bf16 %v947_v11, %v899_v19  ;;  %v1491_v41 = vmax.bf16 %v5004_v48, %v1475_v34  ;;  %v1729_v14 = vmul.f32 %v5239_v0, %v5238_v36  ;;  %v1730_v28 = vmul.f32 %v5239_v0, %v5240_v61 }
 0x1cd   : > { %2562 = vset.pattern.permute.xlu1 %v4966_v16  ;;  %1541 = vmatprep.subr.bf16.mxu0 %v1510_v27  ;;  %v1492_v37 = vmax.bf16 %v5004_v48, %v1476_v26  ;;  %v1728_v30 = vmul.f32 %v1692_v46, %v5240_v61  ;;  %v1823_v25 = vsub.f32 %v5241_v49, %v1727_v3  ;;  %v2591_v27 = vld [vmem:[%s4759_s3 + $0x110] sm:$0xff] }
 0x1ce   : > { %1646 = vperm.xlu1 %2562, %v2589_v62   ;;  %1591 = vmatpush1.bf16.msra.mxu1 %v963_v59  ;;  %v1507_v10 = vmul.bf16 %v1491_v41, %v1443_v1  ;;  %v1905_v7 = vpop.permute.xlu1 %1904  ;;  %v1935_v5 = vmul.f32 %v1901_v24, %v5135_v52  ;;  %v1936_v21 = vmul.f32 %v1901_v24, %v5138_v8  ;;  %v5242_v3 = vld [vmem:[#allocation56_spill] sm:$0xff] }
 0x1cf   : > { %1542 = vmatpush1.bf16.msra.mxu0 %v1509_v50  ;;  %v1508_v15 = vmul.bf16 %v1492_v37, %v1444_v6  ;;  %v1824_v33 = vsub.f32 %v5241_v49, %v1728_v30  ;;  %v1937_v58 = vmul.f32 %v1905_v7, %v5135_v52  ;;  %v1938_v18 = vmul.f32 %v1905_v7, %v5138_v8  ;;  %v4528_v4 = vpop.permute.xlu0 %1976 }
 0x1d1   : > { %1543 = vmatprep.subr.bf16.mxu0 %v1508_v15  ;;  %v2033_v20 = vsub.f32 %v2001_v63, %v1937_v58  ;;  %v2034_v38 = vsub.f32 %v2001_v63, %v1938_v18  ;;  %v2592_v15 = vld [vmem:[%s4759_s3 + $0x118] sm:$0xff] }
 0x1d2   : > { %2563 = vset.pattern.permute.xlu1 %v5104_v56  ;;  %v1793_v54 = vpop.permute.xlu1 %1792 }
 0x1d3   : > { %1544 = vmatpush1.bf16.msra.mxu0 %v1507_v10  ;;  %1860 = vperm.xlu1 %2563, %v2590_v13   ;;  %v1825_v45 = vsub.f32 %v1793_v54, %v1729_v14  ;;  %v1826_v12 = vsub.f32 %v1793_v54, %v1730_v28  ;;  %v4538_v23 = vpop.permute.xlu0 %1956 }
 0x1d5   : > { %v1841_v47 = vpack.c.bf16 %v1825_v45, %v1823_v25  ;;  %v1842_v29 = vpack.c.bf16 %v1826_v12, %v1824_v33 }
 0x1d6   : > { %1562 = vmatmul.mubr.bf16.vlgmr.msra.gmra.mxu0 %v2578_v55  ;;  %v1997_v22 = vpop.permute.xlu1 %1996 }
 0x1d7   : > { %2564 = vset.pattern.permute.xlu1 %v5004_v48  ;;  %2201 = vmatprep.mubr.bf16.mxu0 %v5004_v48  ;;  %v2065_v60 = vand.u32 2147450879, %v1841_v47  ;;  %v2066_v9 = vand.u32 2147450879, %v1842_v29  ;;  %v2031_v39 = vsub.f32 %v1997_v22, %v1935_v5  ;;  %v2032_v31 = vsub.f32 %v1997_v22, %v1936_v21  ;;  %v4541_v37 = vpop.permute.xlu0 %1952 }
 0x1d8   : > { %1748 = vperm.xlu1 %2564, %v2590_v13  }
 0x1d9   : > { %v2049_v44 = vpack.c.bf16 %v2033_v20, %v2031_v39  ;;  %v2050_v11 = vpack.c.bf16 %v2034_v38, %v2032_v31  ;;  %v2081_v51 = vsub.bf16 1065369472, %v2065_v60  ;;  %v2082_v46 = vsub.bf16 1065369472, %v2066_v9  ;;  %v2580_v31 = vld [vmem:[%s3860_s16] ss:$12 sps:$4 sm:$0xff]  }
 0x1da   : > { %v1682_v42 = vpop.permute.xlu1 %1681  ;;  %1609 = vmatmul.mubr.bf16.vlgmr.msra.gmra.mxu1 %v2580_v31 }
 0x1db   : > { %v2113_v40 = vand.u32 2147450879, %v2049_v44  ;;  %v2114_v17 = vand.u32 2147450879, %v2050_v11  ;;  %v2097_v43 = vmax.bf16 %v5004_v48, %v2081_v51  ;;  %v2098_v26 = vmax.bf16 %v5004_v48, %v2082_v46  ;;  %v1893_v14 = vpop.permute.xlu0 %1892  ;;  %v2593_v44 = vld [vmem:[%s4759_s3 + $0x100] sm:$0xff] }
 0x1dc   : > { %1752 = vperm.xlu1 %2564, %v2589_v62   ;;  %v1723_v41 = vmul.f32 %v1682_v42, %v5238_v36  ;;  %v1931_v49 = vmul.f32 %v1893_v14, %v5135_v52  ;;  %v1932_v25 = vmul.f32 %v1893_v14, %v5138_v8 }
 0x1dd   : > { %v2129_v53 = vsub.bf16 1065369472, %v2113_v40  ;;  %v2130_v35 = vsub.bf16 1065369472, %v2114_v17 }
 0x1de   : > { %v1687_v34 = vpop.permute.xlu1 %1686 }
 0x1df   : > { %v2145_v19 = vmax.bf16 %v5004_v48, %v2129_v53  ;;  %v2146_v32 = vmax.bf16 %v5004_v48, %v2130_v35  ;;  %v1725_v24 = vmul.f32 %v1687_v34, %v5238_v36  ;;  %v1726_v1 = vmul.f32 %v1687_v34, %v5240_v61  ;;  %v5243_v53 = vld [vmem:[#allocation71_spill] sm:$0xff] }
 0x1e0   : > { %2565 = vset.pattern.permute.xlu1 %v4919_v57 }
 0x1e1   : > { %1960 = vperm.xlu1 %2565, %v2589_v62   ;;  %v2162_v50 = vmul.bf16 %v2146_v32, %v2098_v26  ;;  %v2161_v6 = vmul.bf16 %v2145_v19, %v2097_v43  ;;  %v1724_v62 = vmul.f32 %v1682_v42, %v5240_v61  ;;  %v1821_v13 = vsub.f32 %v5242_v3, %v1725_v24  ;;  %v2594_v19 = vld [vmem:[%s4759_s3 + $0x108] sm:$0xff] }
 0x1e2   : > { %v1897_v59 = vpop.permute.xlu1 %1896  ;;  %v1822_v0 = vsub.f32 %v5242_v3, %v1726_v1  ;;  %v5244_v26 = vld [vmem:[#allocation20_spill] sm:$0xff] }
 0x1e3   : > { %2169 = vmatprep.subr.bf16.mxu0 %v2162_v50  ;;  %v1933_v54 = vmul.f32 %v1897_v59, %v5135_v52  ;;  %v1934_v33 = vmul.f32 %v1897_v59, %v5138_v8  ;;  %v1719_v32 = vmul.f32 %v5244_v26, %v5238_v36  ;;  %v1889_v59 = vpop.permute.xlu0 %1888 }
 0x1e4   : > { %2170 = vmatpush1.bf16.msra.mxu0 %v2161_v6 }
 0x1e5   : > { %2566 = vset.pattern.permute.xlu1 %v4966_v16 }
 0x1e6   : > { %1631 = vperm.xlu1 %2566, %v2591_v27   ;;  %v1781_v10 = vpop.permute.xlu1 %1780 }
 0x1e7   : > { %v1819_v7 = vsub.f32 %v1781_v10, %v1723_v41  ;;  %v1820_v55 = vsub.f32 %v1781_v10, %v1724_v62 }
 0x1e9   : > { %v1839_v28 = vpack.c.bf16 %v1821_v13, %v1819_v7  ;;  %v1840_v30 = vpack.c.bf16 %v1822_v0, %v1820_v55  ;;  %v1929_v7 = vmul.f32 %v1889_v59, %v5135_v52  ;;  %v1930_v55 = vmul.f32 %v1889_v59, %v5138_v8 }
 0x1ea   : > { %2568 = vset.pattern.permute.xlu1 %v5104_v56  ;;  %v1989_v63 = vpop.permute.xlu1 %1988 }
 0x1eb   : > { %1852 = vperm.xlu1 %2568, %v2591_v27   ;;  %v2063_v58 = vand.u32 2147450879, %v1839_v28  ;;  %v2064_v45 = vand.u32 2147450879, %v1840_v30  ;;  %v2027_v18 = vsub.f32 %v1989_v63, %v1931_v49  ;;  %v2028_v47 = vsub.f32 %v1989_v63, %v1932_v25 }
 0x1ed   : > { %v2079_v60 = vsub.bf16 1065369472, %v2063_v58  ;;  %v2080_v22 = vsub.bf16 1065369472, %v2064_v45 }
 0x1ee   : > { %v1993_v12 = vpop.permute.xlu1 %1992 }
 0x1ef   : > { %1856 = vperm.xlu1 %2568, %v2592_v15   ;;  %v2029_v29 = vsub.f32 %v1993_v12, %v1933_v54  ;;  %v2030_v5 = vsub.f32 %v1993_v12, %v1934_v33  ;;  %v2095_v46 = vmax.bf16 %v5004_v48, %v2079_v60  ;;  %v2096_v17 = vmax.bf16 %v5004_v48, %v2080_v22 }
 0x1f1   : > { %v2047_v21 = vpack.c.bf16 %v2029_v29, %v2027_v18  ;;  %v2048_v20 = vpack.c.bf16 %v2030_v5, %v2028_v47 }
 0x1f3   : > { %2569 = vset.pattern.permute.xlu1 %v5004_v48  ;;  %v2111_v38 = vand.u32 2147450879, %v2047_v21  ;;  %v2112_v9 = vand.u32 2147450879, %v2048_v20 }
 0x1f4   : > { %1744 = vperm.xlu1 %2569, %v2592_v15   ;;  %v1677_v39 = vpop.permute.xlu1 %1676 }
 0x1f5   : > { %v2127_v11 = vsub.bf16 1065369472, %v2111_v38  ;;  %v2128_v51 = vsub.bf16 1065369472, %v2112_v9  ;;  %v1721_v50 = vmul.f32 %v1677_v39, %v5238_v36  ;;  %v1722_v6 = vmul.f32 %v1677_v39, %v5240_v61 }
 0x1f7   : > { %v2143_v40 = vmax.bf16 %v5004_v48, %v2127_v11  ;;  %v2144_v42 = vmax.bf16 %v5004_v48, %v2128_v51 }
 0x1f8   : > { %2570 = vset.pattern.permute.xlu1 %v4919_v57 }
 0x1f9   : > { %1948 = vperm.xlu1 %2570, %v2591_v27   ;;  %v2160_v35 = vmul.bf16 %v2144_v42, %v2096_v17  ;;  %v2159_v43 = vmul.bf16 %v2143_v40, %v2095_v46  ;;  %v1720_v27 = vmul.f32 %v5244_v26, %v5240_v61  ;;  %v5246_v46 = vld [vmem:[#allocation60_spill] sm:$0xff] }
 0x1fb   : > { %2171 = vmatprep.subr.bf16.mxu0 %v2160_v35 }
 0x1fc   : > { %2172 = vmatpush1.bf16.msra.mxu0 %v2159_v43 }
 0x1fd   : > { %2572 = vset.pattern.permute.xlu1 %v4966_v16  ;;  %v1885_v16 = vpop.permute.xlu1 %1884 }
 0x1fe   : > { %1621 = vperm.xlu1 %2572, %v2593_v44   ;;  %v1928_v10 = vmul.f32 %v1885_v16, %v5138_v8 }
 0x200   : > { %v2024_v30 = vsub.f32 %v4523_v2, %v1928_v10 }
 0x201   : > { %v1773_v34 = vpop.permute.xlu1 %1772 }
 0x202   : > { %1626 = vperm.xlu1 %2572, %v5243_v53   ;;  %v1815_v62 = vsub.f32 %v1773_v34, %v1719_v32  ;;  %v1816_v24 = vsub.f32 %v1773_v34, %v1720_v27 }
 0x205   : > { %v1777_v41 = vpop.permute.xlu1 %1776 }
 0x206   : > { %2574 = vset.pattern.permute.xlu1 %v5104_v56  ;;  %v1927_v56 = vmul.f32 %v1885_v16, %v5135_v52  ;;  %v1817_v1 = vsub.f32 %v1777_v41, %v1721_v50  ;;  %v1818_v15 = vsub.f32 %v1777_v41, %v1722_v6 }
 0x207   : > { %1848 = vperm.xlu1 %2574, %v2594_v19  }
 0x208   : > { %v1837_v3 = vpack.c.bf16 %v1817_v1, %v1815_v62  ;;  %v1838_v13 = vpack.c.bf16 %v1818_v15, %v1816_v24  ;;  %v2023_v0 = vsub.f32 %v4523_v2, %v1927_v56 }
 0x20a   : > { %v2061_v14 = vand.u32 2147450879, %v1837_v3  ;;  %v1985_v28 = vpop.permute.xlu1 %1984  ;;  %v2062_v63 = vand.u32 2147450879, %v1838_v13 }
 0x20b   : > { %2575 = vset.pattern.permute.xlu1 %v5004_v48  ;;  %v2025_v49 = vsub.f32 %v1985_v28, %v1929_v7  ;;  %v2026_v25 = vsub.f32 %v1985_v28, %v1930_v55 }
 0x20c   : > { %1732 = vperm.xlu1 %2575, %v2593_v44   ;;  %v2077_v58 = vsub.bf16 1065369472, %v2061_v14  ;;  %v2078_v45 = vsub.bf16 1065369472, %v2062_v63 }
 0x20d   : > { %v2045_v54 = vpack.c.bf16 %v2025_v49, %v2023_v0  ;;  %v2046_v33 = vpack.c.bf16 %v2026_v25, %v2024_v30 }
 0x20e   : > { %v2093_v21 = vmax.bf16 %v5004_v48, %v2077_v58  ;;  %v2094_v2 = vmax.bf16 %v5004_v48, %v2078_v45 }
 0x20f   : > { %v2109_v12 = vand.u32 2147450879, %v2045_v54  ;;  %v2110_v18 = vand.u32 2147450879, %v2046_v33 }
 0x210   : > { %2576 = vset.pattern.permute.xlu1 %v4919_v57 }
 0x211   : > { %1940 = vperm.xlu1 %2576, %v2593_v44   ;;  %v2125_v29 = vsub.bf16 1065369472, %v2109_v12  ;;  %v2126_v5 = vsub.bf16 1065369472, %v2110_v18  ;;  %v5245_v44 = vld [vmem:[#allocation40_spill] sm:$0xff] }
 0x212   : > { %v1717_v11 = vmul.f32 %v5245_v44, %v5238_v36  ;;  %v1718_v51 = vmul.f32 %v5245_v44, %v5240_v61 }
 0x213   : > { %v1662_v47 = vpop.permute.xlu1 %1661  ;;  %v2141_v57 = vmax.bf16 %v5004_v48, %v2125_v29  ;;  %v2142_v20 = vmax.bf16 %v5004_v48, %v2126_v5  ;;  %v5247_v5 = vld [vmem:[#allocation63_spill] sm:$0xff] }
 0x214   : > { %v1715_v39 = vmul.f32 %v1662_v47, %v5238_v36  ;;  %v1716_v31 = vmul.f32 %v1662_v47, %v5240_v61 }
 0x215   : > { %1944 = vperm.xlu1 %2576, %v2594_v19   ;;  %v2158_v22 = vmul.bf16 %v2142_v20, %v2094_v2  ;;  %v2157_v38 = vmul.bf16 %v2141_v57, %v2093_v21  ;;  %v1869_v2 = vpop.permute.xlu0 %1868 }
 0x216   : > { %v1811_v40 = vsub.f32 %v5246_v46, %v1715_v39  ;;  %v1812_v42 = vsub.f32 %v5246_v46, %v1716_v31 }
 0x217   : > { %2173 = vmatprep.subr.bf16.mxu0 %v2158_v22 }
 0x218   : > { %v1877_v60 = vpop.permute.xlu1 %1876  ;;  %2174 = vmatpush1.bf16.msra.mxu0 %v2157_v38  ;;  %v1919_v38 = vmul.f32 %v1869_v2, %v5135_v52 }
 0x219   : > { %v1923_v26 = vmul.f32 %v1877_v60, %v5135_v52  ;;  %v1924_v32 = vmul.f32 %v1877_v60, %v5138_v8 }
 0x21e   : > { %v1881_v9 = vpop.permute.xlu1 %1880 }
 0x21f   : > { %v1925_v53 = vmul.f32 %v1881_v9, %v5135_v52  ;;  %v1926_v43 = vmul.f32 %v1881_v9, %v5138_v8  ;;  %v1920_v9 = vmul.f32 %v1869_v2, %v5138_v8 }
 0x221   : > { %v2021_v27 = vsub.f32 %v4528_v4, %v1925_v53  ;;  %v2022_v59 = vsub.f32 %v4528_v4, %v1926_v43 }
 0x223   : > { %v1769_v17 = vpop.permute.xlu1 %1768 }
 0x224   : > { %v1813_v16 = vsub.f32 %v1769_v17, %v1717_v11  ;;  %v1814_v35 = vsub.f32 %v1769_v17, %v1718_v51 }
 0x226   : > { %v1835_v19 = vpack.c.bf16 %v1813_v16, %v1811_v40  ;;  %v1836_v34 = vpack.c.bf16 %v1814_v35, %v1812_v42 }
 0x228   : > { %v2059_v50 = vand.u32 2147450879, %v1835_v19  ;;  %v1973_v6 = vpop.permute.xlu1 %1972  ;;  %v2060_v56 = vand.u32 2147450879, %v1836_v34 }
 0x229   : > { %v2019_v41 = vsub.f32 %v1973_v6, %v1923_v26  ;;  %v2020_v62 = vsub.f32 %v1973_v6, %v1924_v32 }
 0x22a   : > { %v2075_v15 = vsub.bf16 1065369472, %v2059_v50  ;;  %v2076_v10 = vsub.bf16 1065369472, %v2060_v56 }
 0x22b   : > { %v2043_v24 = vpack.c.bf16 %v2021_v27, %v2019_v41  ;;  %v2044_v1 = vpack.c.bf16 %v2022_v59, %v2020_v62 }
 0x22c   : > { %v2091_v14 = vmax.bf16 %v5004_v48, %v2075_v15  ;;  %v2092_v63 = vmax.bf16 %v5004_v48, %v2076_v10  ;;  %v5248_v15 = vld [vmem:[#allocation42_spill] sm:$0xff] }
 0x22d   : > { %v2107_v7 = vand.u32 2147450879, %v2043_v24  ;;  %v2108_v55 = vand.u32 2147450879, %v2044_v1  ;;  %v1652_v3 = vpop.permute.xlu1 %1651  ;;  %v1707_v10 = vmul.f32 %v5248_v15, %v5238_v36 }
 0x22e   : > { %v1711_v33 = vmul.f32 %v1652_v3, %v5238_v36  ;;  %v1712_v58 = vmul.f32 %v1652_v3, %v5240_v61 }
 0x22f   : > { %v2123_v13 = vsub.bf16 1065369472, %v2107_v7  ;;  %v2124_v0 = vsub.bf16 1065369472, %v2108_v55  ;;  %v1708_v7 = vmul.f32 %v5248_v15, %v5240_v61 }
 0x231   : > { %v2139_v28 = vmax.bf16 %v5004_v48, %v2123_v13  ;;  %v1657_v30 = vpop.permute.xlu1 %1656  ;;  %v2140_v4 = vmax.bf16 %v5004_v48, %v2124_v0  ;;  %v1865_v13 = vpop.permute.xlu0 %1864 }
 0x232   : > { %v1713_v45 = vmul.f32 %v1657_v30, %v5238_v36  ;;  %v1714_v12 = vmul.f32 %v1657_v30, %v5240_v61 }
 0x233   : > { %v2156_v49 = vmul.bf16 %v2140_v4, %v2092_v63  ;;  %v2155_v25 = vmul.bf16 %v2139_v28, %v2091_v14 }
 0x234   : > { %v1809_v21 = vsub.f32 %v5247_v5, %v1713_v45  ;;  %v1810_v57 = vsub.f32 %v5247_v5, %v1714_v12 }
 0x235   : > { %2175 = vmatprep.subr.bf16.mxu0 %v2156_v49 }
 0x236   : > { %v1873_v54 = vpop.permute.xlu1 %1872  ;;  %2176 = vmatpush1.bf16.msra.mxu0 %v2155_v25  ;;  %v1917_v25 = vmul.f32 %v1865_v13, %v5135_v52 }
 0x237   : > { %v1921_v39 = vmul.f32 %v1873_v54, %v5135_v52  ;;  %v1922_v31 = vmul.f32 %v1873_v54, %v5138_v8  ;;  %v1918_v54 = vmul.f32 %v1865_v13, %v5138_v8 }
 0x23b   : > { %v1757_v18 = vpop.permute.xlu1 %1756 }
 0x23c   : > { %v1807_v47 = vsub.f32 %v1757_v18, %v1711_v33  ;;  %v1808_v29 = vsub.f32 %v1757_v18, %v1712_v58 }
 0x23e   : > { %v1833_v20 = vpack.c.bf16 %v1809_v21, %v1807_v47  ;;  %v1834_v60 = vpack.c.bf16 %v1810_v57, %v1808_v29 }
 0x240   : > { %v1965_v22 = vpop.permute.xlu1 %1964  ;;  %v2057_v44 = vand.u32 2147450879, %v1833_v20  ;;  %v2058_v11 = vand.u32 2147450879, %v1834_v60 }
 0x241   : > { %v2015_v46 = vsub.f32 %v1965_v22, %v1919_v38  ;;  %v2016_v40 = vsub.f32 %v1965_v22, %v1920_v9 }
 0x242   : > { %v2073_v35 = vsub.bf16 1065369472, %v2057_v44  ;;  %v2074_v43 = vsub.bf16 1065369472, %v2058_v11 }
 0x244   : > { %v1969_v51 = vpop.permute.xlu1 %1968  ;;  %v2089_v50 = vmax.bf16 %v5004_v48, %v2073_v35  ;;  %v2090_v59 = vmax.bf16 %v5004_v48, %v2074_v43 }
 0x245   : > { %v2017_v17 = vsub.f32 %v1969_v51, %v1921_v39  ;;  %v2018_v42 = vsub.f32 %v1969_v51, %v1922_v31 }
 0x247   : > { %v2041_v53 = vpack.c.bf16 %v2017_v17, %v2015_v46  ;;  %v2042_v16 = vpack.c.bf16 %v2018_v42, %v2016_v40  ;;  %v4638_v46 = vpop.permute.xlu0 %1844 }
 0x249   : > { %v2105_v19 = vand.u32 2147450879, %v2041_v53  ;;  %v2106_v34 = vand.u32 2147450879, %v2042_v16  ;;  %v1647_v26 = vpop.permute.xlu1 %1646 }
 0x24a   : > { %v1709_v55 = vmul.f32 %v1647_v26, %v5238_v36  ;;  %v1710_v3 = vmul.f32 %v1647_v26, %v5240_v61 }
 0x24b   : > { %v2121_v32 = vsub.bf16 1065369472, %v2105_v19  ;;  %v2122_v27 = vsub.bf16 1065369472, %v2106_v34  ;;  %v1741_v43 = vpop.permute.xlu0 %1740  ;;  %v5249_v19 = vld [vmem:[#allocation21_spill] sm:$0xff] }
 0x24c   : > { %v1705_v34 = vmul.f32 %v5249_v19, %v5238_v36  ;;  %v1706_v26 = vmul.f32 %v5249_v19, %v5240_v61 }
 0x24d   : > { %v2137_v6 = vmax.bf16 %v5004_v48, %v2121_v32  ;;  %v2138_v56 = vmax.bf16 %v5004_v48, %v2122_v27 }
 0x24e   : > { %v1861_v41 = vpop.permute.xlu1 %1860 }
 0x24f   : > { %v2154_v62 = vmul.bf16 %v2138_v56, %v2090_v59  ;;  %v2153_v24 = vmul.bf16 %v2137_v6, %v2089_v50  ;;  %v1915_v0 = vmul.f32 %v1861_v41, %v5135_v52  ;;  %v1916_v49 = vmul.f32 %v1861_v41, %v5138_v8 }
 0x251   : > { %2177 = vmatprep.subr.bf16.mxu0 %v2154_v62  ;;  %v2011_v45 = vsub.f32 %v4538_v23, %v1915_v0  ;;  %v2012_v47 = vsub.f32 %v4538_v23, %v1916_v49 }
 0x252   : > { %2178 = vmatpush1.bf16.msra.mxu0 %v2153_v24 }
 0x253   : > { %v1749_v1 = vpop.permute.xlu1 %1748 }
 0x254   : > { %v1803_v28 = vsub.f32 %v1749_v1, %v1707_v10  ;;  %v1804_v30 = vsub.f32 %v1749_v1, %v1708_v7 }
 0x257   : > { %v1753_v14 = vpop.permute.xlu1 %1752 }
 0x258   : > { %v1805_v63 = vsub.f32 %v1753_v14, %v1709_v55  ;;  %v1806_v4 = vsub.f32 %v1753_v14, %v1710_v3 }
 0x25a   : > { %v1831_v33 = vpack.c.bf16 %v1805_v63, %v1803_v28  ;;  %v1832_v58 = vpack.c.bf16 %v1806_v4, %v1804_v30 }
 0x25c   : > { %v2055_v12 = vand.u32 2147450879, %v1831_v33  ;;  %v1961_v18 = vpop.permute.xlu1 %1960  ;;  %v2056_v29 = vand.u32 2147450879, %v1832_v58 }
 0x25d   : > { %v2013_v5 = vsub.f32 %v1961_v18, %v1917_v25  ;;  %v2014_v21 = vsub.f32 %v1961_v18, %v1918_v54 }
 0x25e   : > { %v2071_v20 = vsub.bf16 1065369472, %v2055_v12  ;;  %v2072_v60 = vsub.bf16 1065369472, %v2056_v29 }
 0x25f   : > { %v2039_v57 = vpack.c.bf16 %v2013_v5, %v2011_v45  ;;  %v2040_v2 = vpack.c.bf16 %v2014_v21, %v2012_v47 }
 0x260   : > { %v2087_v44 = vmax.bf16 %v5004_v48, %v2071_v20  ;;  %v2088_v51 = vmax.bf16 %v5004_v48, %v2072_v60 }
 0x261   : > { %v2103_v22 = vand.u32 2147450879, %v2039_v57  ;;  %v2104_v38 = vand.u32 2147450879, %v2040_v2  ;;  %v1632_v9 = vpop.permute.xlu1 %1631 }
 0x262   : > { %v1703_v16 = vmul.f32 %v1632_v9, %v5238_v36  ;;  %v1704_v35 = vmul.f32 %v1632_v9, %v5240_v61 }
 0x263   : > { %v2119_v39 = vsub.bf16 1065369472, %v2103_v22  ;;  %v2120_v31 = vsub.bf16 1065369472, %v2104_v38  ;;  %v1737_v22 = vpop.permute.xlu0 %1736 }
 0x264   : > { %v1799_v32 = vsub.f32 %v1741_v43, %v1703_v16  ;;  %v1800_v50 = vsub.f32 %v1741_v43, %v1704_v35 }
 0x265   : > { %v2135_v11 = vmax.bf16 %v5004_v48, %v2119_v39  ;;  %v2136_v23 = vmax.bf16 %v5004_v48, %v2120_v31 }
 0x266   : > { %v1853_v40 = vpop.permute.xlu1 %1852 }
 0x267   : > { %v2152_v17 = vmul.bf16 %v2136_v23, %v2088_v51  ;;  %v2151_v42 = vmul.bf16 %v2135_v11, %v2087_v44  ;;  %v1911_v1 = vmul.f32 %v1853_v40, %v5135_v52  ;;  %v1912_v15 = vmul.f32 %v1853_v40, %v5138_v8 }
 0x268   : > { %v1907_v40 = vmul.f32 %v4638_v46, %v5135_v52 }
 0x269   : > { %2179 = vmatprep.subr.bf16.mxu0 %v2152_v17  ;;  %v1908_v17 = vmul.f32 %v4638_v46, %v5138_v8 }
 0x26a   : > { %v1857_v53 = vpop.permute.xlu1 %1856  ;;  %2180 = vmatpush1.bf16.msra.mxu0 %v2151_v42 }
 0x26b   : > { %v1913_v6 = vmul.f32 %v1857_v53, %v5135_v52  ;;  %v1914_v41 = vmul.f32 %v1857_v53, %v5138_v8 }
 0x26d   : > { %v2009_v10 = vsub.f32 %v4541_v37, %v1913_v6  ;;  %v2010_v3 = vsub.f32 %v4541_v37, %v1914_v41 }
 0x26f   : > { %v1745_v27 = vpop.permute.xlu1 %1744 }
 0x270   : > { %v1801_v59 = vsub.f32 %v1745_v27, %v1705_v34  ;;  %v1802_v56 = vsub.f32 %v1745_v27, %v1706_v26 }
 0x272   : > { %v1829_v62 = vpack.c.bf16 %v1801_v59, %v1799_v32  ;;  %v1830_v24 = vpack.c.bf16 %v1802_v56, %v1800_v50 }
 0x274   : > { %v2053_v7 = vand.u32 2147450879, %v1829_v62  ;;  %v1949_v55 = vpop.permute.xlu1 %1948  ;;  %v2054_v13 = vand.u32 2147450879, %v1830_v24 }
 0x275   : > { %v2007_v0 = vsub.f32 %v1949_v55, %v1911_v1  ;;  %v2008_v14 = vsub.f32 %v1949_v55, %v1912_v15  ;;  %v2581_v15 = vld [vmem:[%s3860_s16 + $0x8] ss:$12 sps:$4 sm:$0xff]   ;;  %v2722_v55 = vmov 1966171168   ;;  %s4677_s16 = sand.u32 1, %s2699_s0  }
 0x276   : > { %v2069_v63 = vsub.bf16 1065369472, %v2053_v7  ;;  %v2070_v4 = vsub.bf16 1065369472, %v2054_v13  ;;  %v5251_v7 = vld [vmem:[#allocation48_spill] sm:$0xff]  ;;  %v5252_v13 = vld [vmem:[#allocation55_spill] sm:$0xff] }
 0x277   : > { %v2037_v28 = vpack.c.bf16 %v2009_v10, %v2007_v0  ;;  %v2038_v30 = vpack.c.bf16 %v2010_v3, %v2008_v14  ;;  %v5250_v10 = vld [vmem:[#allocation61_spill] sm:$0xff]  ;;  %vm329_vm3 = vcmp.gt.f32.partialorder %v5251_v7, 0.0  ;;  %vm331_vm5 = vcmp.lt.f32.partialorder %v5251_v7, 48.0  ;;  %s2430_s12 = sshll.u32 %s4677_s16, 1  ;;  %s2269_s20 = scalar_lea.sflag [#allocation7], %s4677_s16 }
 0x278   : > { %v2085_v45 = vmax.bf16 %v5004_v48, %v2069_v63  ;;  %v2086_v47 = vmax.bf16 %v5004_v48, %v2070_v4  ;;  %vm326_vm0 = vcmp.gt.f32.partialorder %v5250_v10, 0.0  ;;  %vm327_vm1 = vcmp.lt.f32.partialorder %v5250_v10, 64.0  ;;  %s240_s14 = scalar_lea.vmem [#allocation6], %s2430_s12 }
 0x279   : > { %v2101_v49 = vand.u32 2147450879, %v2037_v28  ;;  %v2102_v25 = vand.u32 2147450879, %v2038_v30  ;;  %v1622_v54 = vpop.permute.xlu1 %1621  ;;  %vm328_vm2 = vmand %vm326_vm0, %vm327_vm1  ;;  %v2723_v14 = vmov 0.0   ;;  %v5253_v4 = vlaneseq  ;;  %s2303_s19 = sshll.u32 %s240_s14, 4  ;;  %s2304_s19 = int_to_ptr.vmem [resolvable:$true] %s2303_s19 }
 0x27a   : > { %v1699_v57 = vmul.f32 %v1622_v54, %v5238_v36  ;;  %v1700_v2 = vmul.f32 %v1622_v54, %v5240_v61  ;;  %vm330_vm4 = vmand %vm328_vm2, %vm329_vm3  ;;  %s2607_s21 = scalar_lea.vmem %s2304_s19, 32  ;;  %p2614_p6 = scmp.lt.s32.totalorder %s2304_s19, %s2612_s28 }
 0x27b   : > { %v2117_v33 = vsub.bf16 1065369472, %v2101_v49  ;;  %v2118_v58 = vsub.bf16 1065369472, %v2102_v25  ;;  %vm332_vm6 = vmand %vm330_vm4, %vm331_vm5  ;;  %vm2260_vm7 = vcmp.lt.s32.totalorder %v5253_v4, 256  ;;  %p2608_p3 = scmp.ne.s32.totalorder %s2304_s19, %s2607_s21  ;;  %p2615_p7 = scmp.lt.s32.totalorder %s2613_s29, %s2607_s21 }
 0x27c   : > { %v2439_v28 = vsel %vm332_vm6, 1.0, %v2723_v14 }
 0x27d   : > { %v2133_v12 = vmax.bf16 %v5004_v48, %v2117_v33  ;;  %v1627_v18 = vpop.permute.xlu1 %1626  ;;  %v2134_v37 = vmax.bf16 %v5004_v48, %v2118_v58  ;;  %p2609_p4 = pnand %p2608_p3, %p2801_p9  ;;  %p2616_p8 = por %p2615_p7, %p2614_p6 }
 0x27e   : > { %v1701_v20 = vmul.f32 %v1627_v18, %v5238_v36  ;;  %v1702_v60 = vmul.f32 %v1627_v18, %v5240_v61 }
 0x27f   : > { %v2150_v29 = vmul.bf16 %v2134_v37, %v2086_v47  ;;  %v2149_v5 = vmul.bf16 %v2133_v12, %v2085_v45  ;;  %p2610_p5 = pneg %p2609_p4 }
 0x280   : > { %v1797_v31 = vsub.f32 %v1737_v22, %v1701_v20  ;;  %v1798_v44 = vsub.f32 %v1737_v22, %v1702_v60 }
 0x281   : > { %2181 = vmatprep.subr.bf16.mxu0 %v2150_v29  ;;  %p2617_p10 = pnand %p2616_p8, %p2610_p5 }
 0x282   : > { %v1849_v21 = vpop.permute.xlu1 %1848  ;;  %2182 = vmatpush1.bf16.msra.mxu0 %v2149_v5 }
 0x283   : > { %v1909_v42 = vmul.f32 %v1849_v21, %v5135_v52  ;;  %v1910_v36 = vmul.f32 %v1849_v21, %v5138_v8 }
 0x287   : > { %v1733_v38 = vpop.permute.xlu1 %1732 }
 0x288   : > { %v1795_v9 = vsub.f32 %v1733_v38, %v1699_v57  ;;  %v1796_v39 = vsub.f32 %v1733_v38, %v1700_v2 }
 0x28a   : > { %v1827_v11 = vpack.c.bf16 %v1797_v31, %v1795_v9  ;;  %v1828_v51 = vpack.c.bf16 %v1798_v44, %v1796_v39 }
 0x28c   : > { %v1941_v23 = vpop.permute.xlu1 %1940  ;;  %v2051_v61 = vand.u32 2147450879, %v1827_v11  ;;  %v2052_v53 = vand.u32 2147450879, %v1828_v51 }
 0x28d   : > { %v2003_v35 = vsub.f32 %v1941_v23, %v1907_v40  ;;  %v2004_v43 = vsub.f32 %v1941_v23, %v1908_v17 }
 0x28e   : > { %v2067_v27 = vsub.bf16 1065369472, %v2051_v61  ;;  %v2068_v50 = vsub.bf16 1065369472, %v2052_v53 }
 0x290   : > { %v1945_v16 = vpop.permute.xlu1 %1944  ;;  %v2083_v52 = vmax.bf16 %v5004_v48, %v2067_v27  ;;  %v2084_v62 = vmax.bf16 %v5004_v48, %v2068_v50 }
 0x291   : > { %v2005_v19 = vsub.f32 %v1945_v16, %v1909_v42  ;;  %v2006_v34 = vsub.f32 %v1945_v16, %v1910_v36 }
 0x293   : > { %v2035_v26 = vpack.c.bf16 %v2005_v19, %v2003_v35  ;;  %v2036_v32 = vpack.c.bf16 %v2006_v34, %v2004_v43 }
 0x295   : > { %v2099_v6 = vand.u32 2147450879, %v2035_v26  ;;  %v2100_v59 = vand.u32 2147450879, %v2036_v32 }
 0x297   : > { %v2115_v56 = vsub.bf16 1065369472, %v2099_v6  ;;  %v2116_v46 = vsub.bf16 1065369472, %v2100_v59 }
 0x299   : > { %v2131_v8 = vmax.bf16 %v5004_v48, %v2115_v56  ;;  %v2132_v41 = vmax.bf16 %v5004_v48, %v2116_v46  ;;  %v2244_v48 = vunpack.c.l.s4 %v2722_v55 }
 0x29b   : > { %v2148_v24 = vmul.bf16 %v2132_v41, %v2084_v62  ;;  %v2147_v1 = vmul.bf16 %v2131_v8, %v2083_v52  ;;  %v2245_v3 = vunpack.c.0.s8 %v2244_v48 }
 0x29d   : > { %2183 = vmatprep.subr.bf16.mxu0 %v2148_v24  ;;  %v2248_v0 = vsub.s32 %v2245_v3, %v5252_v13 }
 0x29e   : > { %2184 = vmatpush1.bf16.msra.mxu0 %v2147_v1 }
 0x29f   : > { %v2249_v30 = vrot.slane %v2439_v28, %v2248_v0 }
 0x2a1   : > { %2202 = vmatmul.mubr.bf16.vlgmr.msra.gmra.mxu0 %v2581_v15  ;;  %v2256_v63 = vrot.slane %v2249_v30, %v2248_v0 }
 0x2a3   : > { %2262 = vst.msk [vmem:[%s240_s14] sm:$0x3] %vm2260_vm7, %v2256_v63 }
 0x2a4   : > { %2620 = shalt.err (!%p2617_p10)
}
 0x2a5   : > { %s2621_s6 = scalar_lea.hbm %s2301_s17, 32  ;;  %s2625_s12 = scalar_lea.hbm %s4761_s5, 64 }
 0x2a6   : > { %p2622_p11 = scmp.ne.s32.totalorder %s2301_s17, %s2621_s6  ;;  %p2626_p1 = scmp.lt.s32.totalorder %s2301_s17, %s4761_s5 }
 0x2a7   : > { %p2627_p2 = scmp.lt.s32.totalorder %s2625_s12, %s2621_s6 }
 0x2a8   : > { %p2623_p12 = pnand %p2622_p11, %p2801_p9 }
 0x2a9   : > { %p2628_p3 = por %p2627_p2, %p2626_p1 }
 0x2aa   : > { %p2624_p0 = pneg %p2623_p12 }
 0x2ac   : > { %p2629_p4 = pnand %p2628_p3, %p2624_p0 }
 0x2ae   : > { %2632 = shalt.err (!%p2629_p4)
}
 0x2af   : > { %2459 = dma.vmem_to_hbm [thread:$0]  (%p2801_p9), %s2304_s19, 32, %s2301_s17, %s2269_s20   ;;  %v1563_v49 = vpop.f32.mrf.mxu0  ;;  %v1610_v25 = vpop.f32.mrf.mxu1  ;;  %v5254_v45 = vld [vmem:[#allocation58_spill] sm:$0xff]  ;;  %v5255_v18 = vld [vmem:[#allocation59_spill] sm:$0xff] }
 0x2b0   : > { %v2220_v12 = vrot.slane %v2439_v28, %v5254_v45  ;;  %v2224_v47 = vrot.slane %v2439_v28, %v5255_v18  ;;  %v1611_v5 = vadd.f32 %v1610_v25, %v1563_v49  ;;  %s2429_s15 = sshll.u32 %s4677_s16, 5  ;;  %s2455_s19 = sshll.u32 %s2707_s25, 9 }
 0x2b1   : > { %v1565_v54 = vpop.f32.mrf.mxu0  ;;  %v1612_v33 = vpop.f32.mrf.mxu1  ;;  %s233_s18 = scalar_lea.vmem [#allocation4], %s2429_s15  ;;  %s4709_s22 = scalar_lea.hbm %s4760_s4, %s2455_s19 }
 0x2b2   : > { %v2230_v21 = vrot.slane %v2220_v12, %v5254_v45  ;;  %v1613_v2 = vadd.f32 %v1612_v33, %v1565_v54  ;;  %v2234_v60 = vrot.slane %v2224_v47, %v5254_v45  ;;  %s2284_s17 = sshll.u32 %s233_s18, 4  ;;  %s2264_s28 = scalar_lea.sflag [#allocation5], %s4677_s16  ;;  %s4704_s17 = int_to_ptr.vmem [resolvable:$true] %s2284_s17 }
 0x2b3   : > { %v1567_v58 = vpop.f32.mrf.mxu0  ;;  %v1614_v37 = vpop.f32.mrf.mxu1  ;;  %s2633_s29 = scalar_lea.vmem %s4704_s17, 512  ;;  %s2725_s25 = smov [#allocation4]  }
 0x2b4   : > { %v1615_v9 = vadd.f32 %v1614_v37, %v1567_v58  ;;  %p2634_p5 = scmp.ne.s32.totalorder %s4704_s17, %s2633_s29  ;;  %s2637_s6 = sshll.u32 %s2725_s25, 4  ;;  %s2638_s6 = int_to_ptr.vmem [resolvable:$false] %s2637_s6 }
 0x2b5   : > { %v1569_v29 = vpop.f32.mrf.mxu0  ;;  %v1616_v22 = vpop.f32.mrf.mxu1  ;;  %s2639_s8 = scalar_lea.vmem %s2638_s6, 1024  ;;  %p2640_p8 = scmp.lt.s32.totalorder %s4704_s17, %s2638_s6 }
 0x2b6   : > { %v1617_v11 = vadd.f32 %v1616_v22, %v1569_v29  ;;  %p2635_p6 = pnand %p2634_p5, %p2801_p9  ;;  %p2641_p10 = scmp.lt.s32.totalorder %s2639_s8, %s2633_s29 }
 0x2b8   : > { %p2636_p7 = pneg %p2635_p6  ;;  %p2642_p11 = por %p2641_p10, %p2640_p8 }
 0x2ba   : > { %p2643_p12 = pnand %p2642_p11, %p2636_p7 }
 0x361   : > { %v2203_v57 = vpop.f32.mrf.mxu0 }
 0x362   : > { %v2212_v20 = vadd.f32 %v2203_v57, %v1611_v5 }
 0x363   : > { %v2205_v38 = vpop.f32.mrf.mxu0 }
 0x364   : > { %v2235_v39 = vmul.f32 %v2230_v21, %v2212_v20  ;;  %v2213_v31 = vadd.f32 %v2205_v38, %v1613_v2 }
 0x365   : > { %v2207_v44 = vpop.f32.mrf.mxu0 }
 0x366   : > { %2239 = vst [vmem:[%s233_s18] sm:$0xff] %v2235_v39  ;;  %v2236_v51 = vmul.f32 %v2234_v60, %v2213_v31  ;;  %v2214_v23 = vadd.f32 %v2207_v44, %v1615_v9 }
 0x367   : > { %v2209_v40 = vpop.f32.mrf.mxu0 }
 0x368   : > { %2240 = vst [vmem:[%s233_s18 + $0x8] sm:$0xff] %v2236_v51  ;;  %v2237_v17 = vmul.f32 %v2230_v21, %v2214_v23  ;;  %v2215_v42 = vadd.f32 %v2209_v40, %v1617_v11 }
 0x36a   : > { %2241 = vst [vmem:[%s233_s18 + $0x10] sm:$0xff] %v2237_v17  ;;  %v2238_v36 = vmul.f32 %v2234_v60, %v2215_v42 }
 0x36c   : > { %2242 = vst [vmem:[%s233_s18 + $0x18] sm:$0xff] %v2238_v36 }
 0x36d   : > { %2646 = shalt.err (!%p2643_p12)
}
 0x36e   : > { %s2647_s11 = scalar_lea.hbm %s4709_s22, 512  ;;  %s2651_s14 = scalar_lea.hbm %s4760_s4, 1024 }
 0x36f   : > { %p2648_p0 = scmp.ne.s32.totalorder %s4709_s22, %s2647_s11  ;;  %p2652_p3 = scmp.lt.s32.totalorder %s4709_s22, %s4760_s4 }
 0x370   : > { %p2653_p4 = scmp.lt.s32.totalorder %s2651_s14, %s2647_s11 }
 0x371   : > { %p2649_p1 = pnand %p2648_p0, %p2801_p9 }
 0x372   : > { %p2654_p5 = por %p2653_p4, %p2652_p3 }
 0x373   : > { %p2650_p2 = pneg %p2649_p1 }
 0x375   : > { %p2655_p6 = pnand %p2654_p5, %p2650_p2 }
 0x377   : > { %2658 = shalt.err (!%p2655_p6)
}
 0x378   : > { %s2726_s19 = smov 256   ;;  %s2727_s20 = smov 16  }
 0x379   : > { %2458 = dma.vmem_to_hbm [thread:$0]  (%p2801_p9), %s4704_s17, 512, %s4709_s22, %s2264_s28, %s2726_s19, %s2726_s19, %s2727_s20  }
 0x37a PF: > { %p2469_p7 = scmp.ge.s32.totalorder %s2715_s27, 2  ;;  %s2315_s21 = sand.u32 1, %s2695_s23  }
 0x37b   : > { %s2316_s29 = scalar_lea.sflag [#allocation5], %s2315_s21 }
 0x37c   : > { %p2463_p8 = pnand %p2469_p7, %p2808_p13 }
 0x37e   : > { %p2464_p10 = pneg %p2463_p8 }
 0x380   : > { %2686 = dma.done.wait (%p2464_p10), %s2316_s29, 512  }
 0x381   : > { %2688 = vsyncadd (%p2464_p10), %s2316_s29, 4294966784  ;;  %s2325_s25 = scalar_lea.sflag [#allocation7], %s2315_s21 }
 0x382   : > { %2690 = dma.done.wait (%p2464_p10), %s2325_s25, 32  }
 0x383   : > { %2692 = vsyncadd (%p2464_p10), %s2325_s25, 4294967264  ;;  %s28_s27 = sadd.s32 1, %s2715_s27   ;;  %s5256_s23 = smov %s2699_s0 }
 0x384   : > { %p25_p11 = scmp.ge.s32.totalorder %s28_s27, 4   ;;  %s5257_s0 = smov %s2703_s24 }
 0x385   : > { %s5258_s24 = smov %s2814_s10  ;;  %s5259_s25 = smov %s2711_s26 }
 0x386   : > { %s5260_s26 = smov %s5262_s30  ;;  %27 = sbr.rel (!%p25_p11) target bundleno = 21 (0x15), region = 87 }
 0x38b   :  { %2330 = vsyncpa [#allocation5], 1 }
 0x38c   :  { %2332 = vsyncpa [#allocation5 + $0x1], 1 }
 0x38d   :  { %2333 = vsyncpa [#allocation7], 1 }
 0x38e   :  { %2335 = vsyncpa [#allocation7 + $0x1], 1 }

</bundles_post_ra>
